<compile_context>
chip_gen: v7x
topology: tpu7x:2x2x1
jax: 0.10.0
libtpu: 0.0.40
codegen_flags: <defaults>
</compile_context>

<pallas_src>
import functools
import math

import jax
import jax.numpy as jnp
import numpy as np
from jax import lax
from jax.experimental import pallas as pl
from jax.experimental.pallas import tpu as pltpu


def _transformer_block_kernel(lens_ref, x_full_ref, x_tile_ref, gamma_ref, beta_ref,
                              wqkv_ref, wo_ref, o_ref, qh_s, kh_s, vh_s,
                              *, kv_block: int, approx_recip: bool):
    b = pl.program_id(0)
    qi = pl.program_id(1)

    heads, S, d_k = qh_s.shape
    H = heads * d_k
    Sq = x_tile_ref.shape[1]
    Tk = kv_block
    n_kv = S // Tk
    cd = qh_s.dtype                       # MXU-operand / scratch compute dtype
    scale = 1.0 / math.sqrt(d_k)
    seq_len = lens_ref[b]                 # valid tokens of this batch row (SMEM)

    # ---- once per batch row: LayerNorm + fused QKV projection + head split ----
    @pl.when(qi == 0)
    def _():
        x = x_full_ref[0]                                      # (S, H) f32
        mu = jnp.mean(x, axis=-1, keepdims=True)
        xc = x - mu
        var = jnp.mean(xc * xc, axis=-1, keepdims=True)
        y = xc * lax.rsqrt(var + 1e-5) * gamma_ref[...] + beta_ref[...]
        qkv = jnp.dot(y.astype(cd), wqkv_ref[...],
                      preferred_element_type=jnp.float32).astype(cd)   # (S, 3H)
        # Head split via static 2-D lane slices, paid once per batch row
        # (amortized over all query blocks; no 3-D transpose in the kernel).
        # TODO(synk): for d_k < 128 the head-major scratch pads the lane dim;
        # head-packing (feedback item on MXU width) would remove that waste.
        for h in range(heads):
            qh_s[h] = qkv[:, h * d_k:(h + 1) * d_k]
            kh_s[h] = qkv[:, H + h * d_k:H + (h + 1) * d_k]
            vh_s[h] = qkv[:, 2 * H + h * d_k:2 * H + (h + 1) * d_k]

    # ---- per query block: online-softmax attention over KV chunks -------------
    row0 = pl.multiple_of(qi * Sq, Sq)
    q_rows = row0 + lax.broadcasted_iota(jnp.int32, (Sq, 1), 0)
    row_keep = (q_rows < seq_len).astype(jnp.float32)          # (Sq, 1)

    ctx_heads = []
    for h in range(heads):
        q_h = qh_s[h, pl.ds(row0, Sq), :]                      # (Sq, d_k)

        def kv_step(j, carry):
            m, l, acc = carry
            col0 = pl.multiple_of(j * Tk, Tk)
            k_j = kh_s[h, pl.ds(col0, Tk), :]                  # (Tk, d_k)
            v_j = vh_s[h, pl.ds(col0, Tk), :]
            # q k^T without transposing k (contract on d_k).
            s = lax.dot_general(q_h, k_j, (((1,), (1,)), ((), ())),
                                preferred_element_type=jnp.float32) * scale
            col_ids = col0 + lax.broadcasted_iota(jnp.int32, (1, Tk), 1)
            s = s + jnp.where(col_ids < seq_len, 0.0, -1e9)    # additive mask
            m_new = jnp.maximum(m, jnp.max(s, axis=-1, keepdims=True))
            alpha = jnp.exp(m - m_new)
            p = jnp.exp(s - m_new)
            l_new = alpha * l + jnp.sum(p, axis=-1, keepdims=True)
            acc_new = alpha * acc + jnp.dot(p.astype(cd), v_j,
                                            preferred_element_type=jnp.float32)
            return m_new, l_new, acc_new

        m0 = jnp.full((Sq, 1), -jnp.inf, dtype=jnp.float32)
        l0 = jnp.zeros((Sq, 1), dtype=jnp.float32)
        a0 = jnp.zeros((Sq, d_k), dtype=jnp.float32)
        # TODO(synk): the KV loop runs all S//Tk chunks; fully-masked chunks
        # contribute exactly zero, a dynamic trip count could skip them.
        _, l, acc = lax.fori_loop(0, n_kv, kv_step, (m0, l0, a0))
        ctx_heads.append(acc * pl.reciprocal(l, approx=approx_recip))

    ctx = jnp.concatenate(ctx_heads, axis=-1)                  # (Sq, H) = concat(heads)
    attn = jnp.dot(ctx.astype(cd), wo_ref[...],
                   preferred_element_type=jnp.float32)         # (Sq, H)
    # masked_fill(p, 0) after softmax only changes fully-padded query rows;
    # since Wo has no bias, zeroing those output rows is exactly equivalent.
    attn = attn * row_keep
    # TODO(synk): nn.Dropout on p / on the sublayer output is identity at inference.
    o_ref[0] = x_tile_ref[0] + attn                            # residual


def prepare_params(gamma, beta, wq, wk, wv, wo, *, compute_dtype=jnp.float32):
    """One-time parameter prep (hoisted out of the per-call wrapper): fuse
    Wq|Wk|Wv into a single (H, 3H) operand and pre-cast MXU weights."""
    wqkv = jnp.concatenate([wq, wk, wv], axis=1).astype(compute_dtype)
    return (gamma.astype(jnp.float32), beta.astype(jnp.float32),
            wqkv, wo.astype(compute_dtype))


def _vmem_limit_bytes():
    # Explicit scoped-VMEM limit (defaults are only 16/32 MiB); chip-aware so a
    # v7x (64 MiB physical) is not over-asked.
    try:
        cap = pltpu.get_tpu_info().vmem_capacity_bytes
        return int(min(100 * 1024 * 1024, cap - cap // 8))
    except Exception:
        return 64 * 1024 * 1024


def _build_call(*, B, S, H, Sq, num_heads, compute_dtype, kernel,
                single_buffer_consts):
    d_k = H // num_heads
    const_kw = {"pipeline_mode": pl.Buffered(1)} if single_buffer_consts else {}
    grid_spec = pltpu.PrefetchScalarGridSpec(
        num_scalar_prefetch=1,                      # lengths -> SMEM
        grid=(B, S // Sq),
        in_specs=[
            # full sequence (K/V path); index is constant across the query axis
            # so the pipeline re-DMAs it only when the batch index changes.
            pl.BlockSpec((1, S, H), lambda b, q, lens: (b, 0, 0)),
            # query tile (residual path)
            pl.BlockSpec((1, Sq, H), lambda b, q, lens: (b, q, 0)),
            # constant operands: single-buffered (their index never changes)
            pl.BlockSpec((1, H), lambda b, q, lens: (0, 0), **const_kw),       # gamma
            pl.BlockSpec((1, H), lambda b, q, lens: (0, 0), **const_kw),       # beta
            pl.BlockSpec((H, 3 * H), lambda b, q, lens: (0, 0), **const_kw),   # Wqkv
            pl.BlockSpec((H, H), lambda b, q, lens: (0, 0), **const_kw),       # Wo
        ],
        out_specs=pl.BlockSpec((1, Sq, H), lambda b, q, lens: (b, q, 0)),
        # head-major Q/K/V scratch, persistent across query blocks of one batch row
        scratch_shapes=[pltpu.VMEM((num_heads, S, d_k), compute_dtype)] * 3,
    )
    return pl.pallas_call(
        kernel,
        out_shape=jax.ShapeDtypeStruct((B, S, H), jnp.float32),
        grid_spec=grid_spec,
        compiler_params=pltpu.CompilerParams(
            # batch axis parallel (megacore); the query axis must stay serial
            # because the per-batch K/V scratch is produced at qi == 0.
            # TODO(synk): when B == 1 on v7x, recompute K/V per query block so
            # the query axis can also be "parallel" and both TensorCores run.
            dimension_semantics=("parallel", "arbitrary"),
            vmem_limit_bytes=_vmem_limit_bytes()),
    )


def transformer_block(x, lengths, gamma, beta, wqkv, wo, *, num_heads,
                      compute_dtype=jnp.float32, q_block=128, kv_block=256,
                      approx_recip=None):
    """x: (B, S, H) f32; lengths: (B,) int32 valid-token counts (padding mask);
    wqkv: (H, 3H) pre-fused [Wq|Wk|Wv]; gamma/beta: (1, H) LayerNorm params."""
    B, S, H = x.shape
    assert H % num_heads == 0
    Sq = min(q_block, S)
    Tk = min(kv_block, S)
    # TODO(synk): ragged S (not divisible by the tile sizes) is not handled.
    assert S % Sq == 0 and S % Tk == 0
    # TODO(synk): H that is not a multiple of 128 produces masked partial stores
    # on the output path; pad the hidden dim for best throughput.
    if approx_recip is None:
        approx_recip = compute_dtype == jnp.bfloat16

    kernel = functools.partial(_transformer_block_kernel,
                               kv_block=Tk, approx_recip=approx_recip)
    args = (lengths.astype(jnp.int32), x, x, gamma, beta, wqkv, wo)
    common = dict(B=B, S=S, H=H, Sq=Sq, num_heads=num_heads,
                  compute_dtype=compute_dtype, kernel=kernel)
    try:
        return _build_call(single_buffer_consts=True, **common)(*args)
    except Exception:
        # TODO(synk): pl.Buffered(1) single-buffering rejected by this jax/Mosaic
        # version; fall back to default double-buffered constant operands.
        return _build_call(single_buffer_consts=False, **common)(*args)


def _reference(x, mask, gamma, beta, wq, wk, wv, wo, *, num_heads):
    # pure-JAX reference of the PyTorch module's math (dense mask path)
    HI = lax.Precision.HIGHEST
    B, S, H = x.shape
    d_k = H // num_heads
    mu = jnp.mean(x, axis=-1, keepdims=True)
    var = jnp.mean((x - mu) ** 2, axis=-1, keepdims=True)
    y = (x - mu) * lax.rsqrt(var + 1e-5) * gamma[0] + beta[0]
    q = jnp.dot(y, wq, precision=HI).reshape(B, S, num_heads, d_k).transpose(0, 2, 1, 3)
    k = jnp.dot(y, wk, precision=HI).reshape(B, S, num_heads, d_k).transpose(0, 2, 1, 3)
    v = jnp.dot(y, wv, precision=HI).reshape(B, S, num_heads, d_k).transpose(0, 2, 1, 3)
    scores = jnp.einsum("bhqd,bhkd->bhqk", q, k, precision=HI) / math.sqrt(d_k)
    m = mask[:, None, :, :]
    scores = jnp.where(m == 0, -1e9, scores)
    p = jax.nn.softmax(scores, axis=-1)
    p = jnp.where(m == 0, 0.0, p)
    ctx = jnp.einsum("bhqk,bhkd->bhqd", p, v,
                     precision=HI).transpose(0, 2, 1, 3).reshape(B, S, H)
    return x + jnp.dot(ctx, wo, precision=HI)


if __name__ == "__main__":
    B, S, H, HEADS = 2, 8, 32, 4

    key = jax.random.PRNGKey(0)
    kx, kq, kk, kv, ko, kg, kb = jax.random.split(key, 7)

    x = jax.random.normal(kx, (B, S, H), dtype=jnp.float32)
    # padding mask: batch 0 keeps all 8 tokens, batch 1 keeps the first 5
    lengths = jnp.array([8, 5], dtype=jnp.int32)
    pad = (jnp.arange(S)[None, :] < lengths[:, None]).astype(jnp.float32)   # (B, S)
    mask = jnp.einsum("bi,bj->bij", pad, pad)   # dense (B,S,S) mask, reference only

    scale = 1.0 / math.sqrt(H)
    wq = jax.random.normal(kq, (H, H), dtype=jnp.float32) * scale
    wk = jax.random.normal(kk, (H, H), dtype=jnp.float32) * scale
    wv = jax.random.normal(kv, (H, H), dtype=jnp.float32) * scale
    wo = jax.random.normal(ko, (H, H), dtype=jnp.float32) * scale
    gamma = 1.0 + 0.1 * jax.random.normal(kg, (1, H), dtype=jnp.float32)
    beta = 0.1 * jax.random.normal(kb, (1, H), dtype=jnp.float32)

    ref = _reference(x, mask, gamma, beta, wq, wk, wv, wo, num_heads=HEADS)

    # f32 MXU operands: faithful to the module, tight tolerance.
    g32, b32, wqkv32, wo32 = prepare_params(gamma, beta, wq, wk, wv, wo,
                                            compute_dtype=jnp.float32)
    out_f32 = transformer_block(x, lengths, g32, b32, wqkv32, wo32,
                                num_heads=HEADS, compute_dtype=jnp.float32)
    out_f32 = jax.block_until_ready(out_f32)
    np.testing.assert_allclose(np.asarray(out_f32), np.asarray(ref),
                               rtol=1e-4, atol=1e-4)

    # bf16 MXU operands with f32 accumulation: v6e/v7x fast path (precision
    # mode, not bit-faithful to the f32 module; loose tolerance).
    g16, b16, wqkv16, wo16 = prepare_params(gamma, beta, wq, wk, wv, wo,
                                            compute_dtype=jnp.bfloat16)
    out_bf16 = transformer_block(x, lengths, g16, b16, wqkv16, wo16,
                                 num_heads=HEADS, compute_dtype=jnp.bfloat16)
    out_bf16 = jax.block_until_ready(out_bf16)
    np.testing.assert_allclose(np.asarray(out_bf16), np.asarray(ref),
                               rtol=2e-1, atol=2e-1)

    print("KERNEL_OK")
</pallas_src>

<mosaic_0001>
module attributes {stable_mosaic.version = 11 : i64} {
  func.func @_transformer_block_kernel(%arg0: i32, %arg1: i32, %arg2: memref<2xi32, #tpu.memory_space<smem>>, %arg3: memref<1x8x32xf32, #tpu.memory_space<vmem>>, %arg4: memref<1x8x32xf32, #tpu.memory_space<vmem>>, %arg5: memref<1x32xf32, #tpu.memory_space<vmem>>, %arg6: memref<1x32xf32, #tpu.memory_space<vmem>>, %arg7: memref<32x96xf32, #tpu.memory_space<vmem>>, %arg8: memref<32x32xf32, #tpu.memory_space<vmem>>, %arg9: memref<1x8x32xf32, #tpu.memory_space<vmem>>, %arg10: memref<4x8x8xf32, #tpu.memory_space<vmem>>, %arg11: memref<4x8x8xf32, #tpu.memory_space<vmem>>, %arg12: memref<4x8x8xf32, #tpu.memory_space<vmem>>) attributes {dimension_semantics = [#tpu.dimension_semantics<parallel>, #tpu.dimension_semantics<arbitrary>], iteration_bounds = array<i64: 2, 1>, scalar_prefetch = 1 : i64, scratch_operands = 3 : i64, tpu.core_type = #tpu.core_type<tc>, window_params = [{transform_indices = @transform_0, window_bounds = array<i64: 1, 8, 32>}, {transform_indices = @transform_1, window_bounds = array<i64: 1, 8, 32>}, {pipeline_mode = #tpu.pipeline_mode<synchronous>, transform_indices = @transform_2, window_bounds = array<i64: 1, 32>}, {pipeline_mode = #tpu.pipeline_mode<synchronous>, transform_indices = @transform_3, window_bounds = array<i64: 1, 32>}, {pipeline_mode = #tpu.pipeline_mode<synchronous>, transform_indices = @transform_4, window_bounds = array<i64: 32, 96>}, {pipeline_mode = #tpu.pipeline_mode<synchronous>, transform_indices = @transform_5, window_bounds = array<i64: 32, 32>}, {transform_indices = @transform_6, window_bounds = array<i64: 1, 8, 32>}]} {
    %0 = arith.index_cast %arg0 : i32 to index
    %1 = memref.load %arg2[%0] : memref<2xi32, #tpu.memory_space<smem>>
    %c0_i32 = arith.constant 0 : i32
    %2 = arith.cmpi eq, %arg1, %c0_i32 : i32
    %3 = arith.extui %2 : i1 to i32
    %c0_i32_0 = arith.constant 0 : i32
    %4 = arith.cmpi ne, %3, %c0_i32_0 : i32
    scf.if %4 {
      %c0_80 = arith.constant 0 : index
      %c0_81 = arith.constant 0 : index
      %c0_82 = arith.constant 0 : index
      %209 = vector.load %arg3[%c0_80, %c0_81, %c0_82] : memref<1x8x32xf32, #tpu.memory_space<vmem>>, vector<1x8x32xf32>
      %210 = vector.shape_cast %209 : vector<1x8x32xf32> to vector<8x32xf32>
      %cst_83 = arith.constant dense<0.000000e+00> : vector<8xf32>
      %211 = vector.multi_reduction <add>, %210, %cst_83 [1] : vector<8x32xf32> to vector<8xf32>
      %212 = vector.shape_cast %211 : vector<8xf32> to vector<8x1xf32>
      %cst_84 = arith.constant 3.200000e+01 : f32
      %213 = vector.broadcast %cst_84 : f32 to vector<8x1xf32>
      %214 = arith.divf %212, %213 : vector<8x1xf32>
      %215 = vector.broadcast %214 : vector<8x1xf32> to vector<8x32xf32>
      %216 = arith.subf %210, %215 : vector<8x32xf32>
      %217 = arith.mulf %216, %216 : vector<8x32xf32>
      %cst_85 = arith.constant dense<0.000000e+00> : vector<8xf32>
      %218 = vector.multi_reduction <add>, %217, %cst_85 [1] : vector<8x32xf32> to vector<8xf32>
      %219 = vector.shape_cast %218 : vector<8xf32> to vector<8x1xf32>
      %cst_86 = arith.constant 3.200000e+01 : f32
      %220 = vector.broadcast %cst_86 : f32 to vector<8x1xf32>
      %221 = arith.divf %219, %220 : vector<8x1xf32>
      %cst_87 = arith.constant 9.99999974E-6 : f32
      %222 = vector.broadcast %cst_87 : f32 to vector<8x1xf32>
      %223 = arith.addf %221, %222 : vector<8x1xf32>
      %224 = math.rsqrt %223 : vector<8x1xf32>
      %225 = vector.broadcast %224 : vector<8x1xf32> to vector<8x32xf32>
      %226 = arith.mulf %216, %225 : vector<8x32xf32>
      %c0_88 = arith.constant 0 : index
      %c0_89 = arith.constant 0 : index
      %227 = vector.load %arg5[%c0_88, %c0_89] : memref<1x32xf32, #tpu.memory_space<vmem>>, vector<1x32xf32>
      %228 = vector.broadcast %227 : vector<1x32xf32> to vector<8x32xf32>
      %229 = arith.mulf %226, %228 : vector<8x32xf32>
      %c0_90 = arith.constant 0 : index
      %c0_91 = arith.constant 0 : index
      %230 = vector.load %arg6[%c0_90, %c0_91] : memref<1x32xf32, #tpu.memory_space<vmem>>, vector<1x32xf32>
      %231 = vector.broadcast %230 : vector<1x32xf32> to vector<8x32xf32>
      %232 = arith.addf %229, %231 : vector<8x32xf32>
      %c0_92 = arith.constant 0 : index
      %c0_93 = arith.constant 0 : index
      %233 = vector.load %arg7[%c0_92, %c0_93] : memref<32x96xf32, #tpu.memory_space<vmem>>, vector<32x96xf32>
      %cst_94 = arith.constant dense<0.000000e+00> : vector<8x96xf32>
      %234 = tpu.matmul %232, %233, %cst_94 {dimension_numbers = #tpu.dot_dimension_numbers<[1], [0], [0], [1], [0, 0, 1, 1], [], []>} : vector<8x32xf32>, vector<32x96xf32>, vector<8x96xf32> -> vector<8x96xf32>
      %235 = vector.extract_strided_slice %234 {offsets = [0, 0], sizes = [8, 8], strides = [1, 1]} : vector<8x96xf32> to vector<8x8xf32>
      %c0_95 = arith.constant 0 : index
      %c0_96 = arith.constant 0 : index
      %c0_97 = arith.constant 0 : index
      %236 = vector.load %arg10[%c0_95, %c0_96, %c0_97] : memref<4x8x8xf32, #tpu.memory_space<vmem>>, vector<1x8x8xf32>
      %237 = vector.shape_cast %236 : vector<1x8x8xf32> to vector<8x8xf32>
      %238 = vector.shape_cast %235 : vector<8x8xf32> to vector<1x8x8xf32>
      tpu.vector_store %arg10[%c0_95, %c0_96, %c0_97], %238 {strides = array<i32>} : memref<4x8x8xf32, #tpu.memory_space<vmem>>, vector<1x8x8xf32>,
      %239 = vector.extract_strided_slice %234 {offsets = [0, 32], sizes = [8, 8], strides = [1, 1]} : vector<8x96xf32> to vector<8x8xf32>
      %c0_98 = arith.constant 0 : index
      %c0_99 = arith.constant 0 : index
      %c0_100 = arith.constant 0 : index
      %240 = vector.load %arg11[%c0_98, %c0_99, %c0_100] : memref<4x8x8xf32, #tpu.memory_space<vmem>>, vector<1x8x8xf32>
      %241 = vector.shape_cast %240 : vector<1x8x8xf32> to vector<8x8xf32>
      %242 = vector.shape_cast %239 : vector<8x8xf32> to vector<1x8x8xf32>
      tpu.vector_store %arg11[%c0_98, %c0_99, %c0_100], %242 {strides = array<i32>} : memref<4x8x8xf32, #tpu.memory_space<vmem>>, vector<1x8x8xf32>,
      %243 = vector.extract_strided_slice %234 {offsets = [0, 64], sizes = [8, 8], strides = [1, 1]} : vector<8x96xf32> to vector<8x8xf32>
      %c0_101 = arith.constant 0 : index
      %c0_102 = arith.constant 0 : index
      %c0_103 = arith.constant 0 : index
      %244 = vector.load %arg12[%c0_101, %c0_102, %c0_103] : memref<4x8x8xf32, #tpu.memory_space<vmem>>, vector<1x8x8xf32>
      %245 = vector.shape_cast %244 : vector<1x8x8xf32> to vector<8x8xf32>
      %246 = vector.shape_cast %243 : vector<8x8xf32> to vector<1x8x8xf32>
      tpu.vector_store %arg12[%c0_101, %c0_102, %c0_103], %246 {strides = array<i32>} : memref<4x8x8xf32, #tpu.memory_space<vmem>>, vector<1x8x8xf32>,
      %247 = vector.extract_strided_slice %234 {offsets = [0, 8], sizes = [8, 8], strides = [1, 1]} : vector<8x96xf32> to vector<8x8xf32>
      %c1_104 = arith.constant 1 : index
      %c0_105 = arith.constant 0 : index
      %c0_106 = arith.constant 0 : index
      %248 = vector.load %arg10[%c1_104, %c0_105, %c0_106] : memref<4x8x8xf32, #tpu.memory_space<vmem>>, vector<1x8x8xf32>
      %249 = vector.shape_cast %248 : vector<1x8x8xf32> to vector<8x8xf32>
      %250 = vector.shape_cast %247 : vector<8x8xf32> to vector<1x8x8xf32>
      tpu.vector_store %arg10[%c1_104, %c0_105, %c0_106], %250 {strides = array<i32>} : memref<4x8x8xf32, #tpu.memory_space<vmem>>, vector<1x8x8xf32>,
      %251 = vector.extract_strided_slice %234 {offsets = [0, 40], sizes = [8, 8], strides = [1, 1]} : vector<8x96xf32> to vector<8x8xf32>
      %c1_107 = arith.constant 1 : index
      %c0_108 = arith.constant 0 : index
      %c0_109 = arith.constant 0 : index
      %252 = vector.load %arg11[%c1_107, %c0_108, %c0_109] : memref<4x8x8xf32, #tpu.memory_space<vmem>>, vector<1x8x8xf32>
      %253 = vector.shape_cast %252 : vector<1x8x8xf32> to vector<8x8xf32>
      %254 = vector.shape_cast %251 : vector<8x8xf32> to vector<1x8x8xf32>
      tpu.vector_store %arg11[%c1_107, %c0_108, %c0_109], %254 {strides = array<i32>} : memref<4x8x8xf32, #tpu.memory_space<vmem>>, vector<1x8x8xf32>,
      %255 = vector.extract_strided_slice %234 {offsets = [0, 72], sizes = [8, 8], strides = [1, 1]} : vector<8x96xf32> to vector<8x8xf32>
      %c1_110 = arith.constant 1 : index
      %c0_111 = arith.constant 0 : index
      %c0_112 = arith.constant 0 : index
      %256 = vector.load %arg12[%c1_110, %c0_111, %c0_112] : memref<4x8x8xf32, #tpu.memory_space<vmem>>, vector<1x8x8xf32>
      %257 = vector.shape_cast %256 : vector<1x8x8xf32> to vector<8x8xf32>
      %258 = vector.shape_cast %255 : vector<8x8xf32> to vector<1x8x8xf32>
      tpu.vector_store %arg12[%c1_110, %c0_111, %c0_112], %258 {strides = array<i32>} : memref<4x8x8xf32, #tpu.memory_space<vmem>>, vector<1x8x8xf32>,
      %259 = vector.extract_strided_slice %234 {offsets = [0, 16], sizes = [8, 8], strides = [1, 1]} : vector<8x96xf32> to vector<8x8xf32>
      %c2_113 = arith.constant 2 : index
      %c0_114 = arith.constant 0 : index
      %c0_115 = arith.constant 0 : index
      %260 = vector.load %arg10[%c2_113, %c0_114, %c0_115] : memref<4x8x8xf32, #tpu.memory_space<vmem>>, vector<1x8x8xf32>
      %261 = vector.shape_cast %260 : vector<1x8x8xf32> to vector<8x8xf32>
      %262 = vector.shape_cast %259 : vector<8x8xf32> to vector<1x8x8xf32>
      tpu.vector_store %arg10[%c2_113, %c0_114, %c0_115], %262 {strides = array<i32>} : memref<4x8x8xf32, #tpu.memory_space<vmem>>, vector<1x8x8xf32>,
      %263 = vector.extract_strided_slice %234 {offsets = [0, 48], sizes = [8, 8], strides = [1, 1]} : vector<8x96xf32> to vector<8x8xf32>
      %c2_116 = arith.constant 2 : index
      %c0_117 = arith.constant 0 : index
      %c0_118 = arith.constant 0 : index
      %264 = vector.load %arg11[%c2_116, %c0_117, %c0_118] : memref<4x8x8xf32, #tpu.memory_space<vmem>>, vector<1x8x8xf32>
      %265 = vector.shape_cast %264 : vector<1x8x8xf32> to vector<8x8xf32>
      %266 = vector.shape_cast %263 : vector<8x8xf32> to vector<1x8x8xf32>
      tpu.vector_store %arg11[%c2_116, %c0_117, %c0_118], %266 {strides = array<i32>} : memref<4x8x8xf32, #tpu.memory_space<vmem>>, vector<1x8x8xf32>,
      %267 = vector.extract_strided_slice %234 {offsets = [0, 80], sizes = [8, 8], strides = [1, 1]} : vector<8x96xf32> to vector<8x8xf32>
      %c2_119 = arith.constant 2 : index
      %c0_120 = arith.constant 0 : index
      %c0_121 = arith.constant 0 : index
      %268 = vector.load %arg12[%c2_119, %c0_120, %c0_121] : memref<4x8x8xf32, #tpu.memory_space<vmem>>, vector<1x8x8xf32>
      %269 = vector.shape_cast %268 : vector<1x8x8xf32> to vector<8x8xf32>
      %270 = vector.shape_cast %267 : vector<8x8xf32> to vector<1x8x8xf32>
      tpu.vector_store %arg12[%c2_119, %c0_120, %c0_121], %270 {strides = array<i32>} : memref<4x8x8xf32, #tpu.memory_space<vmem>>, vector<1x8x8xf32>,
      %271 = vector.extract_strided_slice %234 {offsets = [0, 24], sizes = [8, 8], strides = [1, 1]} : vector<8x96xf32> to vector<8x8xf32>
      %c3_122 = arith.constant 3 : index
      %c0_123 = arith.constant 0 : index
      %c0_124 = arith.constant 0 : index
      %272 = vector.load %arg10[%c3_122, %c0_123, %c0_124] : memref<4x8x8xf32, #tpu.memory_space<vmem>>, vector<1x8x8xf32>
      %273 = vector.shape_cast %272 : vector<1x8x8xf32> to vector<8x8xf32>
      %274 = vector.shape_cast %271 : vector<8x8xf32> to vector<1x8x8xf32>
      tpu.vector_store %arg10[%c3_122, %c0_123, %c0_124], %274 {strides = array<i32>} : memref<4x8x8xf32, #tpu.memory_space<vmem>>, vector<1x8x8xf32>,
      %275 = vector.extract_strided_slice %234 {offsets = [0, 56], sizes = [8, 8], strides = [1, 1]} : vector<8x96xf32> to vector<8x8xf32>
      %c3_125 = arith.constant 3 : index
      %c0_126 = arith.constant 0 : index
      %c0_127 = arith.constant 0 : index
      %276 = vector.load %arg11[%c3_125, %c0_126, %c0_127] : memref<4x8x8xf32, #tpu.memory_space<vmem>>, vector<1x8x8xf32>
      %277 = vector.shape_cast %276 : vector<1x8x8xf32> to vector<8x8xf32>
      %278 = vector.shape_cast %275 : vector<8x8xf32> to vector<1x8x8xf32>
      tpu.vector_store %arg11[%c3_125, %c0_126, %c0_127], %278 {strides = array<i32>} : memref<4x8x8xf32, #tpu.memory_space<vmem>>, vector<1x8x8xf32>,
      %279 = vector.extract_strided_slice %234 {offsets = [0, 88], sizes = [8, 8], strides = [1, 1]} : vector<8x96xf32> to vector<8x8xf32>
      %c3_128 = arith.constant 3 : index
      %c0_129 = arith.constant 0 : index
      %c0_130 = arith.constant 0 : index
      %280 = vector.load %arg12[%c3_128, %c0_129, %c0_130] : memref<4x8x8xf32, #tpu.memory_space<vmem>>, vector<1x8x8xf32>
      %281 = vector.shape_cast %280 : vector<1x8x8xf32> to vector<8x8xf32>
      %282 = vector.shape_cast %279 : vector<8x8xf32> to vector<1x8x8xf32>
      tpu.vector_store %arg12[%c3_128, %c0_129, %c0_130], %282 {strides = array<i32>} : memref<4x8x8xf32, #tpu.memory_space<vmem>>, vector<1x8x8xf32>,
    } else {
    }
    %c8_i32 = arith.constant 8 : i32
    %5 = arith.muli %arg1, %c8_i32 : i32
    %6 = tpu.assume_multiple %5, 8 : i32
    %7 = tpu.iota {dimensions = array<i32: 0>} : vector<8x1xi32>
    %8 = vector.broadcast %6 : i32 to vector<8x1xi32>
    %9 = arith.addi %8, %7 : vector<8x1xi32>
    %10 = vector.broadcast %1 : i32 to vector<8x1xi32>
    %11 = arith.cmpi slt, %9, %10 : vector<8x1xi32>
    %12 = arith.extui %11 : vector<8x1xi1> to vector<8x1xi32>
    %13 = arith.sitofp %12 : vector<8x1xi32> to vector<8x1xf32>
    %c0 = arith.constant 0 : index
    %14 = arith.index_cast %6 : i32 to index
    %c0_1 = arith.constant 0 : index
    %15 = vector.load %arg10[%c0, %14, %c0_1] : memref<4x8x8xf32, #tpu.memory_space<vmem>>, vector<1x8x8xf32>
    %16 = vector.shape_cast %15 : vector<1x8x8xf32> to vector<8x8xf32>
    %cst = arith.constant 0xFF800000 : f32
    %17 = vector.broadcast %cst : f32 to vector<8x1xf32>
    %cst_2 = arith.constant 0.000000e+00 : f32
    %18 = vector.broadcast %cst_2 : f32 to vector<8x1xf32>
    %cst_3 = arith.constant 0.000000e+00 : f32
    %19 = vector.broadcast %cst_3 : f32 to vector<8x8xf32>
    %c0_i32_4 = arith.constant 0 : i32
    %c8_i32_5 = arith.constant 8 : i32
    %20 = arith.muli %c0_i32_4, %c8_i32_5 : i32
    %21 = tpu.assume_multiple %20, 8 : i32
    %c0_6 = arith.constant 0 : index
    %22 = arith.index_cast %21 : i32 to index
    %c0_7 = arith.constant 0 : index
    %23 = vector.load %arg11[%c0_6, %22, %c0_7] : memref<4x8x8xf32, #tpu.memory_space<vmem>>, vector<1x8x8xf32>
    %24 = vector.shape_cast %23 : vector<1x8x8xf32> to vector<8x8xf32>
    %c0_8 = arith.constant 0 : index
    %25 = arith.index_cast %21 : i32 to index
    %c0_9 = arith.constant 0 : index
    %26 = vector.load %arg12[%c0_8, %25, %c0_9] : memref<4x8x8xf32, #tpu.memory_space<vmem>>, vector<1x8x8xf32>
    %27 = vector.shape_cast %26 : vector<1x8x8xf32> to vector<8x8xf32>
    %cst_10 = arith.constant dense<0.000000e+00> : vector<8x8xf32>
    %28 = tpu.matmul %16, %24, %cst_10 {dimension_numbers = #tpu.dot_dimension_numbers<[1], [1], [0], [0], [0, 0, 1, 0], [], []>} : vector<8x8xf32>, vector<8x8xf32>, vector<8x8xf32> -> vector<8x8xf32>
    %cst_11 = arith.constant 0.353553385 : f32
    %29 = vector.broadcast %cst_11 : f32 to vector<8x8xf32>
    %30 = arith.mulf %28, %29 : vector<8x8xf32>
    %31 = tpu.iota {dimensions = array<i32: 1>} : vector<1x8xi32>
    %32 = vector.broadcast %21 : i32 to vector<1x8xi32>
    %33 = arith.addi %32, %31 : vector<1x8xi32>
    %34 = vector.broadcast %1 : i32 to vector<1x8xi32>
    %35 = arith.cmpi slt, %33, %34 : vector<1x8xi32>
    %cst_12 = arith.constant 0.000000e+00 : f32
    %cst_13 = arith.constant -1.000000e+09 : f32
    %36 = vector.broadcast %cst_12 : f32 to vector<1x8xf32>
    %37 = vector.broadcast %cst_13 : f32 to vector<1x8xf32>
    %38 = arith.select %35, %36, %37 : vector<1x8xi1>, vector<1x8xf32>
    %39 = vector.broadcast %38 : vector<1x8xf32> to vector<8x8xf32>
    %40 = arith.addf %30, %39 : vector<8x8xf32>
    %cst_14 = arith.constant dense<0xFF800000> : vector<8xf32>
    %41 = vector.multi_reduction <maximumf>, %40, %cst_14 [1] : vector<8x8xf32> to vector<8xf32>
    %42 = vector.shape_cast %41 : vector<8xf32> to vector<8x1xf32>
    %43 = arith.maximumf %17, %42 : vector<8x1xf32>
    %44 = arith.subf %17, %43 : vector<8x1xf32>
    %45 = math.exp %44 : vector<8x1xf32>
    %46 = vector.broadcast %43 : vector<8x1xf32> to vector<8x8xf32>
    %47 = arith.subf %40, %46 : vector<8x8xf32>
    %48 = math.exp %47 : vector<8x8xf32>
    %49 = arith.mulf %45, %18 : vector<8x1xf32>
    %cst_15 = arith.constant dense<0.000000e+00> : vector<8xf32>
    %50 = vector.multi_reduction <add>, %48, %cst_15 [1] : vector<8x8xf32> to vector<8xf32>
    %51 = vector.shape_cast %50 : vector<8xf32> to vector<8x1xf32>
    %52 = arith.addf %49, %51 : vector<8x1xf32>
    %53 = vector.broadcast %45 : vector<8x1xf32> to vector<8x8xf32>
    %54 = arith.mulf %53, %19 : vector<8x8xf32>
    %cst_16 = arith.constant dense<0.000000e+00> : vector<8x8xf32>
    %55 = tpu.matmul %48, %27, %cst_16 {dimension_numbers = #tpu.dot_dimension_numbers<[1], [0], [0], [1], [0, 0, 1, 1], [], []>} : vector<8x8xf32>, vector<8x8xf32>, vector<8x8xf32> -> vector<8x8xf32>
    %56 = arith.addf %54, %55 : vector<8x8xf32>
    %c1_i32 = arith.constant 1 : i32
    %57 = tpu.reciprocal %52 : vector<8x1xf32> -> vector<8x1xf32>
    %58 = vector.broadcast %57 : vector<8x1xf32> to vector<8x8xf32>
    %59 = arith.mulf %56, %58 : vector<8x8xf32>
    %c1 = arith.constant 1 : index
    %60 = arith.index_cast %6 : i32 to index
    %c0_17 = arith.constant 0 : index
    %61 = vector.load %arg10[%c1, %60, %c0_17] : memref<4x8x8xf32, #tpu.memory_space<vmem>>, vector<1x8x8xf32>
    %62 = vector.shape_cast %61 : vector<1x8x8xf32> to vector<8x8xf32>
    %cst_18 = arith.constant 0xFF800000 : f32
    %63 = vector.broadcast %cst_18 : f32 to vector<8x1xf32>
    %cst_19 = arith.constant 0.000000e+00 : f32
    %64 = vector.broadcast %cst_19 : f32 to vector<8x1xf32>
    %cst_20 = arith.constant 0.000000e+00 : f32
    %65 = vector.broadcast %cst_20 : f32 to vector<8x8xf32>
    %c0_i32_21 = arith.constant 0 : i32
    %c8_i32_22 = arith.constant 8 : i32
    %66 = arith.muli %c0_i32_21, %c8_i32_22 : i32
    %67 = tpu.assume_multiple %66, 8 : i32
    %c1_23 = arith.constant 1 : index
    %68 = arith.index_cast %67 : i32 to index
    %c0_24 = arith.constant 0 : index
    %69 = vector.load %arg11[%c1_23, %68, %c0_24] : memref<4x8x8xf32, #tpu.memory_space<vmem>>, vector<1x8x8xf32>
    %70 = vector.shape_cast %69 : vector<1x8x8xf32> to vector<8x8xf32>
    %c1_25 = arith.constant 1 : index
    %71 = arith.index_cast %67 : i32 to index
    %c0_26 = arith.constant 0 : index
    %72 = vector.load %arg12[%c1_25, %71, %c0_26] : memref<4x8x8xf32, #tpu.memory_space<vmem>>, vector<1x8x8xf32>
    %73 = vector.shape_cast %72 : vector<1x8x8xf32> to vector<8x8xf32>
    %cst_27 = arith.constant dense<0.000000e+00> : vector<8x8xf32>
    %74 = tpu.matmul %62, %70, %cst_27 {dimension_numbers = #tpu.dot_dimension_numbers<[1], [1], [0], [0], [0, 0, 1, 0], [], []>} : vector<8x8xf32>, vector<8x8xf32>, vector<8x8xf32> -> vector<8x8xf32>
    %cst_28 = arith.constant 0.353553385 : f32
    %75 = vector.broadcast %cst_28 : f32 to vector<8x8xf32>
    %76 = arith.mulf %74, %75 : vector<8x8xf32>
    %77 = tpu.iota {dimensions = array<i32: 1>} : vector<1x8xi32>
    %78 = vector.broadcast %67 : i32 to vector<1x8xi32>
    %79 = arith.addi %78, %77 : vector<1x8xi32>
    %80 = vector.broadcast %1 : i32 to vector<1x8xi32>
    %81 = arith.cmpi slt, %79, %80 : vector<1x8xi32>
    %cst_29 = arith.constant 0.000000e+00 : f32
    %cst_30 = arith.constant -1.000000e+09 : f32
    %82 = vector.broadcast %cst_29 : f32 to vector<1x8xf32>
    %83 = vector.broadcast %cst_30 : f32 to vector<1x8xf32>
    %84 = arith.select %81, %82, %83 : vector<1x8xi1>, vector<1x8xf32>
    %85 = vector.broadcast %84 : vector<1x8xf32> to vector<8x8xf32>
    %86 = arith.addf %76, %85 : vector<8x8xf32>
    %cst_31 = arith.constant dense<0xFF800000> : vector<8xf32>
    %87 = vector.multi_reduction <maximumf>, %86, %cst_31 [1] : vector<8x8xf32> to vector<8xf32>
    %88 = vector.shape_cast %87 : vector<8xf32> to vector<8x1xf32>
    %89 = arith.maximumf %63, %88 : vector<8x1xf32>
    %90 = arith.subf %63, %89 : vector<8x1xf32>
    %91 = math.exp %90 : vector<8x1xf32>
    %92 = vector.broadcast %89 : vector<8x1xf32> to vector<8x8xf32>
    %93 = arith.subf %86, %92 : vector<8x8xf32>
    %94 = math.exp %93 : vector<8x8xf32>
    %95 = arith.mulf %91, %64 : vector<8x1xf32>
    %cst_32 = arith.constant dense<0.000000e+00> : vector<8xf32>
    %96 = vector.multi_reduction <add>, %94, %cst_32 [1] : vector<8x8xf32> to vector<8xf32>
    %97 = vector.shape_cast %96 : vector<8xf32> to vector<8x1xf32>
    %98 = arith.addf %95, %97 : vector<8x1xf32>
    %99 = vector.broadcast %91 : vector<8x1xf32> to vector<8x8xf32>
    %100 = arith.mulf %99, %65 : vector<8x8xf32>
    %cst_33 = arith.constant dense<0.000000e+00> : vector<8x8xf32>
    %101 = tpu.matmul %94, %73, %cst_33 {dimension_numbers = #tpu.dot_dimension_numbers<[1], [0], [0], [1], [0, 0, 1, 1], [], []>} : vector<8x8xf32>, vector<8x8xf32>, vector<8x8xf32> -> vector<8x8xf32>
    %102 = arith.addf %100, %101 : vector<8x8xf32>
    %c1_i32_34 = arith.constant 1 : i32
    %103 = tpu.reciprocal %98 : vector<8x1xf32> -> vector<8x1xf32>
    %104 = vector.broadcast %103 : vector<8x1xf32> to vector<8x8xf32>
    %105 = arith.mulf %102, %104 : vector<8x8xf32>
    %c2 = arith.constant 2 : index
    %106 = arith.index_cast %6 : i32 to index
    %c0_35 = arith.constant 0 : index
    %107 = vector.load %arg10[%c2, %106, %c0_35] : memref<4x8x8xf32, #tpu.memory_space<vmem>>, vector<1x8x8xf32>
    %108 = vector.shape_cast %107 : vector<1x8x8xf32> to vector<8x8xf32>
    %cst_36 = arith.constant 0xFF800000 : f32
    %109 = vector.broadcast %cst_36 : f32 to vector<8x1xf32>
    %cst_37 = arith.constant 0.000000e+00 : f32
    %110 = vector.broadcast %cst_37 : f32 to vector<8x1xf32>
    %cst_38 = arith.constant 0.000000e+00 : f32
    %111 = vector.broadcast %cst_38 : f32 to vector<8x8xf32>
    %c0_i32_39 = arith.constant 0 : i32
    %c8_i32_40 = arith.constant 8 : i32
    %112 = arith.muli %c0_i32_39, %c8_i32_40 : i32
    %113 = tpu.assume_multiple %112, 8 : i32
    %c2_41 = arith.constant 2 : index
    %114 = arith.index_cast %113 : i32 to index
    %c0_42 = arith.constant 0 : index
    %115 = vector.load %arg11[%c2_41, %114, %c0_42] : memref<4x8x8xf32, #tpu.memory_space<vmem>>, vector<1x8x8xf32>
    %116 = vector.shape_cast %115 : vector<1x8x8xf32> to vector<8x8xf32>
    %c2_43 = arith.constant 2 : index
    %117 = arith.index_cast %113 : i32 to index
    %c0_44 = arith.constant 0 : index
    %118 = vector.load %arg12[%c2_43, %117, %c0_44] : memref<4x8x8xf32, #tpu.memory_space<vmem>>, vector<1x8x8xf32>
    %119 = vector.shape_cast %118 : vector<1x8x8xf32> to vector<8x8xf32>
    %cst_45 = arith.constant dense<0.000000e+00> : vector<8x8xf32>
    %120 = tpu.matmul %108, %116, %cst_45 {dimension_numbers = #tpu.dot_dimension_numbers<[1], [1], [0], [0], [0, 0, 1, 0], [], []>} : vector<8x8xf32>, vector<8x8xf32>, vector<8x8xf32> -> vector<8x8xf32>
    %cst_46 = arith.constant 0.353553385 : f32
    %121 = vector.broadcast %cst_46 : f32 to vector<8x8xf32>
    %122 = arith.mulf %120, %121 : vector<8x8xf32>
    %123 = tpu.iota {dimensions = array<i32: 1>} : vector<1x8xi32>
    %124 = vector.broadcast %113 : i32 to vector<1x8xi32>
    %125 = arith.addi %124, %123 : vector<1x8xi32>
    %126 = vector.broadcast %1 : i32 to vector<1x8xi32>
    %127 = arith.cmpi slt, %125, %126 : vector<1x8xi32>
    %cst_47 = arith.constant 0.000000e+00 : f32
    %cst_48 = arith.constant -1.000000e+09 : f32
    %128 = vector.broadcast %cst_47 : f32 to vector<1x8xf32>
    %129 = vector.broadcast %cst_48 : f32 to vector<1x8xf32>
    %130 = arith.select %127, %128, %129 : vector<1x8xi1>, vector<1x8xf32>
    %131 = vector.broadcast %130 : vector<1x8xf32> to vector<8x8xf32>
    %132 = arith.addf %122, %131 : vector<8x8xf32>
    %cst_49 = arith.constant dense<0xFF800000> : vector<8xf32>
    %133 = vector.multi_reduction <maximumf>, %132, %cst_49 [1] : vector<8x8xf32> to vector<8xf32>
    %134 = vector.shape_cast %133 : vector<8xf32> to vector<8x1xf32>
    %135 = arith.maximumf %109, %134 : vector<8x1xf32>
    %136 = arith.subf %109, %135 : vector<8x1xf32>
    %137 = math.exp %136 : vector<8x1xf32>
    %138 = vector.broadcast %135 : vector<8x1xf32> to vector<8x8xf32>
    %139 = arith.subf %132, %138 : vector<8x8xf32>
    %140 = math.exp %139 : vector<8x8xf32>
    %141 = arith.mulf %137, %110 : vector<8x1xf32>
    %cst_50 = arith.constant dense<0.000000e+00> : vector<8xf32>
    %142 = vector.multi_reduction <add>, %140, %cst_50 [1] : vector<8x8xf32> to vector<8xf32>
    %143 = vector.shape_cast %142 : vector<8xf32> to vector<8x1xf32>
    %144 = arith.addf %141, %143 : vector<8x1xf32>
    %145 = vector.broadcast %137 : vector<8x1xf32> to vector<8x8xf32>
    %146 = arith.mulf %145, %111 : vector<8x8xf32>
    %cst_51 = arith.constant dense<0.000000e+00> : vector<8x8xf32>
    %147 = tpu.matmul %140, %119, %cst_51 {dimension_numbers = #tpu.dot_dimension_numbers<[1], [0], [0], [1], [0, 0, 1, 1], [], []>} : vector<8x8xf32>, vector<8x8xf32>, vector<8x8xf32> -> vector<8x8xf32>
    %148 = arith.addf %146, %147 : vector<8x8xf32>
    %c1_i32_52 = arith.constant 1 : i32
    %149 = tpu.reciprocal %144 : vector<8x1xf32> -> vector<8x1xf32>
    %150 = vector.broadcast %149 : vector<8x1xf32> to vector<8x8xf32>
    %151 = arith.mulf %148, %150 : vector<8x8xf32>
    %c3 = arith.constant 3 : index
    %152 = arith.index_cast %6 : i32 to index
    %c0_53 = arith.constant 0 : index
    %153 = vector.load %arg10[%c3, %152, %c0_53] : memref<4x8x8xf32, #tpu.memory_space<vmem>>, vector<1x8x8xf32>
    %154 = vector.shape_cast %153 : vector<1x8x8xf32> to vector<8x8xf32>
    %cst_54 = arith.constant 0xFF800000 : f32
    %155 = vector.broadcast %cst_54 : f32 to vector<8x1xf32>
    %cst_55 = arith.constant 0.000000e+00 : f32
    %156 = vector.broadcast %cst_55 : f32 to vector<8x1xf32>
    %cst_56 = arith.constant 0.000000e+00 : f32
    %157 = vector.broadcast %cst_56 : f32 to vector<8x8xf32>
    %c0_i32_57 = arith.constant 0 : i32
    %c8_i32_58 = arith.constant 8 : i32
    %158 = arith.muli %c0_i32_57, %c8_i32_58 : i32
    %159 = tpu.assume_multiple %158, 8 : i32
    %c3_59 = arith.constant 3 : index
    %160 = arith.index_cast %159 : i32 to index
    %c0_60 = arith.constant 0 : index
    %161 = vector.load %arg11[%c3_59, %160, %c0_60] : memref<4x8x8xf32, #tpu.memory_space<vmem>>, vector<1x8x8xf32>
    %162 = vector.shape_cast %161 : vector<1x8x8xf32> to vector<8x8xf32>
    %c3_61 = arith.constant 3 : index
    %163 = arith.index_cast %159 : i32 to index
    %c0_62 = arith.constant 0 : index
    %164 = vector.load %arg12[%c3_61, %163, %c0_62] : memref<4x8x8xf32, #tpu.memory_space<vmem>>, vector<1x8x8xf32>
    %165 = vector.shape_cast %164 : vector<1x8x8xf32> to vector<8x8xf32>
    %cst_63 = arith.constant dense<0.000000e+00> : vector<8x8xf32>
    %166 = tpu.matmul %154, %162, %cst_63 {dimension_numbers = #tpu.dot_dimension_numbers<[1], [1], [0], [0], [0, 0, 1, 0], [], []>} : vector<8x8xf32>, vector<8x8xf32>, vector<8x8xf32> -> vector<8x8xf32>
    %cst_64 = arith.constant 0.353553385 : f32
    %167 = vector.broadcast %cst_64 : f32 to vector<8x8xf32>
    %168 = arith.mulf %166, %167 : vector<8x8xf32>
    %169 = tpu.iota {dimensions = array<i32: 1>} : vector<1x8xi32>
    %170 = vector.broadcast %159 : i32 to vector<1x8xi32>
    %171 = arith.addi %170, %169 : vector<1x8xi32>
    %172 = vector.broadcast %1 : i32 to vector<1x8xi32>
    %173 = arith.cmpi slt, %171, %172 : vector<1x8xi32>
    %cst_65 = arith.constant 0.000000e+00 : f32
    %cst_66 = arith.constant -1.000000e+09 : f32
    %174 = vector.broadcast %cst_65 : f32 to vector<1x8xf32>
    %175 = vector.broadcast %cst_66 : f32 to vector<1x8xf32>
    %176 = arith.select %173, %174, %175 : vector<1x8xi1>, vector<1x8xf32>
    %177 = vector.broadcast %176 : vector<1x8xf32> to vector<8x8xf32>
    %178 = arith.addf %168, %177 : vector<8x8xf32>
    %cst_67 = arith.constant dense<0xFF800000> : vector<8xf32>
    %179 = vector.multi_reduction <maximumf>, %178, %cst_67 [1] : vector<8x8xf32> to vector<8xf32>
    %180 = vector.shape_cast %179 : vector<8xf32> to vector<8x1xf32>
    %181 = arith.maximumf %155, %180 : vector<8x1xf32>
    %182 = arith.subf %155, %181 : vector<8x1xf32>
    %183 = math.exp %182 : vector<8x1xf32>
    %184 = vector.broadcast %181 : vector<8x1xf32> to vector<8x8xf32>
    %185 = arith.subf %178, %184 : vector<8x8xf32>
    %186 = math.exp %185 : vector<8x8xf32>
    %187 = arith.mulf %183, %156 : vector<8x1xf32>
    %cst_68 = arith.constant dense<0.000000e+00> : vector<8xf32>
    %188 = vector.multi_reduction <add>, %186, %cst_68 [1] : vector<8x8xf32> to vector<8xf32>
    %189 = vector.shape_cast %188 : vector<8xf32> to vector<8x1xf32>
    %190 = arith.addf %187, %189 : vector<8x1xf32>
    %191 = vector.broadcast %183 : vector<8x1xf32> to vector<8x8xf32>
    %192 = arith.mulf %191, %157 : vector<8x8xf32>
    %cst_69 = arith.constant dense<0.000000e+00> : vector<8x8xf32>
    %193 = tpu.matmul %186, %165, %cst_69 {dimension_numbers = #tpu.dot_dimension_numbers<[1], [0], [0], [1], [0, 0, 1, 1], [], []>} : vector<8x8xf32>, vector<8x8xf32>, vector<8x8xf32> -> vector<8x8xf32>
    %194 = arith.addf %192, %193 : vector<8x8xf32>
    %c1_i32_70 = arith.constant 1 : i32
    %195 = tpu.reciprocal %190 : vector<8x1xf32> -> vector<8x1xf32>
    %196 = vector.broadcast %195 : vector<8x1xf32> to vector<8x8xf32>
    %197 = arith.mulf %194, %196 : vector<8x8xf32>
    %198 = tpu.concatenate %59, %105, %151, %197 in 1 : vector<8x8xf32>, vector<8x8xf32>, vector<8x8xf32>, vector<8x8xf32> -> vector<8x32xf32>
    %c0_71 = arith.constant 0 : index
    %c0_72 = arith.constant 0 : index
    %199 = vector.load %arg8[%c0_71, %c0_72] : memref<32x32xf32, #tpu.memory_space<vmem>>, vector<32x32xf32>
    %cst_73 = arith.constant dense<0.000000e+00> : vector<8x32xf32>
    %200 = tpu.matmul %198, %199, %cst_73 {dimension_numbers = #tpu.dot_dimension_numbers<[1], [0], [0], [1], [0, 0, 1, 1], [], []>} : vector<8x32xf32>, vector<32x32xf32>, vector<8x32xf32> -> vector<8x32xf32>
    %201 = vector.broadcast %13 : vector<8x1xf32> to vector<8x32xf32>
    %202 = arith.mulf %200, %201 : vector<8x32xf32>
    %c0_74 = arith.constant 0 : index
    %c0_75 = arith.constant 0 : index
    %c0_76 = arith.constant 0 : index
    %203 = vector.load %arg4[%c0_74, %c0_75, %c0_76] : memref<1x8x32xf32, #tpu.memory_space<vmem>>, vector<1x8x32xf32>
    %204 = vector.shape_cast %203 : vector<1x8x32xf32> to vector<8x32xf32>
    %205 = arith.addf %204, %202 : vector<8x32xf32>
    %c0_77 = arith.constant 0 : index
    %c0_78 = arith.constant 0 : index
    %c0_79 = arith.constant 0 : index
    %206 = vector.load %arg9[%c0_77, %c0_78, %c0_79] : memref<1x8x32xf32, #tpu.memory_space<vmem>>, vector<1x8x32xf32>
    %207 = vector.shape_cast %206 : vector<1x8x32xf32> to vector<8x32xf32>
    %208 = vector.shape_cast %205 : vector<8x32xf32> to vector<1x8x32xf32>
    tpu.vector_store %arg9[%c0_77, %c0_78, %c0_79], %208 {strides = array<i32>} : memref<1x8x32xf32, #tpu.memory_space<vmem>>, vector<1x8x32xf32>,
    return
  }
  func.func @transform_0(%arg0: i32, %arg1: i32, %arg2: memref<2xi32, #tpu.memory_space<smem>>) -> (i32, i32, i32) {
    %c0_i32 = arith.constant 0 : i32
    %c0_i32_0 = arith.constant 0 : i32
    %c0_i32_1 = arith.constant 0 : i32
    return %arg0, %c0_i32, %c0_i32_0 : i32, i32, i32
  }
  func.func @transform_1(%arg0: i32, %arg1: i32, %arg2: memref<2xi32, #tpu.memory_space<smem>>) -> (i32, i32, i32) {
    %c0_i32 = arith.constant 0 : i32
    %c0_i32_0 = arith.constant 0 : i32
    return %arg0, %arg1, %c0_i32 : i32, i32, i32
  }
  func.func @transform_2(%arg0: i32, %arg1: i32, %arg2: memref<2xi32, #tpu.memory_space<smem>>) -> (i32, i32) {
    %c0_i32 = arith.constant 0 : i32
    %c0_i32_0 = arith.constant 0 : i32
    %c0_i32_1 = arith.constant 0 : i32
    return %c0_i32, %c0_i32_0 : i32, i32
  }
  func.func @transform_3(%arg0: i32, %arg1: i32, %arg2: memref<2xi32, #tpu.memory_space<smem>>) -> (i32, i32) {
    %c0_i32 = arith.constant 0 : i32
    %c0_i32_0 = arith.constant 0 : i32
    %c0_i32_1 = arith.constant 0 : i32
    return %c0_i32, %c0_i32_0 : i32, i32
  }
  func.func @transform_4(%arg0: i32, %arg1: i32, %arg2: memref<2xi32, #tpu.memory_space<smem>>) -> (i32, i32) {
    %c0_i32 = arith.constant 0 : i32
    %c0_i32_0 = arith.constant 0 : i32
    %c0_i32_1 = arith.constant 0 : i32
    return %c0_i32, %c0_i32_0 : i32, i32
  }
  func.func @transform_5(%arg0: i32, %arg1: i32, %arg2: memref<2xi32, #tpu.memory_space<smem>>) -> (i32, i32) {
    %c0_i32 = arith.constant 0 : i32
    %c0_i32_0 = arith.constant 0 : i32
    %c0_i32_1 = arith.constant 0 : i32
    return %c0_i32, %c0_i32_0 : i32, i32
  }
  func.func @transform_6(%arg0: i32, %arg1: i32, %arg2: memref<2xi32, #tpu.memory_space<smem>>) -> (i32, i32, i32) {
    %c0_i32 = arith.constant 0 : i32
    %c0_i32_0 = arith.constant 0 : i32
    return %arg0, %arg1, %c0_i32 : i32, i32, i32
  }
}

module attributes {stable_mosaic.version = 11 : i64} {
  func.func @_transformer_block_kernel(%arg0: i32, %arg1: i32, %arg2: memref<2xi32, #tpu.memory_space<smem>>, %arg3: memref<1x8x32xf32, #tpu.memory_space<vmem>>, %arg4: memref<1x8x32xf32, #tpu.memory_space<vmem>>, %arg5: memref<1x32xf32, #tpu.memory_space<vmem>>, %arg6: memref<1x32xf32, #tpu.memory_space<vmem>>, %arg7: memref<32x96xf32, #tpu.memory_space<vmem>>, %arg8: memref<32x32xf32, #tpu.memory_space<vmem>>, %arg9: memref<1x8x32xf32, #tpu.memory_space<vmem>>, %arg10: memref<4x8x8xf32, #tpu.memory_space<vmem>>, %arg11: memref<4x8x8xf32, #tpu.memory_space<vmem>>, %arg12: memref<4x8x8xf32, #tpu.memory_space<vmem>>) attributes {dimension_semantics = [#tpu.dimension_semantics<parallel>, #tpu.dimension_semantics<arbitrary>], iteration_bounds = array<i64: 2, 1>, scalar_prefetch = 1 : i64, scratch_operands = 3 : i64, tpu.core_type = #tpu.core_type<tc>, window_params = [{transform_indices = @transform_0, window_bounds = array<i64: 1, 8, 32>}, {transform_indices = @transform_1, window_bounds = array<i64: 1, 8, 32>}, {pipeline_mode = #tpu.pipeline_mode<synchronous>, transform_indices = @transform_2, window_bounds = array<i64: 1, 32>}, {pipeline_mode = #tpu.pipeline_mode<synchronous>, transform_indices = @transform_3, window_bounds = array<i64: 1, 32>}, {pipeline_mode = #tpu.pipeline_mode<synchronous>, transform_indices = @transform_4, window_bounds = array<i64: 32, 96>}, {pipeline_mode = #tpu.pipeline_mode<synchronous>, transform_indices = @transform_5, window_bounds = array<i64: 32, 32>}, {transform_indices = @transform_6, window_bounds = array<i64: 1, 8, 32>}]} {
    %0 = arith.index_cast %arg0 : i32 to index
    %1 = memref.load %arg2[%0] : memref<2xi32, #tpu.memory_space<smem>>
    %c0_i32 = arith.constant 0 : i32
    %2 = arith.cmpi eq, %arg1, %c0_i32 : i32
    %3 = arith.extui %2 : i1 to i32
    %c0_i32_0 = arith.constant 0 : i32
    %4 = arith.cmpi ne, %3, %c0_i32_0 : i32
    scf.if %4 {
      %c0_80 = arith.constant 0 : index
      %c0_81 = arith.constant 0 : index
      %c0_82 = arith.constant 0 : index
      %209 = vector.load %arg3[%c0_80, %c0_81, %c0_82] : memref<1x8x32xf32, #tpu.memory_space<vmem>>, vector<1x8x32xf32>
      %210 = vector.shape_cast %209 : vector<1x8x32xf32> to vector<8x32xf32>
      %cst_83 = arith.constant dense<0.000000e+00> : vector<8xf32>
      %211 = vector.multi_reduction <add>, %210, %cst_83 [1] : vector<8x32xf32> to vector<8xf32>
      %212 = vector.shape_cast %211 : vector<8xf32> to vector<8x1xf32>
      %cst_84 = arith.constant 3.200000e+01 : f32
      %213 = vector.broadcast %cst_84 : f32 to vector<8x1xf32>
      %214 = arith.divf %212, %213 : vector<8x1xf32>
      %215 = vector.broadcast %214 : vector<8x1xf32> to vector<8x32xf32>
      %216 = arith.subf %210, %215 : vector<8x32xf32>
      %217 = arith.mulf %216, %216 : vector<8x32xf32>
      %cst_85 = arith.constant dense<0.000000e+00> : vector<8xf32>
      %218 = vector.multi_reduction <add>, %217, %cst_85 [1] : vector<8x32xf32> to vector<8xf32>
      %219 = vector.shape_cast %218 : vector<8xf32> to vector<8x1xf32>
      %cst_86 = arith.constant 3.200000e+01 : f32
      %220 = vector.broadcast %cst_86 : f32 to vector<8x1xf32>
      %221 = arith.divf %219, %220 : vector<8x1xf32>
      %cst_87 = arith.constant 9.99999974E-6 : f32
      %222 = vector.broadcast %cst_87 : f32 to vector<8x1xf32>
      %223 = arith.addf %221, %222 : vector<8x1xf32>
      %224 = math.rsqrt %223 : vector<8x1xf32>
      %225 = vector.broadcast %224 : vector<8x1xf32> to vector<8x32xf32>
      %226 = arith.mulf %216, %225 : vector<8x32xf32>
      %c0_88 = arith.constant 0 : index
      %c0_89 = arith.constant 0 : index
      %227 = vector.load %arg5[%c0_88, %c0_89] : memref<1x32xf32, #tpu.memory_space<vmem>>, vector<1x32xf32>
      %228 = vector.broadcast %227 : vector<1x32xf32> to vector<8x32xf32>
      %229 = arith.mulf %226, %228 : vector<8x32xf32>
      %c0_90 = arith.constant 0 : index
      %c0_91 = arith.constant 0 : index
      %230 = vector.load %arg6[%c0_90, %c0_91] : memref<1x32xf32, #tpu.memory_space<vmem>>, vector<1x32xf32>
      %231 = vector.broadcast %230 : vector<1x32xf32> to vector<8x32xf32>
      %232 = arith.addf %229, %231 : vector<8x32xf32>
      %c0_92 = arith.constant 0 : index
      %c0_93 = arith.constant 0 : index
      %233 = vector.load %arg7[%c0_92, %c0_93] : memref<32x96xf32, #tpu.memory_space<vmem>>, vector<32x96xf32>
      %cst_94 = arith.constant dense<0.000000e+00> : vector<8x96xf32>
      %234 = tpu.matmul %232, %233, %cst_94 {dimension_numbers = #tpu.dot_dimension_numbers<[1], [0], [0], [1], [0, 0, 1, 1], [], []>} : vector<8x32xf32>, vector<32x96xf32>, vector<8x96xf32> -> vector<8x96xf32>
      %235 = vector.extract_strided_slice %234 {offsets = [0, 0], sizes = [8, 8], strides = [1, 1]} : vector<8x96xf32> to vector<8x8xf32>
      %c0_95 = arith.constant 0 : index
      %c0_96 = arith.constant 0 : index
      %c0_97 = arith.constant 0 : index
      %236 = vector.load %arg10[%c0_95, %c0_96, %c0_97] : memref<4x8x8xf32, #tpu.memory_space<vmem>>, vector<1x8x8xf32>
      %237 = vector.shape_cast %236 : vector<1x8x8xf32> to vector<8x8xf32>
      %238 = vector.shape_cast %235 : vector<8x8xf32> to vector<1x8x8xf32>
      tpu.vector_store %arg10[%c0_95, %c0_96, %c0_97], %238 {strides = array<i32>} : memref<4x8x8xf32, #tpu.memory_space<vmem>>, vector<1x8x8xf32>,
      %239 = vector.extract_strided_slice %234 {offsets = [0, 32], sizes = [8, 8], strides = [1, 1]} : vector<8x96xf32> to vector<8x8xf32>
      %c0_98 = arith.constant 0 : index
      %c0_99 = arith.constant 0 : index
      %c0_100 = arith.constant 0 : index
      %240 = vector.load %arg11[%c0_98, %c0_99, %c0_100] : memref<4x8x8xf32, #tpu.memory_space<vmem>>, vector<1x8x8xf32>
      %241 = vector.shape_cast %240 : vector<1x8x8xf32> to vector<8x8xf32>
      %242 = vector.shape_cast %239 : vector<8x8xf32> to vector<1x8x8xf32>
      tpu.vector_store %arg11[%c0_98, %c0_99, %c0_100], %242 {strides = array<i32>} : memref<4x8x8xf32, #tpu.memory_space<vmem>>, vector<1x8x8xf32>,
      %243 = vector.extract_strided_slice %234 {offsets = [0, 64], sizes = [8, 8], strides = [1, 1]} : vector<8x96xf32> to vector<8x8xf32>
      %c0_101 = arith.constant 0 : index
      %c0_102 = arith.constant 0 : index
      %c0_103 = arith.constant 0 : index
      %244 = vector.load %arg12[%c0_101, %c0_102, %c0_103] : memref<4x8x8xf32, #tpu.memory_space<vmem>>, vector<1x8x8xf32>
      %245 = vector.shape_cast %244 : vector<1x8x8xf32> to vector<8x8xf32>
      %246 = vector.shape_cast %243 : vector<8x8xf32> to vector<1x8x8xf32>
      tpu.vector_store %arg12[%c0_101, %c0_102, %c0_103], %246 {strides = array<i32>} : memref<4x8x8xf32, #tpu.memory_space<vmem>>, vector<1x8x8xf32>,
      %247 = vector.extract_strided_slice %234 {offsets = [0, 8], sizes = [8, 8], strides = [1, 1]} : vector<8x96xf32> to vector<8x8xf32>
      %c1_104 = arith.constant 1 : index
      %c0_105 = arith.constant 0 : index
      %c0_106 = arith.constant 0 : index
      %248 = vector.load %arg10[%c1_104, %c0_105, %c0_106] : memref<4x8x8xf32, #tpu.memory_space<vmem>>, vector<1x8x8xf32>
      %249 = vector.shape_cast %248 : vector<1x8x8xf32> to vector<8x8xf32>
      %250 = vector.shape_cast %247 : vector<8x8xf32> to vector<1x8x8xf32>
      tpu.vector_store %arg10[%c1_104, %c0_105, %c0_106], %250 {strides = array<i32>} : memref<4x8x8xf32, #tpu.memory_space<vmem>>, vector<1x8x8xf32>,
      %251 = vector.extract_strided_slice %234 {offsets = [0, 40], sizes = [8, 8], strides = [1, 1]} : vector<8x96xf32> to vector<8x8xf32>
      %c1_107 = arith.constant 1 : index
      %c0_108 = arith.constant 0 : index
      %c0_109 = arith.constant 0 : index
      %252 = vector.load %arg11[%c1_107, %c0_108, %c0_109] : memref<4x8x8xf32, #tpu.memory_space<vmem>>, vector<1x8x8xf32>
      %253 = vector.shape_cast %252 : vector<1x8x8xf32> to vector<8x8xf32>
      %254 = vector.shape_cast %251 : vector<8x8xf32> to vector<1x8x8xf32>
      tpu.vector_store %arg11[%c1_107, %c0_108, %c0_109], %254 {strides = array<i32>} : memref<4x8x8xf32, #tpu.memory_space<vmem>>, vector<1x8x8xf32>,
      %255 = vector.extract_strided_slice %234 {offsets = [0, 72], sizes = [8, 8], strides = [1, 1]} : vector<8x96xf32> to vector<8x8xf32>
      %c1_110 = arith.constant 1 : index
      %c0_111 = arith.constant 0 : index
      %c0_112 = arith.constant 0 : index
      %256 = vector.load %arg12[%c1_110, %c0_111, %c0_112] : memref<4x8x8xf32, #tpu.memory_space<vmem>>, vector<1x8x8xf32>
      %257 = vector.shape_cast %256 : vector<1x8x8xf32> to vector<8x8xf32>
      %258 = vector.shape_cast %255 : vector<8x8xf32> to vector<1x8x8xf32>
      tpu.vector_store %arg12[%c1_110, %c0_111, %c0_112], %258 {strides = array<i32>} : memref<4x8x8xf32, #tpu.memory_space<vmem>>, vector<1x8x8xf32>,
      %259 = vector.extract_strided_slice %234 {offsets = [0, 16], sizes = [8, 8], strides = [1, 1]} : vector<8x96xf32> to vector<8x8xf32>
      %c2_113 = arith.constant 2 : index
      %c0_114 = arith.constant 0 : index
      %c0_115 = arith.constant 0 : index
      %260 = vector.load %arg10[%c2_113, %c0_114, %c0_115] : memref<4x8x8xf32, #tpu.memory_space<vmem>>, vector<1x8x8xf32>
      %261 = vector.shape_cast %260 : vector<1x8x8xf32> to vector<8x8xf32>
      %262 = vector.shape_cast %259 : vector<8x8xf32> to vector<1x8x8xf32>
      tpu.vector_store %arg10[%c2_113, %c0_114, %c0_115], %262 {strides = array<i32>} : memref<4x8x8xf32, #tpu.memory_space<vmem>>, vector<1x8x8xf32>,
      %263 = vector.extract_strided_slice %234 {offsets = [0, 48], sizes = [8, 8], strides = [1, 1]} : vector<8x96xf32> to vector<8x8xf32>
      %c2_116 = arith.constant 2 : index
      %c0_117 = arith.constant 0 : index
      %c0_118 = arith.constant 0 : index
      %264 = vector.load %arg11[%c2_116, %c0_117, %c0_118] : memref<4x8x8xf32, #tpu.memory_space<vmem>>, vector<1x8x8xf32>
      %265 = vector.shape_cast %264 : vector<1x8x8xf32> to vector<8x8xf32>
      %266 = vector.shape_cast %263 : vector<8x8xf32> to vector<1x8x8xf32>
      tpu.vector_store %arg11[%c2_116, %c0_117, %c0_118], %266 {strides = array<i32>} : memref<4x8x8xf32, #tpu.memory_space<vmem>>, vector<1x8x8xf32>,
      %267 = vector.extract_strided_slice %234 {offsets = [0, 80], sizes = [8, 8], strides = [1, 1]} : vector<8x96xf32> to vector<8x8xf32>
      %c2_119 = arith.constant 2 : index
      %c0_120 = arith.constant 0 : index
      %c0_121 = arith.constant 0 : index
      %268 = vector.load %arg12[%c2_119, %c0_120, %c0_121] : memref<4x8x8xf32, #tpu.memory_space<vmem>>, vector<1x8x8xf32>
      %269 = vector.shape_cast %268 : vector<1x8x8xf32> to vector<8x8xf32>
      %270 = vector.shape_cast %267 : vector<8x8xf32> to vector<1x8x8xf32>
      tpu.vector_store %arg12[%c2_119, %c0_120, %c0_121], %270 {strides = array<i32>} : memref<4x8x8xf32, #tpu.memory_space<vmem>>, vector<1x8x8xf32>,
      %271 = vector.extract_strided_slice %234 {offsets = [0, 24], sizes = [8, 8], strides = [1, 1]} : vector<8x96xf32> to vector<8x8xf32>
      %c3_122 = arith.constant 3 : index
      %c0_123 = arith.constant 0 : index
      %c0_124 = arith.constant 0 : index
      %272 = vector.load %arg10[%c3_122, %c0_123, %c0_124] : memref<4x8x8xf32, #tpu.memory_space<vmem>>, vector<1x8x8xf32>
      %273 = vector.shape_cast %272 : vector<1x8x8xf32> to vector<8x8xf32>
      %274 = vector.shape_cast %271 : vector<8x8xf32> to vector<1x8x8xf32>
      tpu.vector_store %arg10[%c3_122, %c0_123, %c0_124], %274 {strides = array<i32>} : memref<4x8x8xf32, #tpu.memory_space<vmem>>, vector<1x8x8xf32>,
      %275 = vector.extract_strided_slice %234 {offsets = [0, 56], sizes = [8, 8], strides = [1, 1]} : vector<8x96xf32> to vector<8x8xf32>
      %c3_125 = arith.constant 3 : index
      %c0_126 = arith.constant 0 : index
      %c0_127 = arith.constant 0 : index
      %276 = vector.load %arg11[%c3_125, %c0_126, %c0_127] : memref<4x8x8xf32, #tpu.memory_space<vmem>>, vector<1x8x8xf32>
      %277 = vector.shape_cast %276 : vector<1x8x8xf32> to vector<8x8xf32>
      %278 = vector.shape_cast %275 : vector<8x8xf32> to vector<1x8x8xf32>
      tpu.vector_store %arg11[%c3_125, %c0_126, %c0_127], %278 {strides = array<i32>} : memref<4x8x8xf32, #tpu.memory_space<vmem>>, vector<1x8x8xf32>,
      %279 = vector.extract_strided_slice %234 {offsets = [0, 88], sizes = [8, 8], strides = [1, 1]} : vector<8x96xf32> to vector<8x8xf32>
      %c3_128 = arith.constant 3 : index
      %c0_129 = arith.constant 0 : index
      %c0_130 = arith.constant 0 : index
      %280 = vector.load %arg12[%c3_128, %c0_129, %c0_130] : memref<4x8x8xf32, #tpu.memory_space<vmem>>, vector<1x8x8xf32>
      %281 = vector.shape_cast %280 : vector<1x8x8xf32> to vector<8x8xf32>
      %282 = vector.shape_cast %279 : vector<8x8xf32> to vector<1x8x8xf32>
      tpu.vector_store %arg12[%c3_128, %c0_129, %c0_130], %282 {strides = array<i32>} : memref<4x8x8xf32, #tpu.memory_space<vmem>>, vector<1x8x8xf32>,
    } else {
    }
    %c8_i32 = arith.constant 8 : i32
    %5 = arith.muli %arg1, %c8_i32 : i32
    %6 = tpu.assume_multiple %5, 8 : i32
    %7 = tpu.iota {dimensions = array<i32: 0>} : vector<8x1xi32>
    %8 = vector.broadcast %6 : i32 to vector<8x1xi32>
    %9 = arith.addi %8, %7 : vector<8x1xi32>
    %10 = vector.broadcast %1 : i32 to vector<8x1xi32>
    %11 = arith.cmpi slt, %9, %10 : vector<8x1xi32>
    %12 = arith.extui %11 : vector<8x1xi1> to vector<8x1xi32>
    %13 = arith.sitofp %12 : vector<8x1xi32> to vector<8x1xf32>
    %c0 = arith.constant 0 : index
    %14 = arith.index_cast %6 : i32 to index
    %c0_1 = arith.constant 0 : index
    %15 = vector.load %arg10[%c0, %14, %c0_1] : memref<4x8x8xf32, #tpu.memory_space<vmem>>, vector<1x8x8xf32>
    %16 = vector.shape_cast %15 : vector<1x8x8xf32> to vector<8x8xf32>
    %cst = arith.constant 0xFF800000 : f32
    %17 = vector.broadcast %cst : f32 to vector<8x1xf32>
    %cst_2 = arith.constant 0.000000e+00 : f32
    %18 = vector.broadcast %cst_2 : f32 to vector<8x1xf32>
    %cst_3 = arith.constant 0.000000e+00 : f32
    %19 = vector.broadcast %cst_3 : f32 to vector<8x8xf32>
    %c0_i32_4 = arith.constant 0 : i32
    %c8_i32_5 = arith.constant 8 : i32
    %20 = arith.muli %c0_i32_4, %c8_i32_5 : i32
    %21 = tpu.assume_multiple %20, 8 : i32
    %c0_6 = arith.constant 0 : index
    %22 = arith.index_cast %21 : i32 to index
    %c0_7 = arith.constant 0 : index
    %23 = vector.load %arg11[%c0_6, %22, %c0_7] : memref<4x8x8xf32, #tpu.memory_space<vmem>>, vector<1x8x8xf32>
    %24 = vector.shape_cast %23 : vector<1x8x8xf32> to vector<8x8xf32>
    %c0_8 = arith.constant 0 : index
    %25 = arith.index_cast %21 : i32 to index
    %c0_9 = arith.constant 0 : index
    %26 = vector.load %arg12[%c0_8, %25, %c0_9] : memref<4x8x8xf32, #tpu.memory_space<vmem>>, vector<1x8x8xf32>
    %27 = vector.shape_cast %26 : vector<1x8x8xf32> to vector<8x8xf32>
    %cst_10 = arith.constant dense<0.000000e+00> : vector<8x8xf32>
    %28 = tpu.matmul %16, %24, %cst_10 {dimension_numbers = #tpu.dot_dimension_numbers<[1], [1], [0], [0], [0, 0, 1, 0], [], []>} : vector<8x8xf32>, vector<8x8xf32>, vector<8x8xf32> -> vector<8x8xf32>
    %cst_11 = arith.constant 0.353553385 : f32
    %29 = vector.broadcast %cst_11 : f32 to vector<8x8xf32>
    %30 = arith.mulf %28, %29 : vector<8x8xf32>
    %31 = tpu.iota {dimensions = array<i32: 1>} : vector<1x8xi32>
    %32 = vector.broadcast %21 : i32 to vector<1x8xi32>
    %33 = arith.addi %32, %31 : vector<1x8xi32>
    %34 = vector.broadcast %1 : i32 to vector<1x8xi32>
    %35 = arith.cmpi slt, %33, %34 : vector<1x8xi32>
    %cst_12 = arith.constant 0.000000e+00 : f32
    %cst_13 = arith.constant -1.000000e+09 : f32
    %36 = vector.broadcast %cst_12 : f32 to vector<1x8xf32>
    %37 = vector.broadcast %cst_13 : f32 to vector<1x8xf32>
    %38 = arith.select %35, %36, %37 : vector<1x8xi1>, vector<1x8xf32>
    %39 = vector.broadcast %38 : vector<1x8xf32> to vector<8x8xf32>
    %40 = arith.addf %30, %39 : vector<8x8xf32>
    %cst_14 = arith.constant dense<0xFF800000> : vector<8xf32>
    %41 = vector.multi_reduction <maximumf>, %40, %cst_14 [1] : vector<8x8xf32> to vector<8xf32>
    %42 = vector.shape_cast %41 : vector<8xf32> to vector<8x1xf32>
    %43 = arith.maximumf %17, %42 : vector<8x1xf32>
    %44 = arith.subf %17, %43 : vector<8x1xf32>
    %45 = math.exp %44 : vector<8x1xf32>
    %46 = vector.broadcast %43 : vector<8x1xf32> to vector<8x8xf32>
    %47 = arith.subf %40, %46 : vector<8x8xf32>
    %48 = math.exp %47 : vector<8x8xf32>
    %49 = arith.mulf %45, %18 : vector<8x1xf32>
    %cst_15 = arith.constant dense<0.000000e+00> : vector<8xf32>
    %50 = vector.multi_reduction <add>, %48, %cst_15 [1] : vector<8x8xf32> to vector<8xf32>
    %51 = vector.shape_cast %50 : vector<8xf32> to vector<8x1xf32>
    %52 = arith.addf %49, %51 : vector<8x1xf32>
    %53 = vector.broadcast %45 : vector<8x1xf32> to vector<8x8xf32>
    %54 = arith.mulf %53, %19 : vector<8x8xf32>
    %cst_16 = arith.constant dense<0.000000e+00> : vector<8x8xf32>
    %55 = tpu.matmul %48, %27, %cst_16 {dimension_numbers = #tpu.dot_dimension_numbers<[1], [0], [0], [1], [0, 0, 1, 1], [], []>} : vector<8x8xf32>, vector<8x8xf32>, vector<8x8xf32> -> vector<8x8xf32>
    %56 = arith.addf %54, %55 : vector<8x8xf32>
    %c1_i32 = arith.constant 1 : i32
    %57 = tpu.reciprocal %52 : vector<8x1xf32> -> vector<8x1xf32>
    %58 = vector.broadcast %57 : vector<8x1xf32> to vector<8x8xf32>
    %59 = arith.mulf %56, %58 : vector<8x8xf32>
    %c1 = arith.constant 1 : index
    %60 = arith.index_cast %6 : i32 to index
    %c0_17 = arith.constant 0 : index
    %61 = vector.load %arg10[%c1, %60, %c0_17] : memref<4x8x8xf32, #tpu.memory_space<vmem>>, vector<1x8x8xf32>
    %62 = vector.shape_cast %61 : vector<1x8x8xf32> to vector<8x8xf32>
    %cst_18 = arith.constant 0xFF800000 : f32
    %63 = vector.broadcast %cst_18 : f32 to vector<8x1xf32>
    %cst_19 = arith.constant 0.000000e+00 : f32
    %64 = vector.broadcast %cst_19 : f32 to vector<8x1xf32>
    %cst_20 = arith.constant 0.000000e+00 : f32
    %65 = vector.broadcast %cst_20 : f32 to vector<8x8xf32>
    %c0_i32_21 = arith.constant 0 : i32
    %c8_i32_22 = arith.constant 8 : i32
    %66 = arith.muli %c0_i32_21, %c8_i32_22 : i32
    %67 = tpu.assume_multiple %66, 8 : i32
    %c1_23 = arith.constant 1 : index
    %68 = arith.index_cast %67 : i32 to index
    %c0_24 = arith.constant 0 : index
    %69 = vector.load %arg11[%c1_23, %68, %c0_24] : memref<4x8x8xf32, #tpu.memory_space<vmem>>, vector<1x8x8xf32>
    %70 = vector.shape_cast %69 : vector<1x8x8xf32> to vector<8x8xf32>
    %c1_25 = arith.constant 1 : index
    %71 = arith.index_cast %67 : i32 to index
    %c0_26 = arith.constant 0 : index
    %72 = vector.load %arg12[%c1_25, %71, %c0_26] : memref<4x8x8xf32, #tpu.memory_space<vmem>>, vector<1x8x8xf32>
    %73 = vector.shape_cast %72 : vector<1x8x8xf32> to vector<8x8xf32>
    %cst_27 = arith.constant dense<0.000000e+00> : vector<8x8xf32>
    %74 = tpu.matmul %62, %70, %cst_27 {dimension_numbers = #tpu.dot_dimension_numbers<[1], [1], [0], [0], [0, 0, 1, 0], [], []>} : vector<8x8xf32>, vector<8x8xf32>, vector<8x8xf32> -> vector<8x8xf32>
    %cst_28 = arith.constant 0.353553385 : f32
    %75 = vector.broadcast %cst_28 : f32 to vector<8x8xf32>
    %76 = arith.mulf %74, %75 : vector<8x8xf32>
    %77 = tpu.iota {dimensions = array<i32: 1>} : vector<1x8xi32>
    %78 = vector.broadcast %67 : i32 to vector<1x8xi32>
    %79 = arith.addi %78, %77 : vector<1x8xi32>
    %80 = vector.broadcast %1 : i32 to vector<1x8xi32>
    %81 = arith.cmpi slt, %79, %80 : vector<1x8xi32>
    %cst_29 = arith.constant 0.000000e+00 : f32
    %cst_30 = arith.constant -1.000000e+09 : f32
    %82 = vector.broadcast %cst_29 : f32 to vector<1x8xf32>
    %83 = vector.broadcast %cst_30 : f32 to vector<1x8xf32>
    %84 = arith.select %81, %82, %83 : vector<1x8xi1>, vector<1x8xf32>
    %85 = vector.broadcast %84 : vector<1x8xf32> to vector<8x8xf32>
    %86 = arith.addf %76, %85 : vector<8x8xf32>
    %cst_31 = arith.constant dense<0xFF800000> : vector<8xf32>
    %87 = vector.multi_reduction <maximumf>, %86, %cst_31 [1] : vector<8x8xf32> to vector<8xf32>
    %88 = vector.shape_cast %87 : vector<8xf32> to vector<8x1xf32>
    %89 = arith.maximumf %63, %88 : vector<8x1xf32>
    %90 = arith.subf %63, %89 : vector<8x1xf32>
    %91 = math.exp %90 : vector<8x1xf32>
    %92 = vector.broadcast %89 : vector<8x1xf32> to vector<8x8xf32>
    %93 = arith.subf %86, %92 : vector<8x8xf32>
    %94 = math.exp %93 : vector<8x8xf32>
    %95 = arith.mulf %91, %64 : vector<8x1xf32>
    %cst_32 = arith.constant dense<0.000000e+00> : vector<8xf32>
    %96 = vector.multi_reduction <add>, %94, %cst_32 [1] : vector<8x8xf32> to vector<8xf32>
    %97 = vector.shape_cast %96 : vector<8xf32> to vector<8x1xf32>
    %98 = arith.addf %95, %97 : vector<8x1xf32>
    %99 = vector.broadcast %91 : vector<8x1xf32> to vector<8x8xf32>
    %100 = arith.mulf %99, %65 : vector<8x8xf32>
    %cst_33 = arith.constant dense<0.000000e+00> : vector<8x8xf32>
    %101 = tpu.matmul %94, %73, %cst_33 {dimension_numbers = #tpu.dot_dimension_numbers<[1], [0], [0], [1], [0, 0, 1, 1], [], []>} : vector<8x8xf32>, vector<8x8xf32>, vector<8x8xf32> -> vector<8x8xf32>
    %102 = arith.addf %100, %101 : vector<8x8xf32>
    %c1_i32_34 = arith.constant 1 : i32
    %103 = tpu.reciprocal %98 : vector<8x1xf32> -> vector<8x1xf32>
    %104 = vector.broadcast %103 : vector<8x1xf32> to vector<8x8xf32>
    %105 = arith.mulf %102, %104 : vector<8x8xf32>
    %c2 = arith.constant 2 : index
    %106 = arith.index_cast %6 : i32 to index
    %c0_35 = arith.constant 0 : index
    %107 = vector.load %arg10[%c2, %106, %c0_35] : memref<4x8x8xf32, #tpu.memory_space<vmem>>, vector<1x8x8xf32>
    %108 = vector.shape_cast %107 : vector<1x8x8xf32> to vector<8x8xf32>
    %cst_36 = arith.constant 0xFF800000 : f32
    %109 = vector.broadcast %cst_36 : f32 to vector<8x1xf32>
    %cst_37 = arith.constant 0.000000e+00 : f32
    %110 = vector.broadcast %cst_37 : f32 to vector<8x1xf32>
    %cst_38 = arith.constant 0.000000e+00 : f32
    %111 = vector.broadcast %cst_38 : f32 to vector<8x8xf32>
    %c0_i32_39 = arith.constant 0 : i32
    %c8_i32_40 = arith.constant 8 : i32
    %112 = arith.muli %c0_i32_39, %c8_i32_40 : i32
    %113 = tpu.assume_multiple %112, 8 : i32
    %c2_41 = arith.constant 2 : index
    %114 = arith.index_cast %113 : i32 to index
    %c0_42 = arith.constant 0 : index
    %115 = vector.load %arg11[%c2_41, %114, %c0_42] : memref<4x8x8xf32, #tpu.memory_space<vmem>>, vector<1x8x8xf32>
    %116 = vector.shape_cast %115 : vector<1x8x8xf32> to vector<8x8xf32>
    %c2_43 = arith.constant 2 : index
    %117 = arith.index_cast %113 : i32 to index
    %c0_44 = arith.constant 0 : index
    %118 = vector.load %arg12[%c2_43, %117, %c0_44] : memref<4x8x8xf32, #tpu.memory_space<vmem>>, vector<1x8x8xf32>
    %119 = vector.shape_cast %118 : vector<1x8x8xf32> to vector<8x8xf32>
    %cst_45 = arith.constant dense<0.000000e+00> : vector<8x8xf32>
    %120 = tpu.matmul %108, %116, %cst_45 {dimension_numbers = #tpu.dot_dimension_numbers<[1], [1], [0], [0], [0, 0, 1, 0], [], []>} : vector<8x8xf32>, vector<8x8xf32>, vector<8x8xf32> -> vector<8x8xf32>
    %cst_46 = arith.constant 0.353553385 : f32
    %121 = vector.broadcast %cst_46 : f32 to vector<8x8xf32>
    %122 = arith.mulf %120, %121 : vector<8x8xf32>
    %123 = tpu.iota {dimensions = array<i32: 1>} : vector<1x8xi32>
    %124 = vector.broadcast %113 : i32 to vector<1x8xi32>
    %125 = arith.addi %124, %123 : vector<1x8xi32>
    %126 = vector.broadcast %1 : i32 to vector<1x8xi32>
    %127 = arith.cmpi slt, %125, %126 : vector<1x8xi32>
    %cst_47 = arith.constant 0.000000e+00 : f32
    %cst_48 = arith.constant -1.000000e+09 : f32
    %128 = vector.broadcast %cst_47 : f32 to vector<1x8xf32>
    %129 = vector.broadcast %cst_48 : f32 to vector<1x8xf32>
    %130 = arith.select %127, %128, %129 : vector<1x8xi1>, vector<1x8xf32>
    %131 = vector.broadcast %130 : vector<1x8xf32> to vector<8x8xf32>
    %132 = arith.addf %122, %131 : vector<8x8xf32>
    %cst_49 = arith.constant dense<0xFF800000> : vector<8xf32>
    %133 = vector.multi_reduction <maximumf>, %132, %cst_49 [1] : vector<8x8xf32> to vector<8xf32>
    %134 = vector.shape_cast %133 : vector<8xf32> to vector<8x1xf32>
    %135 = arith.maximumf %109, %134 : vector<8x1xf32>
    %136 = arith.subf %109, %135 : vector<8x1xf32>
    %137 = math.exp %136 : vector<8x1xf32>
    %138 = vector.broadcast %135 : vector<8x1xf32> to vector<8x8xf32>
    %139 = arith.subf %132, %138 : vector<8x8xf32>
    %140 = math.exp %139 : vector<8x8xf32>
    %141 = arith.mulf %137, %110 : vector<8x1xf32>
    %cst_50 = arith.constant dense<0.000000e+00> : vector<8xf32>
    %142 = vector.multi_reduction <add>, %140, %cst_50 [1] : vector<8x8xf32> to vector<8xf32>
    %143 = vector.shape_cast %142 : vector<8xf32> to vector<8x1xf32>
    %144 = arith.addf %141, %143 : vector<8x1xf32>
    %145 = vector.broadcast %137 : vector<8x1xf32> to vector<8x8xf32>
    %146 = arith.mulf %145, %111 : vector<8x8xf32>
    %cst_51 = arith.constant dense<0.000000e+00> : vector<8x8xf32>
    %147 = tpu.matmul %140, %119, %cst_51 {dimension_numbers = #tpu.dot_dimension_numbers<[1], [0], [0], [1], [0, 0, 1, 1], [], []>} : vector<8x8xf32>, vector<8x8xf32>, vector<8x8xf32> -> vector<8x8xf32>
    %148 = arith.addf %146, %147 : vector<8x8xf32>
    %c1_i32_52 = arith.constant 1 : i32
    %149 = tpu.reciprocal %144 : vector<8x1xf32> -> vector<8x1xf32>
    %150 = vector.broadcast %149 : vector<8x1xf32> to vector<8x8xf32>
    %151 = arith.mulf %148, %150 : vector<8x8xf32>
    %c3 = arith.constant 3 : index
    %152 = arith.index_cast %6 : i32 to index
    %c0_53 = arith.constant 0 : index
    %153 = vector.load %arg10[%c3, %152, %c0_53] : memref<4x8x8xf32, #tpu.memory_space<vmem>>, vector<1x8x8xf32>
    %154 = vector.shape_cast %153 : vector<1x8x8xf32> to vector<8x8xf32>
    %cst_54 = arith.constant 0xFF800000 : f32
    %155 = vector.broadcast %cst_54 : f32 to vector<8x1xf32>
    %cst_55 = arith.constant 0.000000e+00 : f32
    %156 = vector.broadcast %cst_55 : f32 to vector<8x1xf32>
    %cst_56 = arith.constant 0.000000e+00 : f32
    %157 = vector.broadcast %cst_56 : f32 to vector<8x8xf32>
    %c0_i32_57 = arith.constant 0 : i32
    %c8_i32_58 = arith.constant 8 : i32
    %158 = arith.muli %c0_i32_57, %c8_i32_58 : i32
    %159 = tpu.assume_multiple %158, 8 : i32
    %c3_59 = arith.constant 3 : index
    %160 = arith.index_cast %159 : i32 to index
    %c0_60 = arith.constant 0 : index
    %161 = vector.load %arg11[%c3_59, %160, %c0_60] : memref<4x8x8xf32, #tpu.memory_space<vmem>>, vector<1x8x8xf32>
    %162 = vector.shape_cast %161 : vector<1x8x8xf32> to vector<8x8xf32>
    %c3_61 = arith.constant 3 : index
    %163 = arith.index_cast %159 : i32 to index
    %c0_62 = arith.constant 0 : index
    %164 = vector.load %arg12[%c3_61, %163, %c0_62] : memref<4x8x8xf32, #tpu.memory_space<vmem>>, vector<1x8x8xf32>
    %165 = vector.shape_cast %164 : vector<1x8x8xf32> to vector<8x8xf32>
    %cst_63 = arith.constant dense<0.000000e+00> : vector<8x8xf32>
    %166 = tpu.matmul %154, %162, %cst_63 {dimension_numbers = #tpu.dot_dimension_numbers<[1], [1], [0], [0], [0, 0, 1, 0], [], []>} : vector<8x8xf32>, vector<8x8xf32>, vector<8x8xf32> -> vector<8x8xf32>
    %cst_64 = arith.constant 0.353553385 : f32
    %167 = vector.broadcast %cst_64 : f32 to vector<8x8xf32>
    %168 = arith.mulf %166, %167 : vector<8x8xf32>
    %169 = tpu.iota {dimensions = array<i32: 1>} : vector<1x8xi32>
    %170 = vector.broadcast %159 : i32 to vector<1x8xi32>
    %171 = arith.addi %170, %169 : vector<1x8xi32>
    %172 = vector.broadcast %1 : i32 to vector<1x8xi32>
    %173 = arith.cmpi slt, %171, %172 : vector<1x8xi32>
    %cst_65 = arith.constant 0.000000e+00 : f32
    %cst_66 = arith.constant -1.000000e+09 : f32
    %174 = vector.broadcast %cst_65 : f32 to vector<1x8xf32>
    %175 = vector.broadcast %cst_66 : f32 to vector<1x8xf32>
    %176 = arith.select %173, %174, %175 : vector<1x8xi1>, vector<1x8xf32>
    %177 = vector.broadcast %176 : vector<1x8xf32> to vector<8x8xf32>
    %178 = arith.addf %168, %177 : vector<8x8xf32>
    %cst_67 = arith.constant dense<0xFF800000> : vector<8xf32>
    %179 = vector.multi_reduction <maximumf>, %178, %cst_67 [1] : vector<8x8xf32> to vector<8xf32>
    %180 = vector.shape_cast %179 : vector<8xf32> to vector<8x1xf32>
    %181 = arith.maximumf %155, %180 : vector<8x1xf32>
    %182 = arith.subf %155, %181 : vector<8x1xf32>
    %183 = math.exp %182 : vector<8x1xf32>
    %184 = vector.broadcast %181 : vector<8x1xf32> to vector<8x8xf32>
    %185 = arith.subf %178, %184 : vector<8x8xf32>
    %186 = math.exp %185 : vector<8x8xf32>
    %187 = arith.mulf %183, %156 : vector<8x1xf32>
    %cst_68 = arith.constant dense<0.000000e+00> : vector<8xf32>
    %188 = vector.multi_reduction <add>, %186, %cst_68 [1] : vector<8x8xf32> to vector<8xf32>
    %189 = vector.shape_cast %188 : vector<8xf32> to vector<8x1xf32>
    %190 = arith.addf %187, %189 : vector<8x1xf32>
    %191 = vector.broadcast %183 : vector<8x1xf32> to vector<8x8xf32>
    %192 = arith.mulf %191, %157 : vector<8x8xf32>
    %cst_69 = arith.constant dense<0.000000e+00> : vector<8x8xf32>
    %193 = tpu.matmul %186, %165, %cst_69 {dimension_numbers = #tpu.dot_dimension_numbers<[1], [0], [0], [1], [0, 0, 1, 1], [], []>} : vector<8x8xf32>, vector<8x8xf32>, vector<8x8xf32> -> vector<8x8xf32>
    %194 = arith.addf %192, %193 : vector<8x8xf32>
    %c1_i32_70 = arith.constant 1 : i32
    %195 = tpu.reciprocal %190 : vector<8x1xf32> -> vector<8x1xf32>
    %196 = vector.broadcast %195 : vector<8x1xf32> to vector<8x8xf32>
    %197 = arith.mulf %194, %196 : vector<8x8xf32>
    %198 = tpu.concatenate %59, %105, %151, %197 in 1 : vector<8x8xf32>, vector<8x8xf32>, vector<8x8xf32>, vector<8x8xf32> -> vector<8x32xf32>
    %c0_71 = arith.constant 0 : index
    %c0_72 = arith.constant 0 : index
    %199 = vector.load %arg8[%c0_71, %c0_72] : memref<32x32xf32, #tpu.memory_space<vmem>>, vector<32x32xf32>
    %cst_73 = arith.constant dense<0.000000e+00> : vector<8x32xf32>
    %200 = tpu.matmul %198, %199, %cst_73 {dimension_numbers = #tpu.dot_dimension_numbers<[1], [0], [0], [1], [0, 0, 1, 1], [], []>} : vector<8x32xf32>, vector<32x32xf32>, vector<8x32xf32> -> vector<8x32xf32>
    %201 = vector.broadcast %13 : vector<8x1xf32> to vector<8x32xf32>
    %202 = arith.mulf %200, %201 : vector<8x32xf32>
    %c0_74 = arith.constant 0 : index
    %c0_75 = arith.constant 0 : index
    %c0_76 = arith.constant 0 : index
    %203 = vector.load %arg4[%c0_74, %c0_75, %c0_76] : memref<1x8x32xf32, #tpu.memory_space<vmem>>, vector<1x8x32xf32>
    %204 = vector.shape_cast %203 : vector<1x8x32xf32> to vector<8x32xf32>
    %205 = arith.addf %204, %202 : vector<8x32xf32>
    %c0_77 = arith.constant 0 : index
    %c0_78 = arith.constant 0 : index
    %c0_79 = arith.constant 0 : index
    %206 = vector.load %arg9[%c0_77, %c0_78, %c0_79] : memref<1x8x32xf32, #tpu.memory_space<vmem>>, vector<1x8x32xf32>
    %207 = vector.shape_cast %206 : vector<1x8x32xf32> to vector<8x32xf32>
    %208 = vector.shape_cast %205 : vector<8x32xf32> to vector<1x8x32xf32>
    tpu.vector_store %arg9[%c0_77, %c0_78, %c0_79], %208 {strides = array<i32>} : memref<1x8x32xf32, #tpu.memory_space<vmem>>, vector<1x8x32xf32>,
    return
  }
  func.func @transform_0(%arg0: i32, %arg1: i32, %arg2: memref<2xi32, #tpu.memory_space<smem>>) -> (i32, i32, i32) {
    %c0_i32 = arith.constant 0 : i32
    %c0_i32_0 = arith.constant 0 : i32
    %c0_i32_1 = arith.constant 0 : i32
    return %arg0, %c0_i32, %c0_i32_0 : i32, i32, i32
  }
  func.func @transform_1(%arg0: i32, %arg1: i32, %arg2: memref<2xi32, #tpu.memory_space<smem>>) -> (i32, i32, i32) {
    %c0_i32 = arith.constant 0 : i32
    %c0_i32_0 = arith.constant 0 : i32
    return %arg0, %arg1, %c0_i32 : i32, i32, i32
  }
  func.func @transform_2(%arg0: i32, %arg1: i32, %arg2: memref<2xi32, #tpu.memory_space<smem>>) -> (i32, i32) {
    %c0_i32 = arith.constant 0 : i32
    %c0_i32_0 = arith.constant 0 : i32
    %c0_i32_1 = arith.constant 0 : i32
    return %c0_i32, %c0_i32_0 : i32, i32
  }
  func.func @transform_3(%arg0: i32, %arg1: i32, %arg2: memref<2xi32, #tpu.memory_space<smem>>) -> (i32, i32) {
    %c0_i32 = arith.constant 0 : i32
    %c0_i32_0 = arith.constant 0 : i32
    %c0_i32_1 = arith.constant 0 : i32
    return %c0_i32, %c0_i32_0 : i32, i32
  }
  func.func @transform_4(%arg0: i32, %arg1: i32, %arg2: memref<2xi32, #tpu.memory_space<smem>>) -> (i32, i32) {
    %c0_i32 = arith.constant 0 : i32
    %c0_i32_0 = arith.constant 0 : i32
    %c0_i32_1 = arith.constant 0 : i32
    return %c0_i32, %c0_i32_0 : i32, i32
  }
  func.func @transform_5(%arg0: i32, %arg1: i32, %arg2: memref<2xi32, #tpu.memory_space<smem>>) -> (i32, i32) {
    %c0_i32 = arith.constant 0 : i32
    %c0_i32_0 = arith.constant 0 : i32
    %c0_i32_1 = arith.constant 0 : i32
    return %c0_i32, %c0_i32_0 : i32, i32
  }
  func.func @transform_6(%arg0: i32, %arg1: i32, %arg2: memref<2xi32, #tpu.memory_space<smem>>) -> (i32, i32, i32) {
    %c0_i32 = arith.constant 0 : i32
    %c0_i32_0 = arith.constant 0 : i32
    return %arg0, %arg1, %c0_i32 : i32, i32, i32
  }
}

</mosaic_0001>

<bundles_post_ra>
// kernel: tpu_custom_call.1
= control target key start
LH: loop header
LB: loop body
LE: loop exit
PB: predicated region body
PF: predicated region fallthrough
CT: control target
= control target key end

     0   :  { %s2638_s0 = inlined_call_operand.hbm [shape: s32[2], index: 0, kind: input, shape index: {}]   ;;  %s2639_s1 = inlined_call_operand.hbm [shape: f32[2,8,32], index: 1, kind: input, shape index: {}]   ;;  %s2640_s2 = inlined_call_operand.hbm [shape: f32[2,8,32], index: 2, kind: input, shape index: {}]   ;;  %s2641_s3 = inlined_call_operand.hbm [shape: f32[1,32], index: 3, kind: input, shape index: {}]   ;;  %s2642_s4 = inlined_call_operand.hbm [shape: f32[1,32], index: 4, kind: input, shape index: {}]   ;;  %s2643_s5 = inlined_call_operand.hbm [shape: f32[32,96], index: 5, kind: input, shape index: {}]   ;;  %s2644_s6 = inlined_call_operand.hbm [shape: f32[32,32], index: 6, kind: input, shape index: {}]   ;;  %s2645_s7 = inlined_call_operand.hbm [shape: f32[2,8,32], index: 7, kind: output, shape index: {}]  }
   0x1   :  { %2651 = sst [smem:[#allocation27_spill]] %s2641_s3  ;;  %s1837_s26 = scalar_lea.hbm %s2638_s0, 16 }
   0x2   :  { %2652 = sst [smem:[#allocation28_spill]] %s2642_s4  ;;  %p1838_p0 = scmp.ne.s32.totalorder %s2638_s0, %s1837_s26 }
   0x3   :  { %2653 = sst [smem:[#allocation29_spill]] %s2643_s5  ;;  %p1841_p1 = scmp.lt.u32.totalorder %s1837_s26, %s2638_s0 }
   0x4   :  { %2654 = sst [smem:[#allocation30_spill]] %s2644_s6 }
   0x5   :  { %p1843_p2 = pnand %p1841_p1, %p1838_p0 }
   0x7   :  { %1846 = shalt.err (!%p1843_p2)  }
   0x8   :  { %s2121_s8 = smov [#allocation6]  }
   0x9   :  { %13 = dma.hbm_to_smem %s2638_s0, 16, %s2121_s8, [#allocation5] }
   0xa   :  { %2071 = dma.done.wait [#allocation5], 16 }
   0xb   :  { %2072 = vsyncadd [#allocation5], 4294967280 }
   0xc   :  { %15 = sfence }
   0xd   :  { %16 = vsyncpa [#allocation8], 0 }
   0xe   :  { %18 = vsyncpa [#allocation8 + $0x1], 0 }
   0xf   :  { %19 = vsyncpa [#allocation11], 0 }
  0x10   :  { %21 = vsyncpa [#allocation11 + $0x1], 0 }
  0x11   :  { %22 = vsyncpa [#allocation14], 0 }
  0x12   :  { %23 = vsyncpa [#allocation17], 0 }
  0x13   :  { %24 = vsyncpa [#allocation9], 0 }
  0x14   :  { %26 = vsyncpa [#allocation9 + $0x1], 0  ;;  %s2201_s11 = smov 0   ;;  %s2203_s12 = smov 0  }
  0x15   :  { %s2205_s13 = smov 0   ;;  %s2207_s14 = smov 0  }
  0x16   :  { %s2209_s0 = smov 0   ;;  %s2211_s15 = smov 0  }
  0x17 LB: > { %s2232_s16 = sadd.s32 4294967295, %s2119_s15   ;;  %p1540_p3 = scmp.ge.s32.totalorder %s2119_s15, 1  ;;  %s2119_s15 = sphi %s2211_s15, %s32_s15   ;;  %s2115_s0 = sphi %s2209_s0, %s2685_s0   ;;  %s2111_s14 = sphi %s2207_s14, %s2684_s14   ;;  %s2107_s13 = sphi %s2205_s13, %s2683_s13   ;;  %s2103_s12 = sphi %s2203_s12, %s2682_s12   ;;  %s2099_s11 = sphi %s2201_s11, %s2681_s11  }
  0x18   : > { %p2646_p4 = scmp.eq.s32.totalorder %s2232_s16, 0  ;;  %p215_p5 = scmp.lt.s32.totalorder %s2119_s15, 3 }
  0x19   : > { %s2122_s18 = smov [#allocation12]   ;;  %s2123_s20 = smov [#allocation13]  }
  0x1a   : > { %p2237_p6 = pnand %p1540_p3, %p215_p5  ;;  %s228_s19 = sshll.u32 %s2122_s18, 4  ;;  %s229_s19 = int_to_ptr.vmem [resolvable:$true] %s228_s19 }
  0x1b   : > { %s239_s21 = sshll.u32 %s2123_s20, 4  ;;  %s2124_s23 = smov [#allocation15]   ;;  %s2250_s21 = int_to_ptr.vmem [resolvable:$true] %s239_s21 }
  0x1c   : > { %s2655_s17 = scalar_select %p2237_p6, 1, 0 }
  0x1d   : > { %p1704_p8 = pneg %p2237_p6  ;;  %s249_s24 = sshll.u32 %s2124_s23, 4  ;;  %s2252_s24 = int_to_ptr.vmem [resolvable:$true] %s249_s24 }
  0x1e   : > { %s2657_s3 = sld [smem:[#allocation27_spill]] }
  0x1f   : > { %p2246_p9 = pnand %p1704_p8, %p2646_p4 }
  0x21   : > { %p2262_p11 = pneg %p2246_p9 }
  0x24   : > { %s1847_s27 = scalar_lea.hbm %s2657_s3, 16 }
  0x25   : > { %p1848_p10 = scmp.ne.s32.totalorder %s2657_s3, %s1847_s27  ;;  %p1854_p0 = scmp.lt.u32.totalorder %s1847_s27, %s2657_s3 }
  0x27   : > { %p1850_p12 = pnand %p2262_p11, %p1848_p10 }
  0x29   : > { %p1851_p13 = pneg %p1850_p12 }
  0x2b   : > { %p1856_p1 = pnand %p1854_p0, %p1851_p13 }
  0x2d   : > { %1859 = shalt.err (!%p1856_p1)
}
  0x2e   : > { %s1860_s10 = scalar_lea.vmem %s229_s19, 16  ;;  %s1867_s18 = scalar_lea.vmem %s229_s19, 32 }
  0x2f   : > { %p1861_p2 = scmp.ne.s32.totalorder %s229_s19, %s1860_s10  ;;  %p1868_p8 = scmp.lt.s32.totalorder %s229_s19, %s229_s19 }
  0x30   : > { %p1869_p7 = scmp.lt.s32.totalorder %s1867_s18, %s1860_s10 }
  0x31   : > { %p1863_p3 = pnand %p1861_p2, %p2262_p11 }
  0x32   : > { %p1870_p4 = por %p1869_p7, %p1868_p8 }
  0x33   : > { %p1864_p5 = pneg %p1863_p3 }
  0x35   : > { %p1871_p6 = pnand %p1870_p4, %p1864_p5 }
  0x37   : > { %1874 = shalt.err (!%p1871_p6)
}
  0x38   : > { %1707 = dma.hbm_to_vmem [thread:$0]  (!%p2246_p9), %s2657_s3, 16, %s229_s19, [#allocation11]  }
  0x39   : > { %s2659_s4 = sld [smem:[#allocation28_spill]] }
  0x3f   : > { %s1875_s27 = scalar_lea.hbm %s2659_s4, 16 }
  0x40   : > { %p1876_p10 = scmp.ne.s32.totalorder %s2659_s4, %s1875_s27  ;;  %p1882_p4 = scmp.lt.u32.totalorder %s1875_s27, %s2659_s4 }
  0x42   : > { %p1878_p12 = pnand %p1876_p10, %p2262_p11 }
  0x44   : > { %p1879_p7 = pneg %p1878_p12 }
  0x46   : > { %p1884_p6 = pnand %p1882_p4, %p1879_p7 }
  0x48   : > { %1887 = shalt.err (!%p1884_p6)
}
  0x49   : > { %s1888_s19 = scalar_lea.vmem %s2250_s21, 16  ;;  %s1895_s10 = scalar_lea.vmem %s2250_s21, 32 }
  0x4a   : > { %p1889_p13 = scmp.ne.s32.totalorder %s2250_s21, %s1888_s19  ;;  %p1896_p2 = scmp.lt.s32.totalorder %s2250_s21, %s2250_s21 }
  0x4b   : > { %p1897_p3 = scmp.lt.s32.totalorder %s1895_s10, %s1888_s19 }
  0x4c   : > { %p1891_p0 = pnand %p1889_p13, %p2262_p11 }
  0x4d   : > { %p1898_p5 = por %p1897_p3, %p1896_p2 }
  0x4e   : > { %p1892_p1 = pneg %p1891_p0 }
  0x50   : > { %p1899_p8 = pnand %p1898_p5, %p1892_p1 }
  0x52   : > { %1902 = shalt.err (!%p1899_p8)
}
  0x53   : > { %1710 = dma.hbm_to_vmem [thread:$0]  (!%p2246_p9), %s2659_s4, 16, %s2250_s21, [#allocation14]  }
  0x54   : > { %s2660_s5 = sld [smem:[#allocation29_spill]] }
  0x5a   : > { %s1903_s26 = scalar_lea.hbm %s2660_s5, 512 }
  0x5b   : > { %p1904_p10 = scmp.ne.s32.totalorder %s2660_s5, %s1903_s26  ;;  %p1910_p4 = scmp.lt.u32.totalorder %s1903_s26, %s2660_s5 }
  0x5d   : > { %p1906_p12 = pnand %p1904_p10, %p2262_p11 }
  0x5f   : > { %p1907_p7 = pneg %p1906_p12 }
  0x61   : > { %p1912_p6 = pnand %p1910_p4, %p1907_p7 }
  0x63   : > { %1915 = shalt.err (!%p1912_p6)
}
  0x64   : > { %s1916_s21 = scalar_lea.vmem %s2252_s24, 512  ;;  %p1924_p2 = scmp.lt.s32.totalorder %s2252_s24, %s2252_s24 }
  0x65   : > { %p1917_p13 = scmp.ne.s32.totalorder %s2252_s24, %s1916_s21  ;;  %p1925_p3 = scmp.lt.s32.totalorder %s1916_s21, %s1916_s21 }
  0x67   : > { %p1919_p0 = pnand %p1917_p13, %p2262_p11  ;;  %p1926_p5 = por %p1925_p3, %p1924_p2 }
  0x69   : > { %p1920_p1 = pneg %p1919_p0 }
  0x6b   : > { %p1927_p8 = pnand %p1926_p5, %p1920_p1 }
  0x6d   : > { %1930 = shalt.err (!%p1927_p8)
}
  0x6e   : > { %s2125_s9 = smov 128   ;;  %s2126_s19 = smov 8  }
  0x6f   : > { %1713 = dma.hbm_to_vmem [thread:$0]  (!%p2246_p9), %s2660_s5, 512, %s2252_s24, [#allocation14], %s2125_s9, %s2125_s9, %s2126_s19  }
  0x70   : > { %s2127_s20 = smov [#allocation16]   ;;  %s2661_s6 = sld [smem:[#allocation30_spill]] }
  0x71   : > { %s262_s23 = sshll.u32 %s2127_s20, 4  ;;  %s263_s23 = int_to_ptr.vmem [resolvable:$true] %s262_s23 }
  0x76   : > { %s1931_s27 = scalar_lea.hbm %s2661_s6, 512 }
  0x77   : > { %p1932_p10 = scmp.ne.s32.totalorder %s2661_s6, %s1931_s27  ;;  %p1938_p4 = scmp.lt.u32.totalorder %s1931_s27, %s2661_s6 }
  0x79   : > { %p1934_p12 = pnand %p1932_p10, %p2262_p11 }
  0x7b   : > { %p1935_p7 = pneg %p1934_p12 }
  0x7d   : > { %p1940_p6 = pnand %p1938_p4, %p1935_p7 }
  0x7f   : > { %1943 = shalt.err (!%p1940_p6)
}
  0x80   : > { %s1944_s24 = scalar_lea.vmem %s263_s23, 512  ;;  %p1952_p2 = scmp.lt.s32.totalorder %s263_s23, %s263_s23 }
  0x81   : > { %p1945_p13 = scmp.ne.s32.totalorder %s263_s23, %s1944_s24  ;;  %p1953_p3 = scmp.lt.s32.totalorder %s1944_s24, %s1944_s24 }
  0x83   : > { %p1947_p0 = pnand %p1945_p13, %p2262_p11  ;;  %p1954_p5 = por %p1953_p3, %p1952_p2 }
  0x85   : > { %p1948_p1 = pneg %p1947_p0 }
  0x87   : > { %p1955_p8 = pnand %p1954_p5, %p1948_p1 }
  0x89   : > { %1958 = shalt.err (!%p1955_p8)
}
  0x8a   : > { %1716 = dma.hbm_to_vmem [thread:$0]  (!%p2246_p9), %s2661_s6, 512, %s263_s23, [#allocation17], %s2125_s9, %s2125_s9, %s2126_s19  }
  0x8b   : > { %s1539_s30 = sadd.s32 4294967294, %s2119_s15   ;;  %s44_s20 = sadd.s32 1, %s2115_s0 }
  0x8c   : > { %p46_p11 = scmp.ge.s32.totalorder %s44_s20, 2  ;;  %s51_s22 = sadd.s32 1, %s2107_s13 }
  0x8d   : > { %p58_p10 = scmp.ne.s32.totalorder %s2107_s13, %s2103_s12  ;;  %p59_p12 = scmp.eq.s32.totalorder %s2119_s15, 0 }
  0x8e   : > { %s2687_s20 = smov (%p46_p11, %s44_s20), 0  ;;  %p64_p4 = scmp.ne.s32.totalorder %s2103_s12, %s2099_s11 }
  0x8f   : > { %2662 = sst [smem:[#allocation26_spill]] %s2687_s20  ;;  %p2351_p7 = por %p59_p12, %p58_p10 }
  0x90   : > { %s48_s9 = ssub.s32 %s2115_s0, %s2687_s20  ;;  %p202_p9 = scmp.eq.s32.totalorder %s2232_s16, 1 }
  0x91   : > { %p49_p6 = scmp.eq.s32.totalorder %s48_s9, 0  ;;  %p2664_p13 = scmp.eq.s32.totalorder %s2232_s16, 0 }
  0x92   : > { %p2366_p1 = por %p202_p9, %p58_p10  ;;  %p208_p2 = scmp.eq.s32.totalorder %s1539_s30, 1 }
  0x93   : > { %p2362_p0 = por %p2664_p13, %p64_p4  ;;  %p1732_p5 = scmp.lt.s32.totalorder %s2119_s15, 2 }
  0x94   : > { %s2666_s23 = scalar_select %p2366_p1, 1, 0 }
  0x95   : > { %s2665_s19 = scalar_select %p2362_p0, 1, 0 }
  0x96   : > { %s2371_s26 = scalar_select %p49_p6, %s2107_s13, %s51_s22  }
  0x97   : > { %p2373_p3 = por %p208_p2, %p64_p4  ;;  %s276_s28 = sand.u32 1, %s2107_s13  }
  0x98   : > { %s1547_s29 = sshll.u32 %s2115_s0, 7  ;;  %s2380_s8 = sshll.u32 %s276_s28, 3 }
  0x99   : > { %s2667_s27 = scalar_select %p2373_p3, 1, 0 }
  0x9a   : > { %s2385_s10 = scalar_lea.hbm %s2639_s1, %s1547_s29  ;;  %s280_s18 = scalar_lea.vmem [#allocation7], %s2380_s8 }
  0x9b   : > { %s287_s30 = sshll.u32 %s280_s18, 4  ;;  %p2390_p8 = pnand %p1732_p5, %p2351_p7  ;;  %s2394_s30 = int_to_ptr.vmem [resolvable:$true] %s287_s30 }
  0x9c   : > { %s2399_s24 = scalar_lea.hbm %s2640_s2, %s1547_s29  ;;  %s277_s3 = scalar_lea.sflag [#allocation8], %s276_s28 }
  0x9d   : > { %s1959_s4 = scalar_lea.hbm %s2385_s10, 128  ;;  %p1961_p10 = pneg %p2390_p8 }
  0x9e   : > { %p1960_p11 = scmp.ne.s32.totalorder %s2385_s10, %s1959_s4  ;;  %s1964_s5 = scalar_lea.hbm %s2639_s1, 256 }
  0x9f   : > { %p1965_p4 = scmp.lt.u32.totalorder %s2385_s10, %s2639_s1  ;;  %p1966_p9 = scmp.lt.u32.totalorder %s1964_s5, %s1959_s4 }
  0xa0   : > { %p1962_p12 = pnand %p1961_p10, %p1960_p11  ;;  %p1968_p13 = scmp.lt.u32.totalorder %s1959_s4, %s2385_s10 }
  0xa1   : > { %p1967_p6 = por %p1966_p9, %p1965_p4 }
  0xa2   : > { %p1963_p7 = pneg %p1962_p12 }
  0xa3   : > { %p1969_p2 = por %p1968_p13, %p1967_p6 }
  0xa5   : > { %p1970_p5 = pnand %p1969_p2, %p1963_p7 }
  0xa7   : > { %1973 = shalt.err (!%p1970_p5)
}
  0xa8   : > { %s1974_s28 = scalar_lea.vmem %s2394_s30, 128  ;;  %s2128_s29 = smov [#allocation7]  }
  0xa9   : > { %p1975_p11 = scmp.ne.s32.totalorder %s2394_s30, %s1974_s28  ;;  %s1979_s9 = sshll.u32 %s2128_s29, 4  ;;  %s1980_s9 = int_to_ptr.vmem [resolvable:$false] %s1979_s9 }
  0xaa   : > { %s1981_s6 = scalar_lea.vmem %s1980_s9, 256  ;;  %p1982_p1 = scmp.lt.s32.totalorder %s2394_s30, %s1980_s9 }
  0xab   : > { %p1977_p12 = pnand %p1975_p11, %p1961_p10  ;;  %p1983_p4 = scmp.lt.s32.totalorder %s1981_s6, %s1974_s28 }
  0xad   : > { %p1978_p3 = pneg %p1977_p12  ;;  %p1984_p9 = por %p1983_p4, %p1982_p1 }
  0xaf   : > { %p1985_p6 = pnand %p1984_p9, %p1978_p3 }
  0xb1   : > { %1988 = shalt.err (!%p1985_p6)
}
  0xb2   : > { %1720 = dma.hbm_to_vmem [thread:$0]  (!%p2390_p8), %s2385_s10, 128, %s2394_s30, %s277_s3  }
  0xb3   : > { %s294_s4 = sand.u32 1, %s2119_s15   ;;  %s298_s5 = scalar_lea.vmem [#allocation10], %s2380_s8 }
  0xb4   : > { %s306_s20 = sshll.u32 %s298_s5, 4  ;;  %s295_s21 = scalar_lea.sflag [#allocation11], %s294_s4  ;;  %s307_s20 = int_to_ptr.vmem [resolvable:$true] %s306_s20 }
  0xb5   : > { %s1989_s25 = scalar_lea.hbm %s2399_s24, 128  ;;  %s1994_s29 = scalar_lea.hbm %s2640_s2, 256 }
  0xb6   : > { %p1990_p1 = scmp.ne.s32.totalorder %s2399_s24, %s1989_s25  ;;  %p1995_p13 = scmp.lt.u32.totalorder %s2399_s24, %s2640_s2 }
  0xb7   : > { %p1996_p2 = scmp.lt.u32.totalorder %s1994_s29, %s1989_s25  ;;  %p1998_p11 = scmp.lt.u32.totalorder %s1989_s25, %s2399_s24 }
  0xb8   : > { %p1992_p3 = pnand %p1990_p1, %p1961_p10 }
  0xb9   : > { %p1997_p5 = por %p1996_p2, %p1995_p13 }
  0xba   : > { %p1993_p7 = pneg %p1992_p3 }
  0xbb   : > { %p1999_p12 = por %p1998_p11, %p1997_p5 }
  0xbd   : > { %p2000_p4 = pnand %p1999_p12, %p1993_p7 }
  0xbf   : > { %2003 = shalt.err (!%p2000_p4)
}
  0xc0   : > { %s2004_s3 = scalar_lea.vmem %s307_s20, 128  ;;  %s2129_s8 = smov [#allocation10]  }
  0xc1   : > { %p2005_p9 = scmp.ne.s32.totalorder %s307_s20, %s2004_s3  ;;  %s2009_s10 = sshll.u32 %s2129_s8, 4  ;;  %s2010_s10 = int_to_ptr.vmem [resolvable:$false] %s2009_s10 }
  0xc2   : > { %s2011_s30 = scalar_lea.vmem %s2010_s10, 256  ;;  %p2012_p3 = scmp.lt.s32.totalorder %s307_s20, %s2010_s10 }
  0xc3   : > { %p2007_p6 = pnand %p2005_p9, %p1961_p10  ;;  %p2013_p0 = scmp.lt.s32.totalorder %s2011_s30, %s2004_s3 }
  0xc5   : > { %p2008_p1 = pneg %p2007_p6  ;;  %p2014_p2 = por %p2013_p0, %p2012_p3 }
  0xc7   : > { %p2015_p13 = pnand %p2014_p2, %p2008_p1 }
  0xc9   : > { %2018 = shalt.err (!%p2015_p13)
}
  0xca   : > { %1723 = dma.hbm_to_vmem [thread:$0]  (!%p2390_p8), %s2399_s24, 128, %s307_s20, %s295_s21  }
  0xcb   : > { %p2669_p7 = scmp.ne.s32.totalorder %s2655_s17, 0 }
  0xcc   : > { %s2450_s4 = sand.u32 (!%p2669_p7), 1, %s2103_s12   ;;  %p2670_p0 = scmp.ne.s32.totalorder (!%p2669_p7), %s2665_s19, 0 }
  0xcd   : > { %315 = sbr.rel (%p2669_p7) target bundleno = 2200 (0x898), region = 44  ;;  %s2453_s5 = sshll.u32 (!%p2669_p7), %s2450_s4, 3 }
  0xce   : > { %s318_s25 = scalar_lea.sflag (!%p2669_p7), [#allocation8], %s2450_s4  ;;  %s321_s18 = scalar_lea.vmem (!%p2669_p7), [#allocation7], %s2453_s5 }
  0xd4   : > { %2074 = dma.done.wait (%p2670_p0), %s318_s25, 128  }
  0xd5   : > { %2076 = vsyncadd (%p2670_p0), %s318_s25, 4294967168  ;;  %s326_s17 = sand.u32 1, %s2232_s16   ;;  %s330_s24 = scalar_lea.vmem [#allocation10], %s2453_s5 }
  0xd6   : > { %s327_s22 = scalar_lea.sflag [#allocation11], %s326_s17 }
  0xd7   : > { %2078 = dma.done.wait (%p2670_p0), %s327_s22, 128  }
  0xd8   : > { %2080 = vsyncadd (%p2670_p0), %s327_s22, 4294967168  ;;  %p2671_p8 = scmp.eq.s32.totalorder %s2232_s16, 0 }
  0xda   : > { %2082 = dma.done.wait (%p2671_p8), [#allocation11], 16   ;;  %p2672_p10 = pmov %p2671_p8 }
  0xdb   : > { %p2673_p5 = pmov %p2671_p8 }
  0xdc   : > { %2084 = vsyncadd (%p2672_p10), [#allocation11], 4294967280 }
  0xdd   : > { %2086 = dma.done.wait (%p2673_p5), [#allocation14], 528   ;;  %p2674_p11 = pmov %p2673_p5 }
  0xde   : > { %p2675_p12 = pmov %p2673_p5 }
  0xdf   : > { %2088 = vsyncadd (%p2674_p11), [#allocation14], 4294966768 }
  0xe0   : > { %2090 = dma.done.wait (%p2675_p12), [#allocation17], 512   ;;  %p2676_p4 = pmov %p2673_p5 }
  0xe1   : > { %vm386_vm0 = vcmask 261120   ;;  %v385_v0 = vld [vmem:[%s321_s18] sm:$0xff]  ;;  %v419_v9 = vld [vmem:[#allocation15 + $0x10] sm:$0xff]  ;;  %v2130_v10 = vmov 0.0|0.0   ;;  %vm2131_vm1 = vmmov 0   ;;  %v2132_v13 = vmov 0.0  }
  0xe2   : > { %2092 = vsyncadd (%p2676_p4), [#allocation17], 4294966784  ;;  %v387_v1 = vsel %vm386_vm0, %v385_v0, 0.0  ;;  %v417_v7 = vld [vmem:[#allocation15] sm:$0xff]  ;;  %v418_v8 = vld [vmem:[#allocation15 + $0x8] sm:$0xff]  ;;  %1670 = vmatprep.subr.bf16.mxu0 %v2130_v10  ;;  %1616 = vmatprep.mubr.msk.f32.mxu0 %vm2131_vm1, %v2132_v13  ;;  %vm494_vm2 = vcmask 64512   ;;  %v551_v38 = vlaneseq }
  0xe3   : > { %388 = vadd.xlane.f32.xlu0 %v387_v1  ;;  %v1671_v11 = vpack.c.bf16 %v418_v8, %v417_v7  ;;  %v420_v12 = vld [vmem:[#allocation15 + $0x18] sm:$0xff]  ;;  %1619 = vmatprep.subr.mxu1 %v2132_v13  ;;  %s2133_s16 = smov 64   ;;  %s2134_s19 = smov 96   ;;  %v2141_v42 = vmov -1e+09   ;;  %vm1279_vm4 = vcmask 130048  }
  0xe4   : > { %1621 = vmatprep.mubr.msk.f32.mxu1 %vm2131_vm1, %v2132_v13  ;;  %v1674_v14 = vpack.c.bf16 %v420_v12, %v419_v9  ;;  %v1558_v19 = vld [vmem:[#allocation12] ss:$0 sm:$0xff]  ;;  %v1559_v21 = vld [vmem:[#allocation13] ss:$0 sm:$0xff]  ;;  %s2135_s20 = smov 88   ;;  %s2136_s21 = smov 120  }
  0xe5   : > { %1672 = vmatpush3.bf16.msra.mxu0 %v1671_v11  ;;  %s2137_s28 = smov 80   ;;  %s2138_s29 = smov 72   ;;  %v642_v39 = vand.u32 127, %v551_v38  ;;  %vm1281_vm5 = vcmask 195584  }
  0xe6   : > { %1673 = vmatprep.subr.bf16.mxu0 %v2130_v10  ;;  %s2139_s9 = smov 104   ;;  %s2140_s6 = smov 56  }
  0xe7   : > { %s2521_s3 = sld [smem:[#allocation6 + %s2111_s14]]  ;;  %s2142_s8 = smov 112  }
  0xe8   : > { %s2143_s10 = smov 48   ;;  %s2144_s30 = smov 40  }
  0xe9   : > { %1675 = vmatpush3.bf16.msra.mxu0 %v1674_v14  ;;  %s2145_s25 = smov 8   ;;  %s2146_s18 = smov 16  }
  0xea   : > { %1639 = vmatprep.subr.mxu0 %v2132_v13  ;;  %s2147_s17 = smov 24   ;;  %s1579_s22 = sshll.u32 %s2111_s14, 7 }
  0xeb   : > { %p2677_p6 = scmp.ne.s32.totalorder %s2666_s23, 0  ;;  %s2148_s14 = smov [#allocation18]  }
  0xed   : > { %v555_v40 = vstv %s2521_s3 }
  0xee   : > { %vm645_vm3 = vcmp.lt.s32.totalorder %v642_v39, %v555_v40 }
  0xef   : > { %v646_v43 = vsel %vm645_vm3, 0.0, %v2141_v42 }
 0x170   : > { %v389_v2 = vpop.xlane.xlu0 %388 }
 0x171   : > { %v391_v3 = vmul.f32 0.03125, %v389_v2 }
 0x173   : > { %v392_v4 = vsub.f32 %v385_v0, %v391_v3 }
 0x175   : > { %v393_v5 = vmul.f32 %v392_v4, %v392_v4 }
 0x177   : > { %v394_v6 = vsel %vm386_vm0, %v393_v5, 0.0 }
 0x178   : > { %395 = vadd.xlane.f32.xlu0 %v394_v6 }
 0x205   : > { %v396_v15 = vpop.xlane.xlu0 %395 }
 0x206   : > { %v397_v16 = vmul.f32 0.03125, %v396_v15 }
 0x208   : > { %v398_v17 = vadd.f32 1e-05, %v397_v16 }
 0x20a   : > { %1811 = vrsqrt.f32 %v398_v17 }
 0x214   : > { %v1812_v18 = vpop.eup %1811 }
 0x215   : > { %v400_v20 = vmul.f32 %v1812_v18, %v392_v4 }
 0x217   : > { %v408_v22 = vmul.f32 %v1558_v19, %v400_v20 }
 0x219   : > { %v416_v23 = vadd.f32 %v1559_v21, %v408_v22 }
 0x21b   : > { %1617 = vmatmul.mubr.msk.f32.vlgmr.msra.gmra.mrb[0].mxu0 %vm386_vm0, %v416_v23 }
 0x21c   : > { %1641 = vmatprep.mubr.msk.f32.mxu0 %vm2131_vm1, %v2132_v13 }
 0x2ee   : > { %v2492_v24 = vpop.f32.mrb[0].mxu0 }
 0x2ef   : > { %501 = vrot.lane.b32.xlu0 %v2492_v24, %s2133_s16  ;;  %497 = vrot.lane.b32.xlu1 %v2492_v24, %s2134_s19  ;;  %v1618_v25 = vpop.f32.mrb[1].mxu0  ;;  %495 = vst.msk [vmem:[#allocation2] sm:$0xff] %vm494_vm2, %v2492_v24  ;;  %s379_s16 = scalar_lea.vmem [#allocation18], %s2453_s5  ;;  %s2023_s5 = sshll.u32 %s2148_s14, 4  ;;  %s2024_s5 = int_to_ptr.vmem [resolvable:$false] %s2023_s5 }
 0x2f0   : > { %s1380_s19 = sshll.u32 %s379_s16, 4  ;;  %s2590_s19 = int_to_ptr.vmem [resolvable:$true] %s1380_s19 }
 0x2f1   : > { %p2026_p2 = scmp.lt.s32.totalorder %s2590_s19, %s2024_s5 }
 0x2f3   : > { %510 = vrot.lane.b32.xlu0 %v2492_v24, %s2135_s20 }
 0x2f6   : > { %v560_v31 = vld [vmem:[#allocation2] sm:$0xff] }
 0x2f7   : > { %505 = vrot.lane.b32.xlu0 %v2492_v24, %s2136_s21 }
 0x2fb   : > { %525 = vrot.lane.b32.xlu0 %v2492_v24, %s2137_s28  ;;  %s2588_s28 = scalar_lea.hbm %s2645_s7, %s1579_s22 }
 0x2ff   : > { %540 = vrot.lane.b32.xlu0 %v2492_v24, %s2138_s29  ;;  %s1366_s29 = scalar_lea.sflag [#allocation9], %s2450_s4 }
 0x303   : > { %535 = vrot.lane.b32.xlu0 %v2492_v24, %s2139_s9  ;;  %s2025_s9 = scalar_lea.vmem %s2024_s5, 256 }
 0x307   : > { %515 = vrot.lane.b32.xlu0 %v2492_v24, %s2140_s6 }
 0x361   : > { %v502_v26 = vpop.permute.xlu0 %501  ;;  %v498_v27 = vpop.permute.xlu1 %497 }
 0x362   : > { %504 = vst.msk [vmem:[#allocation4] sm:$0xff] %vm494_vm2, %v502_v26  ;;  %500 = vst.msk [vmem:[#allocation3] sm:$0xff] %vm494_vm2, %v498_v27 }
 0x365   : > { %v511_v28 = vpop.permute.xlu0 %510 }
 0x366   : > { %514 = vst.msk [vmem:[#allocation3 + $0x8] sm:$0xff] %vm494_vm2, %v511_v28 }
 0x369   : > { %v506_v29 = vpop.permute.xlu0 %505  ;;  %v561_v30 = vld [vmem:[#allocation3] sm:$0xff] }
 0x36a   : > { %509 = vst.msk [vmem:[#allocation2 + $0x8] sm:$0xff] %vm494_vm2, %v506_v29  ;;  %1620 = vmatpush3.xpose.msk.msra.mxu1 %vm494_vm2, %v561_v30  ;;  %v562_v33 = vld [vmem:[#allocation4] sm:$0xff] }
 0x36b   : > { %1624 = vmatprep.subr.mxu1 %v2132_v13 }
 0x36d   : > { %v526_v32 = vpop.permute.xlu0 %525  ;;  %1622 = vmatmul.mubr.msk.f32.vlgmr.msra.gmra.mrb[0].mxu1 %vm494_vm2, %v560_v31  ;;  %v743_v56 = vld [vmem:[#allocation3 + $0x8] sm:$0xff] }
 0x36e   : > { %529 = vst.msk [vmem:[#allocation3 + $0x10] sm:$0xff] %vm494_vm2, %v526_v32  ;;  %1625 = vmatpush3.msra.mxu1 %v562_v33  ;;  %1626 = vmatprep.mubr.msk.f32.mxu1 %vm2131_vm1, %v2132_v13 }
 0x36f   : > { %1629 = vmatprep.subr.mxu1 %v2132_v13 }
 0x371   : > { %v541_v34 = vpop.permute.xlu0 %540  ;;  %v1565_v57 = vld [vmem:[#allocation2 + $0x8] sm:$0xff] }
 0x372   : > { %544 = vst.msk [vmem:[#allocation3 + $0x18] sm:$0xff] %vm494_vm2, %v541_v34 }
 0x375   : > { %v536_v35 = vpop.permute.xlu0 %535  ;;  %v919_v36 = vld [vmem:[#allocation3 + $0x10] sm:$0xff] }
 0x376   : > { %539 = vst.msk [vmem:[#allocation2 + $0x18] sm:$0xff] %vm494_vm2, %v536_v35  ;;  %1640 = vmatpush3.xpose.msk.msra.mxu0 %vm494_vm2, %v919_v36 }
 0x377   : > { %1649 = vmatprep.subr.mxu0 %v2132_v13 }
 0x379   : > { %v516_v37 = vpop.permute.xlu0 %515  ;;  %v1095_v53 = vld [vmem:[#allocation3 + $0x18] sm:$0xff] }
 0x37a   : > { %519 = vst.msk [vmem:[#allocation4 + $0x8] sm:$0xff] %vm494_vm2, %v516_v37 }
 0x37d   : > { %v1573_v55 = vld [vmem:[#allocation2 + $0x18] sm:$0xff] }
 0x381   : > { %v745_v58 = vld [vmem:[#allocation4 + $0x8] sm:$0xff] }
 0x440   : > { %v636_v41 = vpop.f32.mrb[0].mxu1 }
 0x441   : > { %v640_v44 = vmul.f32 0.35355338, %v636_v41  ;;  %v1623_v45 = vpop.f32.mrb[1].mxu1 }
 0x443   : > { %v647_v46 = vadd.f32 %v646_v43, %v640_v44 }
 0x445   : > { %v648_v47 = vsel %vm494_vm2, %v647_v46, -inf }
 0x446   : > { %649 = vmax.xlane.f32.xlu1 %v648_v47 }
 0x457   : > { %520 = vrot.lane.b32.xlu1 %v2492_v24, %s2142_s8 }
 0x4d3   : > { %v650_v48 = vpop.xlane.xlu1 %649 }
 0x4d4   : > { %v654_v49 = vsub.f32 %v647_v46, %v650_v48  ;;  %v651_v59 = vsub.f32 -inf, %v650_v48 }
 0x4d6   : > { %v655_v50 = vmul.f32 1.442695, %v654_v49  ;;  %v652_v60 = vmul.f32 1.442695, %v651_v59 }
 0x4d7   : > { %v521_v51 = vpop.permute.xlu1 %520 }
 0x4d8   : > { %524 = vst.msk [vmem:[#allocation2 + $0x10] sm:$0xff] %vm494_vm2, %v521_v51  ;;  %1813 = vpow2.f32 %v655_v50 }
 0x4d9   : > { %1815 = vpow2.f32 %v652_v60 }
 0x4df   : > { %v1569_v52 = vld [vmem:[#allocation2 + $0x10] sm:$0xff] }
 0x4e0   : > { %1642 = vmatmul.mubr.msk.f32.vlgmr.msra.gmra.mrb[2].mxu0 %vm494_vm2, %v1569_v52 }
 0x4e1   : > { %1650 = vmatpush3.xpose.msk.msra.mxu0 %vm494_vm2, %v1095_v53  ;;  %1651 = vmatprep.mubr.msk.f32.mxu0 %vm2131_vm1, %v2132_v13 }
 0x4e2   : > { %1676 = vmatprep.subr.bf16.mxu0 %v2130_v10  ;;  %v2535_v54 = vpop.eup %1813 }
 0x4e3   : > { %1627 = vmatmul.mubr.msk.f32.vlgmr.msra.gmra.mrb[2].mxu1 %vm494_vm2, %v2535_v54  ;;  %v1816_v61 = vpop.eup %1815  ;;  %v658_v36 = vsel %vm494_vm2, %v2535_v54, 0.0 }
 0x4e4   : > { %1652 = vmatmul.mubr.msk.f32.vlgmr.msra.gmra.mrb[4].mxu0 %vm494_vm2, %v1573_v55  ;;  %1630 = vmatpush3.xpose.msk.msra.mxu1 %vm494_vm2, %v743_v56  ;;  %v2550_v1 = vmul.f32 0.0, %v1816_v61  ;;  %v1283_v61 = vld [vmem:[#allocation16] sm:$0xff] }
 0x4e5   : > { %1631 = vmatprep.mubr.msk.f32.mxu1 %vm2131_vm1, %v2132_v13  ;;  %1634 = vmatprep.subr.mxu1 %v2132_v13 }
 0x4e6   : > { %1667 = vmatprep.mubr.msk.f32.mxu0 %vm2131_vm1, %v2132_v13 }
 0x4e7   : > { %1632 = vmatmul.mubr.msk.f32.vlgmr.msra.gmra.mrb[4].mxu1 %vm494_vm2, %v1565_v57 }
 0x4e8   : > { %1635 = vmatpush3.msra.mxu1 %v745_v58  ;;  %1636 = vmatprep.mubr.msk.f32.mxu1 %vm2131_vm1, %v2132_v13 }
 0x4e9   : > { %1644 = vmatprep.subr.mxu1 %v2132_v13 }
 0x5b3   : > { %v994_v62 = vpop.f32.mrb[2].mxu0 }
 0x5b4   : > { %v998_v63 = vmul.f32 0.35355338, %v994_v62  ;;  %v1643_v0 = vpop.f32.mrb[3].mxu0  ;;  %v1284_v62 = vld [vmem:[#allocation16 + $0x8] sm:$0xff] }
 0x5b6   : > { %v999_v2 = vadd.f32 %v998_v63, %v646_v43  ;;  %v731_v3 = vpop.f32.mrb[2].mxu1  ;;  %v1677_v63 = vpack.c.bf16 %v1284_v62, %v1283_v61 }
 0x5b7   : > { %v1170_v4 = vpop.f32.mrb[4].mxu0  ;;  %v735_v5 = vadd.f32 %v731_v3, %v2550_v1  ;;  %v1628_v6 = vpop.f32.mrb[3].mxu1  ;;  %v1286_v3 = vld [vmem:[#allocation16 + $0x18] sm:$0xff] }
 0x5b8   : > { %v1174_v7 = vmul.f32 0.35355338, %v1170_v4  ;;  %v1653_v8 = vpop.f32.mrb[5].mxu0  ;;  %v1000_v9 = vsel %vm494_vm2, %v999_v2, -inf  ;;  %1678 = vmatpush3.bf16.msra.mxu0 %v1677_v63 }
 0x5b9   : > { %1001 = vmax.xlane.f32.xlu1 %v1000_v9  ;;  %1679 = vmatprep.subr.bf16.mxu0 %v2130_v10 }
 0x5ba   : > { %v1175_v11 = vadd.f32 %v1174_v7, %v646_v43  ;;  %v818_v12 = vpop.f32.mrb[4].mxu1 }
 0x5bb   : > { %v822_v14 = vmul.f32 0.35355338, %v818_v12  ;;  %v1633_v15 = vpop.f32.mrb[5].mxu1 }
 0x5bc   : > { %v1176_v16 = vsel %vm494_vm2, %v1175_v11, -inf }
 0x5bd   : > { %1177 = vmax.xlane.f32.xlu0 %v1176_v16  ;;  %v823_v17 = vadd.f32 %v822_v14, %v646_v43 }
 0x5bf   : > { %v824_v18 = vsel %vm494_vm2, %v823_v17, -inf }
 0x5c1   : > { %825 = vmax.xlane.f32.xlu0 %v824_v18 }
 0x5ca   : > { %530 = vrot.lane.b32.xlu1 %v2492_v24, %s2143_s10 }
 0x5d7   : > { %545 = vrot.lane.b32.xlu0 %v2492_v24, %s2144_s30 }
 0x646   : > { %v1002_v19 = vpop.xlane.xlu1 %1001 }
 0x647   : > { %v1006_v20 = vsub.f32 %v999_v2, %v1002_v19  ;;  %v1003_v48 = vsub.f32 -inf, %v1002_v19  ;;  %v1285_v2 = vld [vmem:[#allocation16 + $0x10] sm:$0xff] }
 0x648   : > { %v1680_v4 = vpack.c.bf16 %v1286_v3, %v1285_v2 }
 0x649   : > { %v1007_v21 = vmul.f32 1.442695, %v1006_v20  ;;  %v1004_v50 = vmul.f32 1.442695, %v1003_v48 }
 0x64a   : > { %v531_v22 = vpop.permute.xlu1 %530  ;;  %v1178_v23 = vpop.xlane.xlu0 %1177  ;;  %1681 = vmatpush3.bf16.msra.mxu0 %v1680_v4 }
 0x64b   : > { %534 = vst.msk [vmem:[#allocation4 + $0x10] sm:$0xff] %vm494_vm2, %v531_v22  ;;  %v1182_v25 = vsub.f32 %v1175_v11, %v1178_v23  ;;  %1817 = vpow2.f32 %v1007_v21  ;;  %v1179_v51 = vsub.f32 -inf, %v1178_v23 }
 0x64d   : > { %v1183_v26 = vmul.f32 1.442695, %v1182_v25  ;;  %v1180_v52 = vmul.f32 1.442695, %v1179_v51 }
 0x64e   : > { %v826_v27 = vpop.xlane.xlu0 %825 }
 0x64f   : > { %v830_v28 = vsub.f32 %v823_v17, %v826_v27  ;;  %1819 = vpow2.f32 %v1183_v26  ;;  %v827_v47 = vsub.f32 -inf, %v826_v27 }
 0x651   : > { %v831_v29 = vmul.f32 1.442695, %v830_v28  ;;  %v828_v49 = vmul.f32 1.442695, %v827_v47  ;;  %v552_v28 = vshrl.u32 %v551_v38, 7 }
 0x652   : > { %v546_v30 = vpop.permute.xlu0 %545  ;;  %v921_v35 = vld [vmem:[#allocation4 + $0x10] sm:$0xff] }
 0x653   : > { %549 = vst.msk [vmem:[#allocation4 + $0x18] sm:$0xff] %vm494_vm2, %v546_v30  ;;  %1821 = vpow2.f32 %v831_v29  ;;  %vm556_vm6 = vcmp.lt.s32.totalorder %v552_v28, %v555_v40 }
 0x654   : > { %v1561_v29 = vsel %vm556_vm6, 1.0, %v2132_v13 }
 0x655   : > { %v1818_v31 = vpop.eup %1817 }
 0x656   : > { %v1010_v24 = vsel %vm494_vm2, %v1818_v31, 0.0 }
 0x657   : > { %1011 = vadd.xlane.f32.xlu0 %v1010_v24 }
 0x659   : > { %v1820_v32 = vpop.eup %1819 }
 0x65a   : > { %v1186_v33 = vsel %vm494_vm2, %v1820_v32, 0.0  ;;  %v1097_v39 = vld [vmem:[#allocation4 + $0x18] sm:$0xff] }
 0x65b   : > { %1187 = vadd.xlane.f32.xlu0 %v1186_v33 }
 0x65d   : > { %v1822_v34 = vpop.eup %1821 }
 0x65e   : > { %1637 = vmatmul.mubr.msk.f32.vlgmr.msra.gmra.mrb[6].mxu1 %vm494_vm2, %v1822_v34  ;;  %v834_v37 = vsel %vm494_vm2, %v1822_v34, 0.0 }
 0x65f   : > { %1645 = vmatpush3.msra.mxu1 %v921_v35  ;;  %659 = vadd.xlane.f32.xlu0 %v658_v36 }
 0x660   : > { %835 = vadd.xlane.f32.xlu1 %v834_v37  ;;  %1646 = vmatprep.mubr.msk.f32.mxu1 %vm2131_vm1, %v2132_v13 }
 0x661   : > { %1654 = vmatprep.subr.mxu1 %v2132_v13 }
 0x662   : > { %1647 = vmatmul.mubr.msk.f32.vlgmr.msra.gmra.mrb[8].mxu1 %vm494_vm2, %v1818_v31  ;;  %v1362_v31 = vld [vmem:[%s330_s24] sm:$0xff]  ;;  %s2019_s24 = scalar_lea.vmem %s2590_s19, 128 }
 0x663   : > { %1655 = vmatpush3.msra.mxu1 %v1097_v39  ;;  %1656 = vmatprep.mubr.msk.f32.mxu1 %vm2131_vm1, %v2132_v13  ;;  %p2020_p9 = scmp.ne.s32.totalorder %s2590_s19, %s2019_s24  ;;  %p2027_p13 = scmp.lt.s32.totalorder %s2025_s9, %s2019_s24 }
 0x665   : > { %p2021_p1 = pnand %p2020_p9, %p2677_p6  ;;  %p2028_p7 = por %p2027_p13, %p2026_p2 }
 0x666   : > { %1657 = vmatmul.mubr.msk.f32.vlgmr.msra.gmra.mrb[10].mxu1 %vm494_vm2, %v1820_v32 }
 0x667   : > { %p2022_p3 = pneg %p2021_p1 }
 0x669   : > { %p2029_p0 = pnand %p2028_p7, %p2022_p3 }
 0x6e4   : > { %v1012_v41 = vpop.xlane.xlu0 %1011 }
 0x6e8   : > { %v1188_v42 = vpop.xlane.xlu0 %1187 }
 0x6ec   : > { %v660_v43 = vpop.xlane.xlu0 %659 }
 0x6ed   : > { %v661_v44 = vadd.f32 %v660_v43, %v2550_v1  ;;  %v836_v54 = vpop.xlane.xlu1 %835 }
 0x6ef   : > { %1823 = vrcp.f32 %v661_v44 }
 0x6f0   : > { %1825 = vpow2.f32 %v828_v49 }
 0x6f1   : > { %1827 = vpow2.f32 %v1004_v50 }
 0x6f2   : > { %1829 = vpow2.f32 %v1180_v52 }
 0x6f9   : > { %v1824_v45 = vpop.eup %1823 }
 0x6fa   : > { %v737_v46 = vmul.f32 %v1824_v45, %v735_v5  ;;  %v1826_v53 = vpop.eup %1825 }
 0x6fb   : > { %v833_v55 = vmul.f32 0.0, %v1826_v53  ;;  %v1828_v56 = vpop.eup %1827 }
 0x6fc   : > { %v1009_v58 = vmul.f32 0.0, %v1828_v56  ;;  %v1830_v59 = vpop.eup %1829 }
 0x6fd   : > { %v837_v57 = vadd.f32 %v836_v54, %v833_v55  ;;  %v1185_v0 = vmul.f32 0.0, %v1830_v59 }
 0x6fe   : > { %v1013_v60 = vadd.f32 %v1012_v41, %v1009_v58 }
 0x6ff   : > { %1831 = vrcp.f32 %v837_v57  ;;  %v1189_v1 = vadd.f32 %v1188_v42, %v1185_v0 }
 0x700   : > { %1833 = vrcp.f32 %v1013_v60 }
 0x701   : > { %1835 = vrcp.f32 %v1189_v1 }
 0x709   : > { %v1832_v8 = vpop.eup %1831 }
 0x70a   : > { %v1834_v15 = vpop.eup %1833 }
 0x70b   : > { %v1836_v19 = vpop.eup %1835 }
 0x731   : > { %v907_v5 = vpop.f32.mrb[6].mxu1 }
 0x732   : > { %v911_v6 = vadd.f32 %v907_v5, %v833_v55  ;;  %v1638_v7 = vpop.f32.mrb[7].mxu1 }
 0x734   : > { %v913_v9 = vmul.f32 %v1832_v8, %v911_v6 }
 0x735   : > { %v1083_v11 = vpop.f32.mrb[8].mxu1 }
 0x736   : > { %v1087_v12 = vadd.f32 %v1083_v11, %v1009_v58  ;;  %v1648_v14 = vpop.f32.mrb[9].mxu1  ;;  %1267 = vrot.lane.b32.xlu1 %v913_v9, %s2145_s25 }
 0x738   : > { %v1089_v16 = vmul.f32 %v1834_v15, %v1087_v12 }
 0x739   : > { %v1259_v17 = vpop.f32.mrb[10].mxu1 }
 0x73a   : > { %v1263_v18 = vadd.f32 %v1259_v17, %v1185_v0  ;;  %v1658_v10 = vpop.f32.mrb[11].mxu1  ;;  %1271 = vrot.lane.b32.xlu0 %v1089_v16, %s2146_s18 }
 0x73c   : > { %v1265_v20 = vmul.f32 %v1836_v19, %v1263_v18 }
 0x73e   : > { %1275 = vrot.lane.b32.xlu1 %v1265_v20, %s2147_s17 }
 0x7a8   : > { %v1268_v21 = vpop.permute.xlu1 %1267 }
 0x7a9   : > { %v1278_v23 = vsel %vm494_vm2, %v737_v46, %v1268_v21 }
 0x7ac   : > { %v1272_v22 = vpop.permute.xlu0 %1271 }
 0x7ad   : > { %v1280_v25 = vsel %vm1279_vm4, %v1278_v23, %v1272_v22 }
 0x7b0   : > { %v1276_v26 = vpop.permute.xlu1 %1275 }
 0x7b1   : > { %v1282_v27 = vsel %vm1281_vm5, %v1280_v25, %v1276_v26 }
 0x7b2   : > { %1668 = vmatmul.mubr.msk.f32.vlgmr.msra.gmra.mrb[6].mxu0 %vm386_vm0, %v1282_v27 }
 0x885   : > { %v1357_v30 = vpop.f32.mrb[6].mxu0 }
 0x886   : > { %v1361_v24 = vmul.f32 %v1561_v29, %v1357_v30  ;;  %v1669_v32 = vpop.f32.mrb[7].mxu0 }
 0x888   : > { %v1363_v33 = vadd.f32 %v1362_v31, %v1361_v24 }
 0x88a   : > { %1364 = vst.msk [vmem:[%s379_s16] sm:$0xff] %vm386_vm0, %v1363_v33 }
 0x88b   : > { %2032 = shalt.err (!%p2029_p0)
}
 0x88c   : > { %s2033_s4 = scalar_lea.hbm %s2588_s28, 128  ;;  %s2037_s8 = scalar_lea.hbm %s2645_s7, 256 }
 0x88d   : > { %p2034_p8 = scmp.ne.s32.totalorder %s2588_s28, %s2033_s4  ;;  %p2038_p11 = scmp.lt.u32.totalorder %s2588_s28, %s2645_s7 }
 0x88e   : > { %p2039_p12 = scmp.lt.u32.totalorder %s2037_s8, %s2033_s4  ;;  %p2041_p9 = scmp.lt.u32.totalorder %s2033_s4, %s2588_s28 }
 0x88f   : > { %p2035_p10 = pnand %p2034_p8, %p2677_p6 }
 0x890   : > { %p2040_p4 = por %p2039_p12, %p2038_p11 }
 0x891   : > { %p2036_p5 = pneg %p2035_p10 }
 0x892   : > { %p2042_p1 = por %p2041_p9, %p2040_p4 }
 0x894   : > { %p2043_p3 = pnand %p2042_p1, %p2036_p5 }
 0x896   : > { %2046 = shalt.err (!%p2043_p3)
}
 0x897   : > { %1702 = dma.vmem_to_hbm [thread:$0]  (%p2677_p6), %s2590_s19, 128, %s2588_s28, %s1366_s29  }
 0x898 PF: > { %s1392_s25 = sand.u32 1, %s2099_s11   ;;  %p2678_p2 = scmp.ne.s32.totalorder %s2667_s27, 0 }
 0x899   : > { %p2679_p13 = scmp.ge.s32.totalorder %s2119_s15, 2  ;;  %s1393_s18 = scalar_lea.sflag [#allocation9], %s1392_s25 }
 0x89b   : > { %p1725_p7 = pnand %p2679_p13, %p2678_p2 }
 0x89d   : > { %2094 = dma.done.wait (!%p1725_p7), %s1393_s18, 128  }
 0x89e   : > { %2096 = vsyncadd (!%p1725_p7), %s1393_s18, 4294967168  ;;  %s32_s15 = sadd.s32 1, %s2119_s15   ;;  %s2680_s23 = sld [smem:[#allocation26_spill]] }
 0x89f   : > { %p29_p0 = scmp.ge.s32.totalorder %s32_s15, 4   ;;  %s2681_s11 = smov %s2103_s12 }
 0x8a0   : > { %s2682_s12 = smov %s2107_s13  ;;  %s2683_s13 = smov %s2371_s26 }
 0x8a1   : > { %s2684_s14 = smov %s2115_s0  ;;  %31 = sbr.rel (!%p29_p0) target bundleno = 23 (0x17), region = 141 }
 0x8a4   : > { %s2685_s0 = smov %s2680_s23 }
 0x8a8   :  { %1398 = vsyncpa [#allocation8], 1 }
 0x8a9   :  { %1400 = vsyncpa [#allocation8 + $0x1], 1 }
 0x8aa   :  { %1401 = vsyncpa [#allocation11], 1 }
 0x8ab   :  { %1403 = vsyncpa [#allocation11 + $0x1], 1 }
 0x8ac   :  { %1404 = vsyncpa [#allocation14], 1 }
 0x8ad   :  { %1405 = vsyncpa [#allocation17], 1 }
 0x8ae   :  { %1406 = vsyncpa [#allocation9], 1 }
 0x8af   :  { %1408 = vsyncpa [#allocation9 + $0x1], 1 }

// kernel: tpu_custom_call.1
= control target key start
LH: loop header
LB: loop body
LE: loop exit
PB: predicated region body
PF: predicated region fallthrough
CT: control target
= control target key end

     0   :  { %s2638_s0 = inlined_call_operand.hbm [shape: s32[2], index: 0, kind: input, shape index: {}]   ;;  %s2639_s1 = inlined_call_operand.hbm [shape: f32[2,8,32], index: 1, kind: input, shape index: {}]   ;;  %s2640_s2 = inlined_call_operand.hbm [shape: f32[2,8,32], index: 2, kind: input, shape index: {}]   ;;  %s2641_s3 = inlined_call_operand.hbm [shape: f32[1,32], index: 3, kind: input, shape index: {}]   ;;  %s2642_s4 = inlined_call_operand.hbm [shape: f32[1,32], index: 4, kind: input, shape index: {}]   ;;  %s2643_s5 = inlined_call_operand.hbm [shape: f32[32,96], index: 5, kind: input, shape index: {}]   ;;  %s2644_s6 = inlined_call_operand.hbm [shape: f32[32,32], index: 6, kind: input, shape index: {}]   ;;  %s2645_s7 = inlined_call_operand.hbm [shape: f32[2,8,32], index: 7, kind: output, shape index: {}]  }
   0x1   :  { %2651 = sst [smem:[#allocation27_spill]] %s2641_s3  ;;  %s1837_s26 = scalar_lea.hbm %s2638_s0, 16 }
   0x2   :  { %2652 = sst [smem:[#allocation28_spill]] %s2642_s4  ;;  %p1838_p0 = scmp.ne.s32.totalorder %s2638_s0, %s1837_s26 }
   0x3   :  { %2653 = sst [smem:[#allocation29_spill]] %s2643_s5  ;;  %p1841_p1 = scmp.lt.u32.totalorder %s1837_s26, %s2638_s0 }
   0x4   :  { %2654 = sst [smem:[#allocation30_spill]] %s2644_s6 }
   0x5   :  { %p1843_p2 = pnand %p1841_p1, %p1838_p0 }
   0x7   :  { %1846 = shalt.err (!%p1843_p2)  }
   0x8   :  { %s2121_s8 = smov [#allocation6]  }
   0x9   :  { %13 = dma.hbm_to_smem %s2638_s0, 16, %s2121_s8, [#allocation5] }
   0xa   :  { %2071 = dma.done.wait [#allocation5], 16 }
   0xb   :  { %2072 = vsyncadd [#allocation5], 4294967280 }
   0xc   :  { %15 = sfence }
   0xd   :  { %16 = vsyncpa [#allocation8], 0 }
   0xe   :  { %18 = vsyncpa [#allocation8 + $0x1], 0 }
   0xf   :  { %19 = vsyncpa [#allocation11], 0 }
  0x10   :  { %21 = vsyncpa [#allocation11 + $0x1], 0 }
  0x11   :  { %22 = vsyncpa [#allocation14], 0 }
  0x12   :  { %23 = vsyncpa [#allocation17], 0 }
  0x13   :  { %24 = vsyncpa [#allocation9], 0 }
  0x14   :  { %26 = vsyncpa [#allocation9 + $0x1], 0  ;;  %s2201_s11 = smov 0   ;;  %s2203_s12 = smov 0  }
  0x15   :  { %s2205_s13 = smov 0   ;;  %s2207_s14 = smov 0  }
  0x16   :  { %s2209_s0 = smov 0   ;;  %s2211_s15 = smov 0  }
  0x17 LB: > { %s2232_s16 = sadd.s32 4294967295, %s2119_s15   ;;  %p1540_p3 = scmp.ge.s32.totalorder %s2119_s15, 1  ;;  %s2119_s15 = sphi %s2211_s15, %s32_s15   ;;  %s2115_s0 = sphi %s2209_s0, %s2685_s0   ;;  %s2111_s14 = sphi %s2207_s14, %s2684_s14   ;;  %s2107_s13 = sphi %s2205_s13, %s2683_s13   ;;  %s2103_s12 = sphi %s2203_s12, %s2682_s12   ;;  %s2099_s11 = sphi %s2201_s11, %s2681_s11  }
  0x18   : > { %p2646_p4 = scmp.eq.s32.totalorder %s2232_s16, 0  ;;  %p215_p5 = scmp.lt.s32.totalorder %s2119_s15, 3 }
  0x19   : > { %s2122_s18 = smov [#allocation12]   ;;  %s2123_s20 = smov [#allocation13]  }
  0x1a   : > { %p2237_p6 = pnand %p1540_p3, %p215_p5  ;;  %s228_s19 = sshll.u32 %s2122_s18, 4  ;;  %s229_s19 = int_to_ptr.vmem [resolvable:$true] %s228_s19 }
  0x1b   : > { %s239_s21 = sshll.u32 %s2123_s20, 4  ;;  %s2124_s23 = smov [#allocation15]   ;;  %s2250_s21 = int_to_ptr.vmem [resolvable:$true] %s239_s21 }
  0x1c   : > { %s2655_s17 = scalar_select %p2237_p6, 1, 0 }
  0x1d   : > { %p1704_p8 = pneg %p2237_p6  ;;  %s249_s24 = sshll.u32 %s2124_s23, 4  ;;  %s2252_s24 = int_to_ptr.vmem [resolvable:$true] %s249_s24 }
  0x1e   : > { %s2657_s3 = sld [smem:[#allocation27_spill]] }
  0x1f   : > { %p2246_p9 = pnand %p1704_p8, %p2646_p4 }
  0x21   : > { %p2262_p11 = pneg %p2246_p9 }
  0x24   : > { %s1847_s27 = scalar_lea.hbm %s2657_s3, 16 }
  0x25   : > { %p1848_p10 = scmp.ne.s32.totalorder %s2657_s3, %s1847_s27  ;;  %p1854_p0 = scmp.lt.u32.totalorder %s1847_s27, %s2657_s3 }
  0x27   : > { %p1850_p12 = pnand %p2262_p11, %p1848_p10 }
  0x29   : > { %p1851_p13 = pneg %p1850_p12 }
  0x2b   : > { %p1856_p1 = pnand %p1854_p0, %p1851_p13 }
  0x2d   : > { %1859 = shalt.err (!%p1856_p1)
}
  0x2e   : > { %s1860_s10 = scalar_lea.vmem %s229_s19, 16  ;;  %s1867_s18 = scalar_lea.vmem %s229_s19, 32 }
  0x2f   : > { %p1861_p2 = scmp.ne.s32.totalorder %s229_s19, %s1860_s10  ;;  %p1868_p8 = scmp.lt.s32.totalorder %s229_s19, %s229_s19 }
  0x30   : > { %p1869_p7 = scmp.lt.s32.totalorder %s1867_s18, %s1860_s10 }
  0x31   : > { %p1863_p3 = pnand %p1861_p2, %p2262_p11 }
  0x32   : > { %p1870_p4 = por %p1869_p7, %p1868_p8 }
  0x33   : > { %p1864_p5 = pneg %p1863_p3 }
  0x35   : > { %p1871_p6 = pnand %p1870_p4, %p1864_p5 }
  0x37   : > { %1874 = shalt.err (!%p1871_p6)
}
  0x38   : > { %1707 = dma.hbm_to_vmem [thread:$0]  (!%p2246_p9), %s2657_s3, 16, %s229_s19, [#allocation11]  }
  0x39   : > { %s2659_s4 = sld [smem:[#allocation28_spill]] }
  0x3f   : > { %s1875_s27 = scalar_lea.hbm %s2659_s4, 16 }
  0x40   : > { %p1876_p10 = scmp.ne.s32.totalorder %s2659_s4, %s1875_s27  ;;  %p1882_p4 = scmp.lt.u32.totalorder %s1875_s27, %s2659_s4 }
  0x42   : > { %p1878_p12 = pnand %p1876_p10, %p2262_p11 }
  0x44   : > { %p1879_p7 = pneg %p1878_p12 }
  0x46   : > { %p1884_p6 = pnand %p1882_p4, %p1879_p7 }
  0x48   : > { %1887 = shalt.err (!%p1884_p6)
}
  0x49   : > { %s1888_s19 = scalar_lea.vmem %s2250_s21, 16  ;;  %s1895_s10 = scalar_lea.vmem %s2250_s21, 32 }
  0x4a   : > { %p1889_p13 = scmp.ne.s32.totalorder %s2250_s21, %s1888_s19  ;;  %p1896_p2 = scmp.lt.s32.totalorder %s2250_s21, %s2250_s21 }
  0x4b   : > { %p1897_p3 = scmp.lt.s32.totalorder %s1895_s10, %s1888_s19 }
  0x4c   : > { %p1891_p0 = pnand %p1889_p13, %p2262_p11 }
  0x4d   : > { %p1898_p5 = por %p1897_p3, %p1896_p2 }
  0x4e   : > { %p1892_p1 = pneg %p1891_p0 }
  0x50   : > { %p1899_p8 = pnand %p1898_p5, %p1892_p1 }
  0x52   : > { %1902 = shalt.err (!%p1899_p8)
}
  0x53   : > { %1710 = dma.hbm_to_vmem [thread:$0]  (!%p2246_p9), %s2659_s4, 16, %s2250_s21, [#allocation14]  }
  0x54   : > { %s2660_s5 = sld [smem:[#allocation29_spill]] }
  0x5a   : > { %s1903_s26 = scalar_lea.hbm %s2660_s5, 512 }
  0x5b   : > { %p1904_p10 = scmp.ne.s32.totalorder %s2660_s5, %s1903_s26  ;;  %p1910_p4 = scmp.lt.u32.totalorder %s1903_s26, %s2660_s5 }
  0x5d   : > { %p1906_p12 = pnand %p1904_p10, %p2262_p11 }
  0x5f   : > { %p1907_p7 = pneg %p1906_p12 }
  0x61   : > { %p1912_p6 = pnand %p1910_p4, %p1907_p7 }
  0x63   : > { %1915 = shalt.err (!%p1912_p6)
}
  0x64   : > { %s1916_s21 = scalar_lea.vmem %s2252_s24, 512  ;;  %p1924_p2 = scmp.lt.s32.totalorder %s2252_s24, %s2252_s24 }
  0x65   : > { %p1917_p13 = scmp.ne.s32.totalorder %s2252_s24, %s1916_s21  ;;  %p1925_p3 = scmp.lt.s32.totalorder %s1916_s21, %s1916_s21 }
  0x67   : > { %p1919_p0 = pnand %p1917_p13, %p2262_p11  ;;  %p1926_p5 = por %p1925_p3, %p1924_p2 }
  0x69   : > { %p1920_p1 = pneg %p1919_p0 }
  0x6b   : > { %p1927_p8 = pnand %p1926_p5, %p1920_p1 }
  0x6d   : > { %1930 = shalt.err (!%p1927_p8)
}
  0x6e   : > { %s2125_s9 = smov 128   ;;  %s2126_s19 = smov 8  }
  0x6f   : > { %1713 = dma.hbm_to_vmem [thread:$0]  (!%p2246_p9), %s2660_s5, 512, %s2252_s24, [#allocation14], %s2125_s9, %s2125_s9, %s2126_s19  }
  0x70   : > { %s2127_s20 = smov [#allocation16]   ;;  %s2661_s6 = sld [smem:[#allocation30_spill]] }
  0x71   : > { %s262_s23 = sshll.u32 %s2127_s20, 4  ;;  %s263_s23 = int_to_ptr.vmem [resolvable:$true] %s262_s23 }
  0x76   : > { %s1931_s27 = scalar_lea.hbm %s2661_s6, 512 }
  0x77   : > { %p1932_p10 = scmp.ne.s32.totalorder %s2661_s6, %s1931_s27  ;;  %p1938_p4 = scmp.lt.u32.totalorder %s1931_s27, %s2661_s6 }
  0x79   : > { %p1934_p12 = pnand %p1932_p10, %p2262_p11 }
  0x7b   : > { %p1935_p7 = pneg %p1934_p12 }
  0x7d   : > { %p1940_p6 = pnand %p1938_p4, %p1935_p7 }
  0x7f   : > { %1943 = shalt.err (!%p1940_p6)
}
  0x80   : > { %s1944_s24 = scalar_lea.vmem %s263_s23, 512  ;;  %p1952_p2 = scmp.lt.s32.totalorder %s263_s23, %s263_s23 }
  0x81   : > { %p1945_p13 = scmp.ne.s32.totalorder %s263_s23, %s1944_s24  ;;  %p1953_p3 = scmp.lt.s32.totalorder %s1944_s24, %s1944_s24 }
  0x83   : > { %p1947_p0 = pnand %p1945_p13, %p2262_p11  ;;  %p1954_p5 = por %p1953_p3, %p1952_p2 }
  0x85   : > { %p1948_p1 = pneg %p1947_p0 }
  0x87   : > { %p1955_p8 = pnand %p1954_p5, %p1948_p1 }
  0x89   : > { %1958 = shalt.err (!%p1955_p8)
}
  0x8a   : > { %1716 = dma.hbm_to_vmem [thread:$0]  (!%p2246_p9), %s2661_s6, 512, %s263_s23, [#allocation17], %s2125_s9, %s2125_s9, %s2126_s19  }
  0x8b   : > { %s1539_s30 = sadd.s32 4294967294, %s2119_s15   ;;  %s44_s20 = sadd.s32 1, %s2115_s0 }
  0x8c   : > { %p46_p11 = scmp.ge.s32.totalorder %s44_s20, 2  ;;  %s51_s22 = sadd.s32 1, %s2107_s13 }
  0x8d   : > { %p58_p10 = scmp.ne.s32.totalorder %s2107_s13, %s2103_s12  ;;  %p59_p12 = scmp.eq.s32.totalorder %s2119_s15, 0 }
  0x8e   : > { %s2687_s20 = smov (%p46_p11, %s44_s20), 0  ;;  %p64_p4 = scmp.ne.s32.totalorder %s2103_s12, %s2099_s11 }
  0x8f   : > { %2662 = sst [smem:[#allocation26_spill]] %s2687_s20  ;;  %p2351_p7 = por %p59_p12, %p58_p10 }
  0x90   : > { %s48_s9 = ssub.s32 %s2115_s0, %s2687_s20  ;;  %p202_p9 = scmp.eq.s32.totalorder %s2232_s16, 1 }
  0x91   : > { %p49_p6 = scmp.eq.s32.totalorder %s48_s9, 0  ;;  %p2664_p13 = scmp.eq.s32.totalorder %s2232_s16, 0 }
  0x92   : > { %p2366_p1 = por %p202_p9, %p58_p10  ;;  %p208_p2 = scmp.eq.s32.totalorder %s1539_s30, 1 }
  0x93   : > { %p2362_p0 = por %p2664_p13, %p64_p4  ;;  %p1732_p5 = scmp.lt.s32.totalorder %s2119_s15, 2 }
  0x94   : > { %s2666_s23 = scalar_select %p2366_p1, 1, 0 }
  0x95   : > { %s2665_s19 = scalar_select %p2362_p0, 1, 0 }
  0x96   : > { %s2371_s26 = scalar_select %p49_p6, %s2107_s13, %s51_s22  }
  0x97   : > { %p2373_p3 = por %p208_p2, %p64_p4  ;;  %s276_s28 = sand.u32 1, %s2107_s13  }
  0x98   : > { %s1547_s29 = sshll.u32 %s2115_s0, 7  ;;  %s2380_s8 = sshll.u32 %s276_s28, 3 }
  0x99   : > { %s2667_s27 = scalar_select %p2373_p3, 1, 0 }
  0x9a   : > { %s2385_s10 = scalar_lea.hbm %s2639_s1, %s1547_s29  ;;  %s280_s18 = scalar_lea.vmem [#allocation7], %s2380_s8 }
  0x9b   : > { %s287_s30 = sshll.u32 %s280_s18, 4  ;;  %p2390_p8 = pnand %p1732_p5, %p2351_p7  ;;  %s2394_s30 = int_to_ptr.vmem [resolvable:$true] %s287_s30 }
  0x9c   : > { %s2399_s24 = scalar_lea.hbm %s2640_s2, %s1547_s29  ;;  %s277_s3 = scalar_lea.sflag [#allocation8], %s276_s28 }
  0x9d   : > { %s1959_s4 = scalar_lea.hbm %s2385_s10, 128  ;;  %p1961_p10 = pneg %p2390_p8 }
  0x9e   : > { %p1960_p11 = scmp.ne.s32.totalorder %s2385_s10, %s1959_s4  ;;  %s1964_s5 = scalar_lea.hbm %s2639_s1, 256 }
  0x9f   : > { %p1965_p4 = scmp.lt.u32.totalorder %s2385_s10, %s2639_s1  ;;  %p1966_p9 = scmp.lt.u32.totalorder %s1964_s5, %s1959_s4 }
  0xa0   : > { %p1962_p12 = pnand %p1961_p10, %p1960_p11  ;;  %p1968_p13 = scmp.lt.u32.totalorder %s1959_s4, %s2385_s10 }
  0xa1   : > { %p1967_p6 = por %p1966_p9, %p1965_p4 }
  0xa2   : > { %p1963_p7 = pneg %p1962_p12 }
  0xa3   : > { %p1969_p2 = por %p1968_p13, %p1967_p6 }
  0xa5   : > { %p1970_p5 = pnand %p1969_p2, %p1963_p7 }
  0xa7   : > { %1973 = shalt.err (!%p1970_p5)
}
  0xa8   : > { %s1974_s28 = scalar_lea.vmem %s2394_s30, 128  ;;  %s2128_s29 = smov [#allocation7]  }
  0xa9   : > { %p1975_p11 = scmp.ne.s32.totalorder %s2394_s30, %s1974_s28  ;;  %s1979_s9 = sshll.u32 %s2128_s29, 4  ;;  %s1980_s9 = int_to_ptr.vmem [resolvable:$false] %s1979_s9 }
  0xaa   : > { %s1981_s6 = scalar_lea.vmem %s1980_s9, 256  ;;  %p1982_p1 = scmp.lt.s32.totalorder %s2394_s30, %s1980_s9 }
  0xab   : > { %p1977_p12 = pnand %p1975_p11, %p1961_p10  ;;  %p1983_p4 = scmp.lt.s32.totalorder %s1981_s6, %s1974_s28 }
  0xad   : > { %p1978_p3 = pneg %p1977_p12  ;;  %p1984_p9 = por %p1983_p4, %p1982_p1 }
  0xaf   : > { %p1985_p6 = pnand %p1984_p9, %p1978_p3 }
  0xb1   : > { %1988 = shalt.err (!%p1985_p6)
}
  0xb2   : > { %1720 = dma.hbm_to_vmem [thread:$0]  (!%p2390_p8), %s2385_s10, 128, %s2394_s30, %s277_s3  }
  0xb3   : > { %s294_s4 = sand.u32 1, %s2119_s15   ;;  %s298_s5 = scalar_lea.vmem [#allocation10], %s2380_s8 }
  0xb4   : > { %s306_s20 = sshll.u32 %s298_s5, 4  ;;  %s295_s21 = scalar_lea.sflag [#allocation11], %s294_s4  ;;  %s307_s20 = int_to_ptr.vmem [resolvable:$true] %s306_s20 }
  0xb5   : > { %s1989_s25 = scalar_lea.hbm %s2399_s24, 128  ;;  %s1994_s29 = scalar_lea.hbm %s2640_s2, 256 }
  0xb6   : > { %p1990_p1 = scmp.ne.s32.totalorder %s2399_s24, %s1989_s25  ;;  %p1995_p13 = scmp.lt.u32.totalorder %s2399_s24, %s2640_s2 }
  0xb7   : > { %p1996_p2 = scmp.lt.u32.totalorder %s1994_s29, %s1989_s25  ;;  %p1998_p11 = scmp.lt.u32.totalorder %s1989_s25, %s2399_s24 }
  0xb8   : > { %p1992_p3 = pnand %p1990_p1, %p1961_p10 }
  0xb9   : > { %p1997_p5 = por %p1996_p2, %p1995_p13 }
  0xba   : > { %p1993_p7 = pneg %p1992_p3 }
  0xbb   : > { %p1999_p12 = por %p1998_p11, %p1997_p5 }
  0xbd   : > { %p2000_p4 = pnand %p1999_p12, %p1993_p7 }
  0xbf   : > { %2003 = shalt.err (!%p2000_p4)
}
  0xc0   : > { %s2004_s3 = scalar_lea.vmem %s307_s20, 128  ;;  %s2129_s8 = smov [#allocation10]  }
  0xc1   : > { %p2005_p9 = scmp.ne.s32.totalorder %s307_s20, %s2004_s3  ;;  %s2009_s10 = sshll.u32 %s2129_s8, 4  ;;  %s2010_s10 = int_to_ptr.vmem [resolvable:$false] %s2009_s10 }
  0xc2   : > { %s2011_s30 = scalar_lea.vmem %s2010_s10, 256  ;;  %p2012_p3 = scmp.lt.s32.totalorder %s307_s20, %s2010_s10 }
  0xc3   : > { %p2007_p6 = pnand %p2005_p9, %p1961_p10  ;;  %p2013_p0 = scmp.lt.s32.totalorder %s2011_s30, %s2004_s3 }
  0xc5   : > { %p2008_p1 = pneg %p2007_p6  ;;  %p2014_p2 = por %p2013_p0, %p2012_p3 }
  0xc7   : > { %p2015_p13 = pnand %p2014_p2, %p2008_p1 }
  0xc9   : > { %2018 = shalt.err (!%p2015_p13)
}
  0xca   : > { %1723 = dma.hbm_to_vmem [thread:$0]  (!%p2390_p8), %s2399_s24, 128, %s307_s20, %s295_s21  }
  0xcb   : > { %p2669_p7 = scmp.ne.s32.totalorder %s2655_s17, 0 }
  0xcc   : > { %s2450_s4 = sand.u32 (!%p2669_p7), 1, %s2103_s12   ;;  %p2670_p0 = scmp.ne.s32.totalorder (!%p2669_p7), %s2665_s19, 0 }
  0xcd   : > { %315 = sbr.rel (%p2669_p7) target bundleno = 2200 (0x898), region = 44  ;;  %s2453_s5 = sshll.u32 (!%p2669_p7), %s2450_s4, 3 }
  0xce   : > { %s318_s25 = scalar_lea.sflag (!%p2669_p7), [#allocation8], %s2450_s4  ;;  %s321_s18 = scalar_lea.vmem (!%p2669_p7), [#allocation7], %s2453_s5 }
  0xd4   : > { %2074 = dma.done.wait (%p2670_p0), %s318_s25, 128  }
  0xd5   : > { %2076 = vsyncadd (%p2670_p0), %s318_s25, 4294967168  ;;  %s326_s17 = sand.u32 1, %s2232_s16   ;;  %s330_s24 = scalar_lea.vmem [#allocation10], %s2453_s5 }
  0xd6   : > { %s327_s22 = scalar_lea.sflag [#allocation11], %s326_s17 }
  0xd7   : > { %2078 = dma.done.wait (%p2670_p0), %s327_s22, 128  }
  0xd8   : > { %2080 = vsyncadd (%p2670_p0), %s327_s22, 4294967168  ;;  %p2671_p8 = scmp.eq.s32.totalorder %s2232_s16, 0 }
  0xda   : > { %2082 = dma.done.wait (%p2671_p8), [#allocation11], 16   ;;  %p2672_p10 = pmov %p2671_p8 }
  0xdb   : > { %p2673_p5 = pmov %p2671_p8 }
  0xdc   : > { %2084 = vsyncadd (%p2672_p10), [#allocation11], 4294967280 }
  0xdd   : > { %2086 = dma.done.wait (%p2673_p5), [#allocation14], 528   ;;  %p2674_p11 = pmov %p2673_p5 }
  0xde   : > { %p2675_p12 = pmov %p2673_p5 }
  0xdf   : > { %2088 = vsyncadd (%p2674_p11), [#allocation14], 4294966768 }
  0xe0   : > { %2090 = dma.done.wait (%p2675_p12), [#allocation17], 512   ;;  %p2676_p4 = pmov %p2673_p5 }
  0xe1   : > { %vm386_vm0 = vcmask 261120   ;;  %v385_v0 = vld [vmem:[%s321_s18] sm:$0xff]  ;;  %v419_v9 = vld [vmem:[#allocation15 + $0x10] sm:$0xff]  ;;  %v2130_v10 = vmov 0.0|0.0   ;;  %vm2131_vm1 = vmmov 0   ;;  %v2132_v13 = vmov 0.0  }
  0xe2   : > { %2092 = vsyncadd (%p2676_p4), [#allocation17], 4294966784  ;;  %v387_v1 = vsel %vm386_vm0, %v385_v0, 0.0  ;;  %v417_v7 = vld [vmem:[#allocation15] sm:$0xff]  ;;  %v418_v8 = vld [vmem:[#allocation15 + $0x8] sm:$0xff]  ;;  %1670 = vmatprep.subr.bf16.mxu0 %v2130_v10  ;;  %1616 = vmatprep.mubr.msk.f32.mxu0 %vm2131_vm1, %v2132_v13  ;;  %vm494_vm2 = vcmask 64512   ;;  %v551_v38 = vlaneseq }
  0xe3   : > { %388 = vadd.xlane.f32.xlu0 %v387_v1  ;;  %v1671_v11 = vpack.c.bf16 %v418_v8, %v417_v7  ;;  %v420_v12 = vld [vmem:[#allocation15 + $0x18] sm:$0xff]  ;;  %1619 = vmatprep.subr.mxu1 %v2132_v13  ;;  %s2133_s16 = smov 64   ;;  %s2134_s19 = smov 96   ;;  %v2141_v42 = vmov -1e+09   ;;  %vm1279_vm4 = vcmask 130048  }
  0xe4   : > { %1621 = vmatprep.mubr.msk.f32.mxu1 %vm2131_vm1, %v2132_v13  ;;  %v1674_v14 = vpack.c.bf16 %v420_v12, %v419_v9  ;;  %v1558_v19 = vld [vmem:[#allocation12] ss:$0 sm:$0xff]  ;;  %v1559_v21 = vld [vmem:[#allocation13] ss:$0 sm:$0xff]  ;;  %s2135_s20 = smov 88   ;;  %s2136_s21 = smov 120  }
  0xe5   : > { %1672 = vmatpush3.bf16.msra.mxu0 %v1671_v11  ;;  %s2137_s28 = smov 80   ;;  %s2138_s29 = smov 72   ;;  %v642_v39 = vand.u32 127, %v551_v38  ;;  %vm1281_vm5 = vcmask 195584  }
  0xe6   : > { %1673 = vmatprep.subr.bf16.mxu0 %v2130_v10  ;;  %s2139_s9 = smov 104   ;;  %s2140_s6 = smov 56  }
  0xe7   : > { %s2521_s3 = sld [smem:[#allocation6 + %s2111_s14]]  ;;  %s2142_s8 = smov 112  }
  0xe8   : > { %s2143_s10 = smov 48   ;;  %s2144_s30 = smov 40  }
  0xe9   : > { %1675 = vmatpush3.bf16.msra.mxu0 %v1674_v14  ;;  %s2145_s25 = smov 8   ;;  %s2146_s18 = smov 16  }
  0xea   : > { %1639 = vmatprep.subr.mxu0 %v2132_v13  ;;  %s2147_s17 = smov 24   ;;  %s1579_s22 = sshll.u32 %s2111_s14, 7 }
  0xeb   : > { %p2677_p6 = scmp.ne.s32.totalorder %s2666_s23, 0  ;;  %s2148_s14 = smov [#allocation18]  }
  0xed   : > { %v555_v40 = vstv %s2521_s3 }
  0xee   : > { %vm645_vm3 = vcmp.lt.s32.totalorder %v642_v39, %v555_v40 }
  0xef   : > { %v646_v43 = vsel %vm645_vm3, 0.0, %v2141_v42 }
 0x170   : > { %v389_v2 = vpop.xlane.xlu0 %388 }
 0x171   : > { %v391_v3 = vmul.f32 0.03125, %v389_v2 }
 0x173   : > { %v392_v4 = vsub.f32 %v385_v0, %v391_v3 }
 0x175   : > { %v393_v5 = vmul.f32 %v392_v4, %v392_v4 }
 0x177   : > { %v394_v6 = vsel %vm386_vm0, %v393_v5, 0.0 }
 0x178   : > { %395 = vadd.xlane.f32.xlu0 %v394_v6 }
 0x205   : > { %v396_v15 = vpop.xlane.xlu0 %395 }
 0x206   : > { %v397_v16 = vmul.f32 0.03125, %v396_v15 }
 0x208   : > { %v398_v17 = vadd.f32 1e-05, %v397_v16 }
 0x20a   : > { %1811 = vrsqrt.f32 %v398_v17 }
 0x214   : > { %v1812_v18 = vpop.eup %1811 }
 0x215   : > { %v400_v20 = vmul.f32 %v1812_v18, %v392_v4 }
 0x217   : > { %v408_v22 = vmul.f32 %v1558_v19, %v400_v20 }
 0x219   : > { %v416_v23 = vadd.f32 %v1559_v21, %v408_v22 }
 0x21b   : > { %1617 = vmatmul.mubr.msk.f32.vlgmr.msra.gmra.mrb[0].mxu0 %vm386_vm0, %v416_v23 }
 0x21c   : > { %1641 = vmatprep.mubr.msk.f32.mxu0 %vm2131_vm1, %v2132_v13 }
 0x2ee   : > { %v2492_v24 = vpop.f32.mrb[0].mxu0 }
 0x2ef   : > { %501 = vrot.lane.b32.xlu0 %v2492_v24, %s2133_s16  ;;  %497 = vrot.lane.b32.xlu1 %v2492_v24, %s2134_s19  ;;  %v1618_v25 = vpop.f32.mrb[1].mxu0  ;;  %495 = vst.msk [vmem:[#allocation2] sm:$0xff] %vm494_vm2, %v2492_v24  ;;  %s379_s16 = scalar_lea.vmem [#allocation18], %s2453_s5  ;;  %s2023_s5 = sshll.u32 %s2148_s14, 4  ;;  %s2024_s5 = int_to_ptr.vmem [resolvable:$false] %s2023_s5 }
 0x2f0   : > { %s1380_s19 = sshll.u32 %s379_s16, 4  ;;  %s2590_s19 = int_to_ptr.vmem [resolvable:$true] %s1380_s19 }
 0x2f1   : > { %p2026_p2 = scmp.lt.s32.totalorder %s2590_s19, %s2024_s5 }
 0x2f3   : > { %510 = vrot.lane.b32.xlu0 %v2492_v24, %s2135_s20 }
 0x2f6   : > { %v560_v31 = vld [vmem:[#allocation2] sm:$0xff] }
 0x2f7   : > { %505 = vrot.lane.b32.xlu0 %v2492_v24, %s2136_s21 }
 0x2fb   : > { %525 = vrot.lane.b32.xlu0 %v2492_v24, %s2137_s28  ;;  %s2588_s28 = scalar_lea.hbm %s2645_s7, %s1579_s22 }
 0x2ff   : > { %540 = vrot.lane.b32.xlu0 %v2492_v24, %s2138_s29  ;;  %s1366_s29 = scalar_lea.sflag [#allocation9], %s2450_s4 }
 0x303   : > { %535 = vrot.lane.b32.xlu0 %v2492_v24, %s2139_s9  ;;  %s2025_s9 = scalar_lea.vmem %s2024_s5, 256 }
 0x307   : > { %515 = vrot.lane.b32.xlu0 %v2492_v24, %s2140_s6 }
 0x361   : > { %v502_v26 = vpop.permute.xlu0 %501  ;;  %v498_v27 = vpop.permute.xlu1 %497 }
 0x362   : > { %504 = vst.msk [vmem:[#allocation4] sm:$0xff] %vm494_vm2, %v502_v26  ;;  %500 = vst.msk [vmem:[#allocation3] sm:$0xff] %vm494_vm2, %v498_v27 }
 0x365   : > { %v511_v28 = vpop.permute.xlu0 %510 }
 0x366   : > { %514 = vst.msk [vmem:[#allocation3 + $0x8] sm:$0xff] %vm494_vm2, %v511_v28 }
 0x369   : > { %v506_v29 = vpop.permute.xlu0 %505  ;;  %v561_v30 = vld [vmem:[#allocation3] sm:$0xff] }
 0x36a   : > { %509 = vst.msk [vmem:[#allocation2 + $0x8] sm:$0xff] %vm494_vm2, %v506_v29  ;;  %1620 = vmatpush3.xpose.msk.msra.mxu1 %vm494_vm2, %v561_v30  ;;  %v562_v33 = vld [vmem:[#allocation4] sm:$0xff] }
 0x36b   : > { %1624 = vmatprep.subr.mxu1 %v2132_v13 }
 0x36d   : > { %v526_v32 = vpop.permute.xlu0 %525  ;;  %1622 = vmatmul.mubr.msk.f32.vlgmr.msra.gmra.mrb[0].mxu1 %vm494_vm2, %v560_v31  ;;  %v743_v56 = vld [vmem:[#allocation3 + $0x8] sm:$0xff] }
 0x36e   : > { %529 = vst.msk [vmem:[#allocation3 + $0x10] sm:$0xff] %vm494_vm2, %v526_v32  ;;  %1625 = vmatpush3.msra.mxu1 %v562_v33  ;;  %1626 = vmatprep.mubr.msk.f32.mxu1 %vm2131_vm1, %v2132_v13 }
 0x36f   : > { %1629 = vmatprep.subr.mxu1 %v2132_v13 }
 0x371   : > { %v541_v34 = vpop.permute.xlu0 %540  ;;  %v1565_v57 = vld [vmem:[#allocation2 + $0x8] sm:$0xff] }
 0x372   : > { %544 = vst.msk [vmem:[#allocation3 + $0x18] sm:$0xff] %vm494_vm2, %v541_v34 }
 0x375   : > { %v536_v35 = vpop.permute.xlu0 %535  ;;  %v919_v36 = vld [vmem:[#allocation3 + $0x10] sm:$0xff] }
 0x376   : > { %539 = vst.msk [vmem:[#allocation2 + $0x18] sm:$0xff] %vm494_vm2, %v536_v35  ;;  %1640 = vmatpush3.xpose.msk.msra.mxu0 %vm494_vm2, %v919_v36 }
 0x377   : > { %1649 = vmatprep.subr.mxu0 %v2132_v13 }
 0x379   : > { %v516_v37 = vpop.permute.xlu0 %515  ;;  %v1095_v53 = vld [vmem:[#allocation3 + $0x18] sm:$0xff] }
 0x37a   : > { %519 = vst.msk [vmem:[#allocation4 + $0x8] sm:$0xff] %vm494_vm2, %v516_v37 }
 0x37d   : > { %v1573_v55 = vld [vmem:[#allocation2 + $0x18] sm:$0xff] }
 0x381   : > { %v745_v58 = vld [vmem:[#allocation4 + $0x8] sm:$0xff] }
 0x440   : > { %v636_v41 = vpop.f32.mrb[0].mxu1 }
 0x441   : > { %v640_v44 = vmul.f32 0.35355338, %v636_v41  ;;  %v1623_v45 = vpop.f32.mrb[1].mxu1 }
 0x443   : > { %v647_v46 = vadd.f32 %v646_v43, %v640_v44 }
 0x445   : > { %v648_v47 = vsel %vm494_vm2, %v647_v46, -inf }
 0x446   : > { %649 = vmax.xlane.f32.xlu1 %v648_v47 }
 0x457   : > { %520 = vrot.lane.b32.xlu1 %v2492_v24, %s2142_s8 }
 0x4d3   : > { %v650_v48 = vpop.xlane.xlu1 %649 }
 0x4d4   : > { %v654_v49 = vsub.f32 %v647_v46, %v650_v48  ;;  %v651_v59 = vsub.f32 -inf, %v650_v48 }
 0x4d6   : > { %v655_v50 = vmul.f32 1.442695, %v654_v49  ;;  %v652_v60 = vmul.f32 1.442695, %v651_v59 }
 0x4d7   : > { %v521_v51 = vpop.permute.xlu1 %520 }
 0x4d8   : > { %524 = vst.msk [vmem:[#allocation2 + $0x10] sm:$0xff] %vm494_vm2, %v521_v51  ;;  %1813 = vpow2.f32 %v655_v50 }
 0x4d9   : > { %1815 = vpow2.f32 %v652_v60 }
 0x4df   : > { %v1569_v52 = vld [vmem:[#allocation2 + $0x10] sm:$0xff] }
 0x4e0   : > { %1642 = vmatmul.mubr.msk.f32.vlgmr.msra.gmra.mrb[2].mxu0 %vm494_vm2, %v1569_v52 }
 0x4e1   : > { %1650 = vmatpush3.xpose.msk.msra.mxu0 %vm494_vm2, %v1095_v53  ;;  %1651 = vmatprep.mubr.msk.f32.mxu0 %vm2131_vm1, %v2132_v13 }
 0x4e2   : > { %1676 = vmatprep.subr.bf16.mxu0 %v2130_v10  ;;  %v2535_v54 = vpop.eup %1813 }
 0x4e3   : > { %1627 = vmatmul.mubr.msk.f32.vlgmr.msra.gmra.mrb[2].mxu1 %vm494_vm2, %v2535_v54  ;;  %v1816_v61 = vpop.eup %1815  ;;  %v658_v36 = vsel %vm494_vm2, %v2535_v54, 0.0 }
 0x4e4   : > { %1652 = vmatmul.mubr.msk.f32.vlgmr.msra.gmra.mrb[4].mxu0 %vm494_vm2, %v1573_v55  ;;  %1630 = vmatpush3.xpose.msk.msra.mxu1 %vm494_vm2, %v743_v56  ;;  %v2550_v1 = vmul.f32 0.0, %v1816_v61  ;;  %v1283_v61 = vld [vmem:[#allocation16] sm:$0xff] }
 0x4e5   : > { %1631 = vmatprep.mubr.msk.f32.mxu1 %vm2131_vm1, %v2132_v13  ;;  %1634 = vmatprep.subr.mxu1 %v2132_v13 }
 0x4e6   : > { %1667 = vmatprep.mubr.msk.f32.mxu0 %vm2131_vm1, %v2132_v13 }
 0x4e7   : > { %1632 = vmatmul.mubr.msk.f32.vlgmr.msra.gmra.mrb[4].mxu1 %vm494_vm2, %v1565_v57 }
 0x4e8   : > { %1635 = vmatpush3.msra.mxu1 %v745_v58  ;;  %1636 = vmatprep.mubr.msk.f32.mxu1 %vm2131_vm1, %v2132_v13 }
 0x4e9   : > { %1644 = vmatprep.subr.mxu1 %v2132_v13 }
 0x5b3   : > { %v994_v62 = vpop.f32.mrb[2].mxu0 }
 0x5b4   : > { %v998_v63 = vmul.f32 0.35355338, %v994_v62  ;;  %v1643_v0 = vpop.f32.mrb[3].mxu0  ;;  %v1284_v62 = vld [vmem:[#allocation16 + $0x8] sm:$0xff] }
 0x5b6   : > { %v999_v2 = vadd.f32 %v998_v63, %v646_v43  ;;  %v731_v3 = vpop.f32.mrb[2].mxu1  ;;  %v1677_v63 = vpack.c.bf16 %v1284_v62, %v1283_v61 }
 0x5b7   : > { %v1170_v4 = vpop.f32.mrb[4].mxu0  ;;  %v735_v5 = vadd.f32 %v731_v3, %v2550_v1  ;;  %v1628_v6 = vpop.f32.mrb[3].mxu1  ;;  %v1286_v3 = vld [vmem:[#allocation16 + $0x18] sm:$0xff] }
 0x5b8   : > { %v1174_v7 = vmul.f32 0.35355338, %v1170_v4  ;;  %v1653_v8 = vpop.f32.mrb[5].mxu0  ;;  %v1000_v9 = vsel %vm494_vm2, %v999_v2, -inf  ;;  %1678 = vmatpush3.bf16.msra.mxu0 %v1677_v63 }
 0x5b9   : > { %1001 = vmax.xlane.f32.xlu1 %v1000_v9  ;;  %1679 = vmatprep.subr.bf16.mxu0 %v2130_v10 }
 0x5ba   : > { %v1175_v11 = vadd.f32 %v1174_v7, %v646_v43  ;;  %v818_v12 = vpop.f32.mrb[4].mxu1 }
 0x5bb   : > { %v822_v14 = vmul.f32 0.35355338, %v818_v12  ;;  %v1633_v15 = vpop.f32.mrb[5].mxu1 }
 0x5bc   : > { %v1176_v16 = vsel %vm494_vm2, %v1175_v11, -inf }
 0x5bd   : > { %1177 = vmax.xlane.f32.xlu0 %v1176_v16  ;;  %v823_v17 = vadd.f32 %v822_v14, %v646_v43 }
 0x5bf   : > { %v824_v18 = vsel %vm494_vm2, %v823_v17, -inf }
 0x5c1   : > { %825 = vmax.xlane.f32.xlu0 %v824_v18 }
 0x5ca   : > { %530 = vrot.lane.b32.xlu1 %v2492_v24, %s2143_s10 }
 0x5d7   : > { %545 = vrot.lane.b32.xlu0 %v2492_v24, %s2144_s30 }
 0x646   : > { %v1002_v19 = vpop.xlane.xlu1 %1001 }
 0x647   : > { %v1006_v20 = vsub.f32 %v999_v2, %v1002_v19  ;;  %v1003_v48 = vsub.f32 -inf, %v1002_v19  ;;  %v1285_v2 = vld [vmem:[#allocation16 + $0x10] sm:$0xff] }
 0x648   : > { %v1680_v4 = vpack.c.bf16 %v1286_v3, %v1285_v2 }
 0x649   : > { %v1007_v21 = vmul.f32 1.442695, %v1006_v20  ;;  %v1004_v50 = vmul.f32 1.442695, %v1003_v48 }
 0x64a   : > { %v531_v22 = vpop.permute.xlu1 %530  ;;  %v1178_v23 = vpop.xlane.xlu0 %1177  ;;  %1681 = vmatpush3.bf16.msra.mxu0 %v1680_v4 }
 0x64b   : > { %534 = vst.msk [vmem:[#allocation4 + $0x10] sm:$0xff] %vm494_vm2, %v531_v22  ;;  %v1182_v25 = vsub.f32 %v1175_v11, %v1178_v23  ;;  %1817 = vpow2.f32 %v1007_v21  ;;  %v1179_v51 = vsub.f32 -inf, %v1178_v23 }
 0x64d   : > { %v1183_v26 = vmul.f32 1.442695, %v1182_v25  ;;  %v1180_v52 = vmul.f32 1.442695, %v1179_v51 }
 0x64e   : > { %v826_v27 = vpop.xlane.xlu0 %825 }
 0x64f   : > { %v830_v28 = vsub.f32 %v823_v17, %v826_v27  ;;  %1819 = vpow2.f32 %v1183_v26  ;;  %v827_v47 = vsub.f32 -inf, %v826_v27 }
 0x651   : > { %v831_v29 = vmul.f32 1.442695, %v830_v28  ;;  %v828_v49 = vmul.f32 1.442695, %v827_v47  ;;  %v552_v28 = vshrl.u32 %v551_v38, 7 }
 0x652   : > { %v546_v30 = vpop.permute.xlu0 %545  ;;  %v921_v35 = vld [vmem:[#allocation4 + $0x10] sm:$0xff] }
 0x653   : > { %549 = vst.msk [vmem:[#allocation4 + $0x18] sm:$0xff] %vm494_vm2, %v546_v30  ;;  %1821 = vpow2.f32 %v831_v29  ;;  %vm556_vm6 = vcmp.lt.s32.totalorder %v552_v28, %v555_v40 }
 0x654   : > { %v1561_v29 = vsel %vm556_vm6, 1.0, %v2132_v13 }
 0x655   : > { %v1818_v31 = vpop.eup %1817 }
 0x656   : > { %v1010_v24 = vsel %vm494_vm2, %v1818_v31, 0.0 }
 0x657   : > { %1011 = vadd.xlane.f32.xlu0 %v1010_v24 }
 0x659   : > { %v1820_v32 = vpop.eup %1819 }
 0x65a   : > { %v1186_v33 = vsel %vm494_vm2, %v1820_v32, 0.0  ;;  %v1097_v39 = vld [vmem:[#allocation4 + $0x18] sm:$0xff] }
 0x65b   : > { %1187 = vadd.xlane.f32.xlu0 %v1186_v33 }
 0x65d   : > { %v1822_v34 = vpop.eup %1821 }
 0x65e   : > { %1637 = vmatmul.mubr.msk.f32.vlgmr.msra.gmra.mrb[6].mxu1 %vm494_vm2, %v1822_v34  ;;  %v834_v37 = vsel %vm494_vm2, %v1822_v34, 0.0 }
 0x65f   : > { %1645 = vmatpush3.msra.mxu1 %v921_v35  ;;  %659 = vadd.xlane.f32.xlu0 %v658_v36 }
 0x660   : > { %835 = vadd.xlane.f32.xlu1 %v834_v37  ;;  %1646 = vmatprep.mubr.msk.f32.mxu1 %vm2131_vm1, %v2132_v13 }
 0x661   : > { %1654 = vmatprep.subr.mxu1 %v2132_v13 }
 0x662   : > { %1647 = vmatmul.mubr.msk.f32.vlgmr.msra.gmra.mrb[8].mxu1 %vm494_vm2, %v1818_v31  ;;  %v1362_v31 = vld [vmem:[%s330_s24] sm:$0xff]  ;;  %s2019_s24 = scalar_lea.vmem %s2590_s19, 128 }
 0x663   : > { %1655 = vmatpush3.msra.mxu1 %v1097_v39  ;;  %1656 = vmatprep.mubr.msk.f32.mxu1 %vm2131_vm1, %v2132_v13  ;;  %p2020_p9 = scmp.ne.s32.totalorder %s2590_s19, %s2019_s24  ;;  %p2027_p13 = scmp.lt.s32.totalorder %s2025_s9, %s2019_s24 }
 0x665   : > { %p2021_p1 = pnand %p2020_p9, %p2677_p6  ;;  %p2028_p7 = por %p2027_p13, %p2026_p2 }
 0x666   : > { %1657 = vmatmul.mubr.msk.f32.vlgmr.msra.gmra.mrb[10].mxu1 %vm494_vm2, %v1820_v32 }
 0x667   : > { %p2022_p3 = pneg %p2021_p1 }
 0x669   : > { %p2029_p0 = pnand %p2028_p7, %p2022_p3 }
 0x6e4   : > { %v1012_v41 = vpop.xlane.xlu0 %1011 }
 0x6e8   : > { %v1188_v42 = vpop.xlane.xlu0 %1187 }
 0x6ec   : > { %v660_v43 = vpop.xlane.xlu0 %659 }
 0x6ed   : > { %v661_v44 = vadd.f32 %v660_v43, %v2550_v1  ;;  %v836_v54 = vpop.xlane.xlu1 %835 }
 0x6ef   : > { %1823 = vrcp.f32 %v661_v44 }
 0x6f0   : > { %1825 = vpow2.f32 %v828_v49 }
 0x6f1   : > { %1827 = vpow2.f32 %v1004_v50 }
 0x6f2   : > { %1829 = vpow2.f32 %v1180_v52 }
 0x6f9   : > { %v1824_v45 = vpop.eup %1823 }
 0x6fa   : > { %v737_v46 = vmul.f32 %v1824_v45, %v735_v5  ;;  %v1826_v53 = vpop.eup %1825 }
 0x6fb   : > { %v833_v55 = vmul.f32 0.0, %v1826_v53  ;;  %v1828_v56 = vpop.eup %1827 }
 0x6fc   : > { %v1009_v58 = vmul.f32 0.0, %v1828_v56  ;;  %v1830_v59 = vpop.eup %1829 }
 0x6fd   : > { %v837_v57 = vadd.f32 %v836_v54, %v833_v55  ;;  %v1185_v0 = vmul.f32 0.0, %v1830_v59 }
 0x6fe   : > { %v1013_v60 = vadd.f32 %v1012_v41, %v1009_v58 }
 0x6ff   : > { %1831 = vrcp.f32 %v837_v57  ;;  %v1189_v1 = vadd.f32 %v1188_v42, %v1185_v0 }
 0x700   : > { %1833 = vrcp.f32 %v1013_v60 }
 0x701   : > { %1835 = vrcp.f32 %v1189_v1 }
 0x709   : > { %v1832_v8 = vpop.eup %1831 }
 0x70a   : > { %v1834_v15 = vpop.eup %1833 }
 0x70b   : > { %v1836_v19 = vpop.eup %1835 }
 0x731   : > { %v907_v5 = vpop.f32.mrb[6].mxu1 }
 0x732   : > { %v911_v6 = vadd.f32 %v907_v5, %v833_v55  ;;  %v1638_v7 = vpop.f32.mrb[7].mxu1 }
 0x734   : > { %v913_v9 = vmul.f32 %v1832_v8, %v911_v6 }
 0x735   : > { %v1083_v11 = vpop.f32.mrb[8].mxu1 }
 0x736   : > { %v1087_v12 = vadd.f32 %v1083_v11, %v1009_v58  ;;  %v1648_v14 = vpop.f32.mrb[9].mxu1  ;;  %1267 = vrot.lane.b32.xlu1 %v913_v9, %s2145_s25 }
 0x738   : > { %v1089_v16 = vmul.f32 %v1834_v15, %v1087_v12 }
 0x739   : > { %v1259_v17 = vpop.f32.mrb[10].mxu1 }
 0x73a   : > { %v1263_v18 = vadd.f32 %v1259_v17, %v1185_v0  ;;  %v1658_v10 = vpop.f32.mrb[11].mxu1  ;;  %1271 = vrot.lane.b32.xlu0 %v1089_v16, %s2146_s18 }
 0x73c   : > { %v1265_v20 = vmul.f32 %v1836_v19, %v1263_v18 }
 0x73e   : > { %1275 = vrot.lane.b32.xlu1 %v1265_v20, %s2147_s17 }
 0x7a8   : > { %v1268_v21 = vpop.permute.xlu1 %1267 }
 0x7a9   : > { %v1278_v23 = vsel %vm494_vm2, %v737_v46, %v1268_v21 }
 0x7ac   : > { %v1272_v22 = vpop.permute.xlu0 %1271 }
 0x7ad   : > { %v1280_v25 = vsel %vm1279_vm4, %v1278_v23, %v1272_v22 }
 0x7b0   : > { %v1276_v26 = vpop.permute.xlu1 %1275 }
 0x7b1   : > { %v1282_v27 = vsel %vm1281_vm5, %v1280_v25, %v1276_v26 }
 0x7b2   : > { %1668 = vmatmul.mubr.msk.f32.vlgmr.msra.gmra.mrb[6].mxu0 %vm386_vm0, %v1282_v27 }
 0x885   : > { %v1357_v30 = vpop.f32.mrb[6].mxu0 }
 0x886   : > { %v1361_v24 = vmul.f32 %v1561_v29, %v1357_v30  ;;  %v1669_v32 = vpop.f32.mrb[7].mxu0 }
 0x888   : > { %v1363_v33 = vadd.f32 %v1362_v31, %v1361_v24 }
 0x88a   : > { %1364 = vst.msk [vmem:[%s379_s16] sm:$0xff] %vm386_vm0, %v1363_v33 }
 0x88b   : > { %2032 = shalt.err (!%p2029_p0)
}
 0x88c   : > { %s2033_s4 = scalar_lea.hbm %s2588_s28, 128  ;;  %s2037_s8 = scalar_lea.hbm %s2645_s7, 256 }
 0x88d   : > { %p2034_p8 = scmp.ne.s32.totalorder %s2588_s28, %s2033_s4  ;;  %p2038_p11 = scmp.lt.u32.totalorder %s2588_s28, %s2645_s7 }
 0x88e   : > { %p2039_p12 = scmp.lt.u32.totalorder %s2037_s8, %s2033_s4  ;;  %p2041_p9 = scmp.lt.u32.totalorder %s2033_s4, %s2588_s28 }
 0x88f   : > { %p2035_p10 = pnand %p2034_p8, %p2677_p6 }
 0x890   : > { %p2040_p4 = por %p2039_p12, %p2038_p11 }
 0x891   : > { %p2036_p5 = pneg %p2035_p10 }
 0x892   : > { %p2042_p1 = por %p2041_p9, %p2040_p4 }
 0x894   : > { %p2043_p3 = pnand %p2042_p1, %p2036_p5 }
 0x896   : > { %2046 = shalt.err (!%p2043_p3)
}
 0x897   : > { %1702 = dma.vmem_to_hbm [thread:$0]  (%p2677_p6), %s2590_s19, 128, %s2588_s28, %s1366_s29  }
 0x898 PF: > { %s1392_s25 = sand.u32 1, %s2099_s11   ;;  %p2678_p2 = scmp.ne.s32.totalorder %s2667_s27, 0 }
 0x899   : > { %p2679_p13 = scmp.ge.s32.totalorder %s2119_s15, 2  ;;  %s1393_s18 = scalar_lea.sflag [#allocation9], %s1392_s25 }
 0x89b   : > { %p1725_p7 = pnand %p2679_p13, %p2678_p2 }
 0x89d   : > { %2094 = dma.done.wait (!%p1725_p7), %s1393_s18, 128  }
 0x89e   : > { %2096 = vsyncadd (!%p1725_p7), %s1393_s18, 4294967168  ;;  %s32_s15 = sadd.s32 1, %s2119_s15   ;;  %s2680_s23 = sld [smem:[#allocation26_spill]] }
 0x89f   : > { %p29_p0 = scmp.ge.s32.totalorder %s32_s15, 4   ;;  %s2681_s11 = smov %s2103_s12 }
 0x8a0   : > { %s2682_s12 = smov %s2107_s13  ;;  %s2683_s13 = smov %s2371_s26 }
 0x8a1   : > { %s2684_s14 = smov %s2115_s0  ;;  %31 = sbr.rel (!%p29_p0) target bundleno = 23 (0x17), region = 141 }
 0x8a4   : > { %s2685_s0 = smov %s2680_s23 }
 0x8a8   :  { %1398 = vsyncpa [#allocation8], 1 }
 0x8a9   :  { %1400 = vsyncpa [#allocation8 + $0x1], 1 }
 0x8aa   :  { %1401 = vsyncpa [#allocation11], 1 }
 0x8ab   :  { %1403 = vsyncpa [#allocation11 + $0x1], 1 }
 0x8ac   :  { %1404 = vsyncpa [#allocation14], 1 }
 0x8ad   :  { %1405 = vsyncpa [#allocation17], 1 }
 0x8ae   :  { %1406 = vsyncpa [#allocation9], 1 }
 0x8af   :  { %1408 = vsyncpa [#allocation9 + $0x1], 1 }

</bundles_post_ra>
